<compile_context>
chip_gen: v7x
topology: tpu7x:2x2x1
jax: 0.10.0
libtpu: 0.0.40
codegen_flags: <defaults>
</compile_context>

<pallas_src>
import math

import jax
import jax.numpy as jnp
from jax import lax
from jax.experimental import pallas as pl
from jax.experimental.pallas import tpu as pltpu


# ----------------------------------------------------------------------------
# Pallas kernel: entire MultiLevelInteraction forward (incl. VEConv)
# ----------------------------------------------------------------------------
def _mli_kernel(
    # graph data
    node_prev_ref,   # [NP, DP]  resident node table (level-1 features)
    rbf_ref,         # [EB, RP]  edge block of RBF features
    edge_f_ref,      # [EB, DP]  edge block of edge features
    src_ref,         # [EB, 1]   int32 source node index per edge
    dst_ref,         # [1, EB]   int32 destination node index per edge
    # parameters (weights already transposed to [in, out], biases [1, out])
    w_n1_ref, b_n1_ref,    # node_layer1
    w_l1_ref, b_l1_ref,    # VEConv.linear_layer1 (rbf_dim -> dim)
    w_l2_ref, b_l2_ref,    # VEConv.linear_layer2
    w_l3_ref, b_l3_ref,    # VEConv.linear_layer3
    w_e1_ref, b_e1_ref,    # edge_layer1
    w_n2_ref, b_n2_ref,    # node_layer2
    w_n3_ref, b_n3_ref,    # node_layer3
    # outputs
    node_out_ref,    # [NP, DP]  g.ndata['node_level']  (resident accumulator)
    edge_out_ref,    # [EB, DP]  updated g.edata['edge_f'] (edge-tiled)
    # scratch
    new_node_scr,    # [NP, DP]  node_layer1(node_prev)
    agg_scr,         # [NP, DP]  scatter-sum accumulator
):
    f32 = jnp.float32
    e_blk = pl.program_id(0)
    n_blk = pl.num_programs(0)
    EB = rbf_ref.shape[0]
    NP = new_node_scr.shape[0]

    def lin(x, w_ref, b_ref):
        return jnp.dot(x, w_ref[...], preferred_element_type=f32) + b_ref[...]

    def softplus(x):
        # nn.Softplus(beta=0.5, threshold=14):
        #   (1/beta)*log(1+exp(beta*x)) when beta*x <= threshold, else x
        beta, thr = 0.5, 14.0
        z = beta * x
        return jnp.where(z > thr, x,
                         (1.0 / beta) * jnp.log1p(jnp.exp(jnp.minimum(z, thr))))

    # ---- init (first edge block): node_layer1 + zero the accumulator -------
    @pl.when(e_blk == 0)
    def _init():
        new_node_scr[...] = lin(node_prev_ref[...], w_n1_ref, b_n1_ref)
        agg_scr[...] = jnp.zeros_like(agg_scr)

    # ---- per-edge-block VEConv ----------------------------------------------
    # update_rbf: h = linear_layer2(softplus(linear_layer1(rbf)))
    h = lin(softplus(lin(rbf_ref[...], w_l1_ref, b_l1_ref)), w_l2_ref, b_l2_ref)
    # update_edge: edge_f = linear_layer3(edge_f)
    ef3 = lin(edge_f_ref[...], w_l3_ref, b_l3_ref)

    # gather new_node[src] via in-kernel one-hot (MXU), no HBM [E,N] matrix
    src_idx = src_ref[...]                                          # (EB, 1)
    onehot_src = (lax.broadcasted_iota(jnp.int32, (EB, NP), 1)
                  == src_idx).astype(f32)                           # (EB, NP)
    gathered = jnp.dot(onehot_src, new_node_scr[...],
                       preferred_element_type=f32)                  # (EB, DP)

    # message: u_mul_e('new_node','h') + copy_e('edge_f')
    msg = gathered * h + ef3

    # scatter-sum over destination nodes (padded edges have dst == NP -> dropped)
    dst_idx = dst_ref[...]                                          # (1, EB)
    onehot_dst = (lax.broadcasted_iota(jnp.int32, (NP, EB), 0)
                  == dst_idx).astype(f32)                           # (NP, EB)
    agg_scr[...] += jnp.dot(onehot_dst, msg, preferred_element_type=f32)

    # g.edata['edge_f'] = softplus(edge_layer1(edge_f_updated))
    edge_out_ref[...] = softplus(lin(ef3, w_e1_ref, b_e1_ref))

    # ---- finalize (last edge block): node_layer2/3 + residual ---------------
    @pl.when(e_blk == n_blk - 1)
    def _finalize():
        node_1a = softplus(lin(agg_scr[...], w_n2_ref, b_n2_ref))
        node_out_ref[...] = node_prev_ref[...] + lin(node_1a, w_n3_ref, b_n3_ref)


# ----------------------------------------------------------------------------
# Wrapper
# ----------------------------------------------------------------------------
def _round_up(x, m):
    return ((x + m - 1) // m) * m


def _pad2d(x, rows, cols):
    return jnp.pad(x, ((0, rows - x.shape[0]), (0, cols - x.shape[1])))


def multi_level_interaction(node_prev, rbf, edge_f, src, dst, params,
                            *, edge_block=256):
    """params: list of 7 (w [in,out], b [1,out]) tuples in kernel order."""
    N, dim = node_prev.shape
    E, rbf_dim = rbf.shape

    f32 = jnp.float32
    DP = _round_up(dim, 128)      # lane-dense feature dim
    RP = _round_up(rbf_dim, 128)  # lane-dense rbf dim
    NP = _round_up(N, 128)        # aligned node table
    EB = edge_block               # rows per edge block (MXU-aligned)
    E_pad = _round_up(max(E, 1), EB)
    n_eblk = E_pad // EB

    node_prev_p = _pad2d(node_prev.astype(f32), NP, DP)
    rbf_p = _pad2d(rbf.astype(f32), E_pad, RP)
    edge_f_p = _pad2d(edge_f.astype(f32), E_pad, DP)

    # Padded edges: src -> 0 (harmless, message dropped), dst -> NP (out of
    # range, so the in-kernel one-hot column is all zeros and nothing scatters).
    src_p = jnp.pad(src.astype(jnp.int32), (0, E_pad - E),
                    constant_values=0).reshape(E_pad, 1)
    dst_p = jnp.pad(dst.astype(jnp.int32), (0, E_pad - E),
                    constant_values=NP).reshape(1, E_pad)

    in_pads = [DP, RP, DP, DP, DP, DP, DP]
    padded_params = [
        (_pad2d(w.astype(f32), ip, DP), _pad2d(b.astype(f32), 1, DP))
        for (w, b), ip in zip(params, in_pads)
    ]

    inputs = [node_prev_p, rbf_p, edge_f_p, src_p, dst_p]
    in_specs = [
        pl.BlockSpec((NP, DP), lambda e: (0, 0)),   # node table: resident
        pl.BlockSpec((EB, RP), lambda e: (e, 0)),   # rbf: edge-tiled, pipelined
        pl.BlockSpec((EB, DP), lambda e: (e, 0)),   # edge_f: edge-tiled
        pl.BlockSpec((EB, 1), lambda e: (e, 0)),    # src indices
        pl.BlockSpec((1, EB), lambda e: (0, e)),    # dst indices
    ]
    for w, b in padded_params:
        inputs += [w, b]
        in_specs += [pl.BlockSpec(w.shape, lambda e: (0, 0)),   # resident weights
                     pl.BlockSpec(b.shape, lambda e: (0, 0))]   # resident biases

    out_specs = (
        pl.BlockSpec((NP, DP), lambda e: (0, 0)),   # node_out: resident accumulator
        pl.BlockSpec((EB, DP), lambda e: (e, 0)),   # edge_out: edge-tiled, lane-dense
    )

    param_bytes = 4 * sum(int(w.size) + int(b.size) for w, b in padded_params)
    cost = pl.CostEstimate(
        flops=int(2 * (E_pad * RP * DP + 3 * E_pad * DP * DP
                       + 2 * E_pad * NP * DP + 3 * NP * DP * DP)),
        transcendentals=int(2 * (2 * E_pad * DP + NP * DP)),
        bytes_accessed=int(4 * (2 * NP * DP + E_pad * (RP + 2 * DP))
                           + param_bytes),
    )

    node_out_p, edge_out_p = pl.pallas_call(
        _mli_kernel,
        out_shape=(
            jax.ShapeDtypeStruct((NP, DP), f32),
            jax.ShapeDtypeStruct((E_pad, DP), f32),
        ),
        grid_spec=pltpu.PrefetchScalarGridSpec(
            num_scalar_prefetch=0,
            grid=(n_eblk,),
            in_specs=in_specs,
            out_specs=out_specs,
            scratch_shapes=[
                pltpu.VMEM((NP, DP), f32),   # new_node = node_layer1(node_prev)
                pltpu.VMEM((NP, DP), f32),   # scatter-sum accumulator
            ],
        ),
        compiler_params=pltpu.CompilerParams(
            dimension_semantics=("arbitrary",),     # edge axis is a reduction
            vmem_limit_bytes=48 * 1024 * 1024,      # headroom on v7x (64 MiB phys)
        ),
        cost_estimate=cost,
    )(*inputs)

    return node_out_p[:N, :dim], edge_out_p[:E, :dim]


# ----------------------------------------------------------------------------
# Pure-JAX reference (for correctness check)
# ----------------------------------------------------------------------------
def _reference(node_prev, rbf, edge_f, src, dst, params):
    def lin(x, w, b):
        return x @ w + b

    def sp(x):
        z = 0.5 * x
        return jnp.where(z > 14.0, x, 2.0 * jnp.log1p(jnp.exp(jnp.minimum(z, 14.0))))

    (w_n1, b_n1), (w_l1, b_l1), (w_l2, b_l2), (w_l3, b_l3), \
        (w_e1, b_e1), (w_n2, b_n2), (w_n3, b_n3) = params

    new_node = lin(node_prev, w_n1, b_n1)
    h = lin(sp(lin(rbf, w_l1, b_l1)), w_l2, b_l2)
    edge_f3 = lin(edge_f, w_l3, b_l3)
    msg = new_node[src] * h + edge_f3
    node_agg = jnp.zeros_like(new_node).at[dst].add(msg)
    edge_out = sp(lin(edge_f3, w_e1, b_e1))
    node_1a = sp(lin(node_agg, w_n2, b_n2))
    node_out = node_prev + lin(node_1a, w_n3, b_n3)
    return node_out, edge_out


# ----------------------------------------------------------------------------
# Deterministic parameter init (PyTorch nn.Linear style uniform bounds)
# ----------------------------------------------------------------------------
def _init_linear(key, fan_in, fan_out):
    k1, k2 = jax.random.split(key)
    bound = 1.0 / math.sqrt(fan_in)
    w = jax.random.uniform(k1, (fan_in, fan_out), jnp.float32, -bound, bound)
    b = jax.random.uniform(k2, (1, fan_out), jnp.float32, -bound, bound)
    return w, b


if __name__ == "__main__":
    N, E, dim, rbf_dim = 8, 16, 32, 16

    key = jax.random.PRNGKey(0)
    keys = jax.random.split(key, 12)

    node_prev = jax.random.normal(keys[0], (N, dim), jnp.float32)
    rbf = jax.random.normal(keys[1], (E, rbf_dim), jnp.float32)
    edge_f = jax.random.normal(keys[2], (E, dim), jnp.float32)
    src = jax.random.randint(keys[3], (E,), 0, N)
    dst = jax.random.randint(keys[4], (E,), 0, N)

    params = [
        _init_linear(keys[5], dim, dim),        # node_layer1
        _init_linear(keys[6], rbf_dim, dim),    # VEConv.linear_layer1
        _init_linear(keys[7], dim, dim),        # VEConv.linear_layer2
        _init_linear(keys[8], dim, dim),        # VEConv.linear_layer3
        _init_linear(keys[9], dim, dim),        # edge_layer1
        _init_linear(keys[10], dim, dim),       # node_layer2
        _init_linear(keys[11], dim, dim),       # node_layer3
    ]

    node_out, edge_out = multi_level_interaction(node_prev, rbf, edge_f, src, dst, params)
    jax.block_until_ready((node_out, edge_out))

    node_ref, edge_ref = _reference(node_prev, rbf, edge_f, src, dst, params)
    assert jnp.allclose(node_out, node_ref, atol=1e-4, rtol=1e-4), "node output mismatch"
    assert jnp.allclose(edge_out, edge_ref, atol=1e-4, rtol=1e-4), "edge output mismatch"

    print("KERNEL_OK")
</pallas_src>

<mosaic_0001>
module attributes {stable_mosaic.version = 11 : i64} {
  func.func @_mli_kernel(%arg0: i32, %arg1: memref<128x128xf32, #tpu.memory_space<vmem>>, %arg2: memref<256x128xf32, #tpu.memory_space<vmem>>, %arg3: memref<256x128xf32, #tpu.memory_space<vmem>>, %arg4: memref<256x1xi32, #tpu.memory_space<vmem>>, %arg5: memref<1x256xi32, #tpu.memory_space<vmem>>, %arg6: memref<128x128xf32, #tpu.memory_space<vmem>>, %arg7: memref<1x128xf32, #tpu.memory_space<vmem>>, %arg8: memref<128x128xf32, #tpu.memory_space<vmem>>, %arg9: memref<1x128xf32, #tpu.memory_space<vmem>>, %arg10: memref<128x128xf32, #tpu.memory_space<vmem>>, %arg11: memref<1x128xf32, #tpu.memory_space<vmem>>, %arg12: memref<128x128xf32, #tpu.memory_space<vmem>>, %arg13: memref<1x128xf32, #tpu.memory_space<vmem>>, %arg14: memref<128x128xf32, #tpu.memory_space<vmem>>, %arg15: memref<1x128xf32, #tpu.memory_space<vmem>>, %arg16: memref<128x128xf32, #tpu.memory_space<vmem>>, %arg17: memref<1x128xf32, #tpu.memory_space<vmem>>, %arg18: memref<128x128xf32, #tpu.memory_space<vmem>>, %arg19: memref<1x128xf32, #tpu.memory_space<vmem>>, %arg20: memref<128x128xf32, #tpu.memory_space<vmem>>, %arg21: memref<256x128xf32, #tpu.memory_space<vmem>>, %arg22: memref<128x128xf32, #tpu.memory_space<vmem>>, %arg23: memref<128x128xf32, #tpu.memory_space<vmem>>) attributes {dimension_semantics = [#tpu.dimension_semantics<arbitrary>], iteration_bounds = array<i64: 1>, scalar_prefetch = 0 : i64, scratch_operands = 2 : i64, tpu.core_type = #tpu.core_type<tc>, window_params = [{pipeline_mode = #tpu.pipeline_mode<synchronous>, transform_indices = @transform_0, window_bounds = array<i64: 128, 128>}, {transform_indices = @transform_1, window_bounds = array<i64: 256, 128>}, {transform_indices = @transform_2, window_bounds = array<i64: 256, 128>}, {transform_indices = @transform_3, window_bounds = array<i64: 256, 1>}, {transform_indices = @transform_4, window_bounds = array<i64: 1, 256>}, {pipeline_mode = #tpu.pipeline_mode<synchronous>, transform_indices = @transform_5, window_bounds = array<i64: 128, 128>}, {pipeline_mode = #tpu.pipeline_mode<synchronous>, transform_indices = @transform_6, window_bounds = array<i64: 1, 128>}, {pipeline_mode = #tpu.pipeline_mode<synchronous>, transform_indices = @transform_7, window_bounds = array<i64: 128, 128>}, {pipeline_mode = #tpu.pipeline_mode<synchronous>, transform_indices = @transform_8, window_bounds = array<i64: 1, 128>}, {pipeline_mode = #tpu.pipeline_mode<synchronous>, transform_indices = @transform_9, window_bounds = array<i64: 128, 128>}, {pipeline_mode = #tpu.pipeline_mode<synchronous>, transform_indices = @transform_10, window_bounds = array<i64: 1, 128>}, {pipeline_mode = #tpu.pipeline_mode<synchronous>, transform_indices = @transform_11, window_bounds = array<i64: 128, 128>}, {pipeline_mode = #tpu.pipeline_mode<synchronous>, transform_indices = @transform_12, window_bounds = array<i64: 1, 128>}, {pipeline_mode = #tpu.pipeline_mode<synchronous>, transform_indices = @transform_13, window_bounds = array<i64: 128, 128>}, {pipeline_mode = #tpu.pipeline_mode<synchronous>, transform_indices = @transform_14, window_bounds = array<i64: 1, 128>}, {pipeline_mode = #tpu.pipeline_mode<synchronous>, transform_indices = @transform_15, window_bounds = array<i64: 128, 128>}, {pipeline_mode = #tpu.pipeline_mode<synchronous>, transform_indices = @transform_16, window_bounds = array<i64: 1, 128>}, {pipeline_mode = #tpu.pipeline_mode<synchronous>, transform_indices = @transform_17, window_bounds = array<i64: 128, 128>}, {pipeline_mode = #tpu.pipeline_mode<synchronous>, transform_indices = @transform_18, window_bounds = array<i64: 1, 128>}, {pipeline_mode = #tpu.pipeline_mode<synchronous>, transform_indices = @transform_19, window_bounds = array<i64: 128, 128>}, {transform_indices = @transform_20, window_bounds = array<i64: 256, 128>}]} {
    %c0_i32 = arith.constant 0 : i32
    %0 = arith.cmpi eq, %arg0, %c0_i32 : i32
    %1 = arith.extui %0 : i1 to i32
    %c0_i32_0 = arith.constant 0 : i32
    %2 = arith.cmpi ne, %1, %c0_i32_0 : i32
    scf.if %2 {
      %c0_47 = arith.constant 0 : index
      %c0_48 = arith.constant 0 : index
      %71 = vector.load %arg1[%c0_47, %c0_48] : memref<128x128xf32, #tpu.memory_space<vmem>>, vector<128x128xf32>
      %c0_49 = arith.constant 0 : index
      %c0_50 = arith.constant 0 : index
      %72 = vector.load %arg6[%c0_49, %c0_50] : memref<128x128xf32, #tpu.memory_space<vmem>>, vector<128x128xf32>
      %cst_51 = arith.constant dense<0.000000e+00> : vector<128x128xf32>
      %73 = tpu.matmul %71, %72, %cst_51 {dimension_numbers = #tpu.dot_dimension_numbers<[1], [0], [0], [1], [0, 0, 1, 1], [], []>} : vector<128x128xf32>, vector<128x128xf32>, vector<128x128xf32> -> vector<128x128xf32>
      %c0_52 = arith.constant 0 : index
      %c0_53 = arith.constant 0 : index
      %74 = vector.load %arg7[%c0_52, %c0_53] : memref<1x128xf32, #tpu.memory_space<vmem>>, vector<1x128xf32>
      %75 = vector.broadcast %74 : vector<1x128xf32> to vector<128x128xf32>
      %76 = arith.addf %73, %75 : vector<128x128xf32>
      %c0_54 = arith.constant 0 : index
      %c0_55 = arith.constant 0 : index
      %77 = vector.load %arg22[%c0_54, %c0_55] : memref<128x128xf32, #tpu.memory_space<vmem>>, vector<128x128xf32>
      tpu.vector_store %arg22[%c0_54, %c0_55], %76 {strides = array<i32>} : memref<128x128xf32, #tpu.memory_space<vmem>>, vector<128x128xf32>,
      %cst_56 = arith.constant 0.000000e+00 : f32
      %78 = vector.broadcast %cst_56 : f32 to vector<128x128xf32>
      %c0_57 = arith.constant 0 : index
      %c0_58 = arith.constant 0 : index
      %79 = vector.load %arg23[%c0_57, %c0_58] : memref<128x128xf32, #tpu.memory_space<vmem>>, vector<128x128xf32>
      tpu.vector_store %arg23[%c0_57, %c0_58], %78 {strides = array<i32>} : memref<128x128xf32, #tpu.memory_space<vmem>>, vector<128x128xf32>,
    } else {
    }
    %c0 = arith.constant 0 : index
    %c0_1 = arith.constant 0 : index
    %3 = vector.load %arg2[%c0, %c0_1] : memref<256x128xf32, #tpu.memory_space<vmem>>, vector<256x128xf32>
    %c0_2 = arith.constant 0 : index
    %c0_3 = arith.constant 0 : index
    %4 = vector.load %arg8[%c0_2, %c0_3] : memref<128x128xf32, #tpu.memory_space<vmem>>, vector<128x128xf32>
    %cst = arith.constant dense<0.000000e+00> : vector<256x128xf32>
    %5 = tpu.matmul %3, %4, %cst {dimension_numbers = #tpu.dot_dimension_numbers<[1], [0], [0], [1], [0, 0, 1, 1], [], []>} : vector<256x128xf32>, vector<128x128xf32>, vector<256x128xf32> -> vector<256x128xf32>
    %c0_4 = arith.constant 0 : index
    %c0_5 = arith.constant 0 : index
    %6 = vector.load %arg9[%c0_4, %c0_5] : memref<1x128xf32, #tpu.memory_space<vmem>>, vector<1x128xf32>
    %7 = vector.broadcast %6 : vector<1x128xf32> to vector<256x128xf32>
    %8 = arith.addf %5, %7 : vector<256x128xf32>
    %cst_6 = arith.constant 5.000000e-01 : f32
    %9 = vector.broadcast %cst_6 : f32 to vector<256x128xf32>
    %10 = arith.mulf %9, %8 : vector<256x128xf32>
    %cst_7 = arith.constant 1.400000e+01 : f32
    %11 = vector.broadcast %cst_7 : f32 to vector<256x128xf32>
    %12 = arith.cmpf ogt, %10, %11 : vector<256x128xf32>
    %cst_8 = arith.constant 1.400000e+01 : f32
    %13 = vector.broadcast %cst_8 : f32 to vector<256x128xf32>
    %14 = arith.minimumf %10, %13 : vector<256x128xf32>
    %15 = math.exp %14 : vector<256x128xf32>
    %16 = math.log1p %15 : vector<256x128xf32>
    %cst_9 = arith.constant 2.000000e+00 : f32
    %17 = vector.broadcast %cst_9 : f32 to vector<256x128xf32>
    %18 = arith.mulf %17, %16 : vector<256x128xf32>
    %19 = arith.select %12, %8, %18 : vector<256x128xi1>, vector<256x128xf32>
    %c0_10 = arith.constant 0 : index
    %c0_11 = arith.constant 0 : index
    %20 = vector.load %arg10[%c0_10, %c0_11] : memref<128x128xf32, #tpu.memory_space<vmem>>, vector<128x128xf32>
    %cst_12 = arith.constant dense<0.000000e+00> : vector<256x128xf32>
    %21 = tpu.matmul %19, %20, %cst_12 {dimension_numbers = #tpu.dot_dimension_numbers<[1], [0], [0], [1], [0, 0, 1, 1], [], []>} : vector<256x128xf32>, vector<128x128xf32>, vector<256x128xf32> -> vector<256x128xf32>
    %c0_13 = arith.constant 0 : index
    %c0_14 = arith.constant 0 : index
    %22 = vector.load %arg11[%c0_13, %c0_14] : memref<1x128xf32, #tpu.memory_space<vmem>>, vector<1x128xf32>
    %23 = vector.broadcast %22 : vector<1x128xf32> to vector<256x128xf32>
    %24 = arith.addf %21, %23 : vector<256x128xf32>
    %c0_15 = arith.constant 0 : index
    %c0_16 = arith.constant 0 : index
    %25 = vector.load %arg3[%c0_15, %c0_16] : memref<256x128xf32, #tpu.memory_space<vmem>>, vector<256x128xf32>
    %c0_17 = arith.constant 0 : index
    %c0_18 = arith.constant 0 : index
    %26 = vector.load %arg12[%c0_17, %c0_18] : memref<128x128xf32, #tpu.memory_space<vmem>>, vector<128x128xf32>
    %cst_19 = arith.constant dense<0.000000e+00> : vector<256x128xf32>
    %27 = tpu.matmul %25, %26, %cst_19 {dimension_numbers = #tpu.dot_dimension_numbers<[1], [0], [0], [1], [0, 0, 1, 1], [], []>} : vector<256x128xf32>, vector<128x128xf32>, vector<256x128xf32> -> vector<256x128xf32>
    %c0_20 = arith.constant 0 : index
    %c0_21 = arith.constant 0 : index
    %28 = vector.load %arg13[%c0_20, %c0_21] : memref<1x128xf32, #tpu.memory_space<vmem>>, vector<1x128xf32>
    %29 = vector.broadcast %28 : vector<1x128xf32> to vector<256x128xf32>
    %30 = arith.addf %27, %29 : vector<256x128xf32>
    %c0_22 = arith.constant 0 : index
    %c0_23 = arith.constant 0 : index
    %31 = vector.load %arg4[%c0_22, %c0_23] : memref<256x1xi32, #tpu.memory_space<vmem>>, vector<256x1xi32>
    %32 = tpu.iota {dimensions = array<i32: 1>} : vector<256x128xi32>
    %33 = vector.broadcast %31 : vector<256x1xi32> to vector<256x128xi32>
    %34 = arith.cmpi eq, %32, %33 : vector<256x128xi32>
    %35 = arith.extui %34 : vector<256x128xi1> to vector<256x128xi32>
    %36 = arith.sitofp %35 : vector<256x128xi32> to vector<256x128xf32>
    %c0_24 = arith.constant 0 : index
    %c0_25 = arith.constant 0 : index
    %37 = vector.load %arg22[%c0_24, %c0_25] : memref<128x128xf32, #tpu.memory_space<vmem>>, vector<128x128xf32>
    %cst_26 = arith.constant dense<0.000000e+00> : vector<256x128xf32>
    %38 = tpu.matmul %36, %37, %cst_26 {dimension_numbers = #tpu.dot_dimension_numbers<[1], [0], [0], [1], [0, 0, 1, 1], [], []>} : vector<256x128xf32>, vector<128x128xf32>, vector<256x128xf32> -> vector<256x128xf32>
    %39 = arith.mulf %38, %24 : vector<256x128xf32>
    %40 = arith.addf %39, %30 : vector<256x128xf32>
    %c0_27 = arith.constant 0 : index
    %c0_28 = arith.constant 0 : index
    %41 = vector.load %arg5[%c0_27, %c0_28] : memref<1x256xi32, #tpu.memory_space<vmem>>, vector<1x256xi32>
    %42 = tpu.iota {dimensions = array<i32: 0>} : vector<128x256xi32>
    %43 = vector.broadcast %41 : vector<1x256xi32> to vector<128x256xi32>
    %44 = arith.cmpi eq, %42, %43 : vector<128x256xi32>
    %45 = arith.extui %44 : vector<128x256xi1> to vector<128x256xi32>
    %46 = arith.sitofp %45 : vector<128x256xi32> to vector<128x256xf32>
    %c0_29 = arith.constant 0 : index
    %c0_30 = arith.constant 0 : index
    %47 = vector.load %arg23[%c0_29, %c0_30] : memref<128x128xf32, #tpu.memory_space<vmem>>, vector<128x128xf32>
    %cst_31 = arith.constant dense<0.000000e+00> : vector<128x128xf32>
    %48 = tpu.matmul %46, %40, %cst_31 {dimension_numbers = #tpu.dot_dimension_numbers<[1], [0], [0], [1], [0, 0, 1, 1], [], []>} : vector<128x256xf32>, vector<256x128xf32>, vector<128x128xf32> -> vector<128x128xf32>
    %49 = arith.addf %47, %48 : vector<128x128xf32>
    %c0_32 = arith.constant 0 : index
    %c0_33 = arith.constant 0 : index
    %50 = vector.load %arg23[%c0_32, %c0_33] : memref<128x128xf32, #tpu.memory_space<vmem>>, vector<128x128xf32>
    tpu.vector_store %arg23[%c0_32, %c0_33], %49 {strides = array<i32>} : memref<128x128xf32, #tpu.memory_space<vmem>>, vector<128x128xf32>,
    %c0_34 = arith.constant 0 : index
    %c0_35 = arith.constant 0 : index
    %51 = vector.load %arg14[%c0_34, %c0_35] : memref<128x128xf32, #tpu.memory_space<vmem>>, vector<128x128xf32>
    %cst_36 = arith.constant dense<0.000000e+00> : vector<256x128xf32>
    %52 = tpu.matmul %30, %51, %cst_36 {dimension_numbers = #tpu.dot_dimension_numbers<[1], [0], [0], [1], [0, 0, 1, 1], [], []>} : vector<256x128xf32>, vector<128x128xf32>, vector<256x128xf32> -> vector<256x128xf32>
    %c0_37 = arith.constant 0 : index
    %c0_38 = arith.constant 0 : index
    %53 = vector.load %arg15[%c0_37, %c0_38] : memref<1x128xf32, #tpu.memory_space<vmem>>, vector<1x128xf32>
    %54 = vector.broadcast %53 : vector<1x128xf32> to vector<256x128xf32>
    %55 = arith.addf %52, %54 : vector<256x128xf32>
    %cst_39 = arith.constant 5.000000e-01 : f32
    %56 = vector.broadcast %cst_39 : f32 to vector<256x128xf32>
    %57 = arith.mulf %56, %55 : vector<256x128xf32>
    %cst_40 = arith.constant 1.400000e+01 : f32
    %58 = vector.broadcast %cst_40 : f32 to vector<256x128xf32>
    %59 = arith.cmpf ogt, %57, %58 : vector<256x128xf32>
    %cst_41 = arith.constant 1.400000e+01 : f32
    %60 = vector.broadcast %cst_41 : f32 to vector<256x128xf32>
    %61 = arith.minimumf %57, %60 : vector<256x128xf32>
    %62 = math.exp %61 : vector<256x128xf32>
    %63 = math.log1p %62 : vector<256x128xf32>
    %cst_42 = arith.constant 2.000000e+00 : f32
    %64 = vector.broadcast %cst_42 : f32 to vector<256x128xf32>
    %65 = arith.mulf %64, %63 : vector<256x128xf32>
    %66 = arith.select %59, %55, %65 : vector<256x128xi1>, vector<256x128xf32>
    %c0_43 = arith.constant 0 : index
    %c0_44 = arith.constant 0 : index
    %67 = vector.load %arg21[%c0_43, %c0_44] : memref<256x128xf32, #tpu.memory_space<vmem>>, vector<256x128xf32>
    tpu.vector_store %arg21[%c0_43, %c0_44], %66 {strides = array<i32>} : memref<256x128xf32, #tpu.memory_space<vmem>>, vector<256x128xf32>,
    %c0_i32_45 = arith.constant 0 : i32
    %68 = arith.cmpi eq, %arg0, %c0_i32_45 : i32
    %69 = arith.extui %68 : i1 to i32
    %c0_i32_46 = arith.constant 0 : i32
    %70 = arith.cmpi ne, %69, %c0_i32_46 : i32
    scf.if %70 {
      %c0_47 = arith.constant 0 : index
      %c0_48 = arith.constant 0 : index
      %71 = vector.load %arg23[%c0_47, %c0_48] : memref<128x128xf32, #tpu.memory_space<vmem>>, vector<128x128xf32>
      %c0_49 = arith.constant 0 : index
      %c0_50 = arith.constant 0 : index
      %72 = vector.load %arg16[%c0_49, %c0_50] : memref<128x128xf32, #tpu.memory_space<vmem>>, vector<128x128xf32>
      %cst_51 = arith.constant dense<0.000000e+00> : vector<128x128xf32>
      %73 = tpu.matmul %71, %72, %cst_51 {dimension_numbers = #tpu.dot_dimension_numbers<[1], [0], [0], [1], [0, 0, 1, 1], [], []>} : vector<128x128xf32>, vector<128x128xf32>, vector<128x128xf32> -> vector<128x128xf32>
      %c0_52 = arith.constant 0 : index
      %c0_53 = arith.constant 0 : index
      %74 = vector.load %arg17[%c0_52, %c0_53] : memref<1x128xf32, #tpu.memory_space<vmem>>, vector<1x128xf32>
      %75 = vector.broadcast %74 : vector<1x128xf32> to vector<128x128xf32>
      %76 = arith.addf %73, %75 : vector<128x128xf32>
      %cst_54 = arith.constant 5.000000e-01 : f32
      %77 = vector.broadcast %cst_54 : f32 to vector<128x128xf32>
      %78 = arith.mulf %77, %76 : vector<128x128xf32>
      %cst_55 = arith.constant 1.400000e+01 : f32
      %79 = vector.broadcast %cst_55 : f32 to vector<128x128xf32>
      %80 = arith.cmpf ogt, %78, %79 : vector<128x128xf32>
      %cst_56 = arith.constant 1.400000e+01 : f32
      %81 = vector.broadcast %cst_56 : f32 to vector<128x128xf32>
      %82 = arith.minimumf %78, %81 : vector<128x128xf32>
      %83 = math.exp %82 : vector<128x128xf32>
      %84 = math.log1p %83 : vector<128x128xf32>
      %cst_57 = arith.constant 2.000000e+00 : f32
      %85 = vector.broadcast %cst_57 : f32 to vector<128x128xf32>
      %86 = arith.mulf %85, %84 : vector<128x128xf32>
      %87 = arith.select %80, %76, %86 : vector<128x128xi1>, vector<128x128xf32>
      %c0_58 = arith.constant 0 : index
      %c0_59 = arith.constant 0 : index
      %88 = vector.load %arg1[%c0_58, %c0_59] : memref<128x128xf32, #tpu.memory_space<vmem>>, vector<128x128xf32>
      %c0_60 = arith.constant 0 : index
      %c0_61 = arith.constant 0 : index
      %89 = vector.load %arg18[%c0_60, %c0_61] : memref<128x128xf32, #tpu.memory_space<vmem>>, vector<128x128xf32>
      %cst_62 = arith.constant dense<0.000000e+00> : vector<128x128xf32>
      %90 = tpu.matmul %87, %89, %cst_62 {dimension_numbers = #tpu.dot_dimension_numbers<[1], [0], [0], [1], [0, 0, 1, 1], [], []>} : vector<128x128xf32>, vector<128x128xf32>, vector<128x128xf32> -> vector<128x128xf32>
      %c0_63 = arith.constant 0 : index
      %c0_64 = arith.constant 0 : index
      %91 = vector.load %arg19[%c0_63, %c0_64] : memref<1x128xf32, #tpu.memory_space<vmem>>, vector<1x128xf32>
      %92 = vector.broadcast %91 : vector<1x128xf32> to vector<128x128xf32>
      %93 = arith.addf %90, %92 : vector<128x128xf32>
      %94 = arith.addf %88, %93 : vector<128x128xf32>
      %c0_65 = arith.constant 0 : index
      %c0_66 = arith.constant 0 : index
      %95 = vector.load %arg20[%c0_65, %c0_66] : memref<128x128xf32, #tpu.memory_space<vmem>>, vector<128x128xf32>
      tpu.vector_store %arg20[%c0_65, %c0_66], %94 {strides = array<i32>} : memref<128x128xf32, #tpu.memory_space<vmem>>, vector<128x128xf32>,
    } else {
    }
    return
  }
  func.func @transform_0(%arg0: i32) -> (i32, i32) {
    %c0_i32 = arith.constant 0 : i32
    %c0_i32_0 = arith.constant 0 : i32
    %c0_i32_1 = arith.constant 0 : i32
    return %c0_i32, %c0_i32_0 : i32, i32
  }
  func.func @transform_1(%arg0: i32) -> (i32, i32) {
    %c0_i32 = arith.constant 0 : i32
    %c0_i32_0 = arith.constant 0 : i32
    return %arg0, %c0_i32 : i32, i32
  }
  func.func @transform_2(%arg0: i32) -> (i32, i32) {
    %c0_i32 = arith.constant 0 : i32
    %c0_i32_0 = arith.constant 0 : i32
    return %arg0, %c0_i32 : i32, i32
  }
  func.func @transform_3(%arg0: i32) -> (i32, i32) {
    %c0_i32 = arith.constant 0 : i32
    %c0_i32_0 = arith.constant 0 : i32
    return %arg0, %c0_i32 : i32, i32
  }
  func.func @transform_4(%arg0: i32) -> (i32, i32) {
    %c0_i32 = arith.constant 0 : i32
    %c0_i32_0 = arith.constant 0 : i32
    return %c0_i32, %arg0 : i32, i32
  }
  func.func @transform_5(%arg0: i32) -> (i32, i32) {
    %c0_i32 = arith.constant 0 : i32
    %c0_i32_0 = arith.constant 0 : i32
    %c0_i32_1 = arith.constant 0 : i32
    return %c0_i32, %c0_i32_0 : i32, i32
  }
  func.func @transform_6(%arg0: i32) -> (i32, i32) {
    %c0_i32 = arith.constant 0 : i32
    %c0_i32_0 = arith.constant 0 : i32
    %c0_i32_1 = arith.constant 0 : i32
    return %c0_i32, %c0_i32_0 : i32, i32
  }
  func.func @transform_7(%arg0: i32) -> (i32, i32) {
    %c0_i32 = arith.constant 0 : i32
    %c0_i32_0 = arith.constant 0 : i32
    %c0_i32_1 = arith.constant 0 : i32
    return %c0_i32, %c0_i32_0 : i32, i32
  }
  func.func @transform_8(%arg0: i32) -> (i32, i32) {
    %c0_i32 = arith.constant 0 : i32
    %c0_i32_0 = arith.constant 0 : i32
    %c0_i32_1 = arith.constant 0 : i32
    return %c0_i32, %c0_i32_0 : i32, i32
  }
  func.func @transform_9(%arg0: i32) -> (i32, i32) {
    %c0_i32 = arith.constant 0 : i32
    %c0_i32_0 = arith.constant 0 : i32
    %c0_i32_1 = arith.constant 0 : i32
    return %c0_i32, %c0_i32_0 : i32, i32
  }
  func.func @transform_10(%arg0: i32) -> (i32, i32) {
    %c0_i32 = arith.constant 0 : i32
    %c0_i32_0 = arith.constant 0 : i32
    %c0_i32_1 = arith.constant 0 : i32
    return %c0_i32, %c0_i32_0 : i32, i32
  }
  func.func @transform_11(%arg0: i32) -> (i32, i32) {
    %c0_i32 = arith.constant 0 : i32
    %c0_i32_0 = arith.constant 0 : i32
    %c0_i32_1 = arith.constant 0 : i32
    return %c0_i32, %c0_i32_0 : i32, i32
  }
  func.func @transform_12(%arg0: i32) -> (i32, i32) {
    %c0_i32 = arith.constant 0 : i32
    %c0_i32_0 = arith.constant 0 : i32
    %c0_i32_1 = arith.constant 0 : i32
    return %c0_i32, %c0_i32_0 : i32, i32
  }
  func.func @transform_13(%arg0: i32) -> (i32, i32) {
    %c0_i32 = arith.constant 0 : i32
    %c0_i32_0 = arith.constant 0 : i32
    %c0_i32_1 = arith.constant 0 : i32
    return %c0_i32, %c0_i32_0 : i32, i32
  }
  func.func @transform_14(%arg0: i32) -> (i32, i32) {
    %c0_i32 = arith.constant 0 : i32
    %c0_i32_0 = arith.constant 0 : i32
    %c0_i32_1 = arith.constant 0 : i32
    return %c0_i32, %c0_i32_0 : i32, i32
  }
  func.func @transform_15(%arg0: i32) -> (i32, i32) {
    %c0_i32 = arith.constant 0 : i32
    %c0_i32_0 = arith.constant 0 : i32
    %c0_i32_1 = arith.constant 0 : i32
    return %c0_i32, %c0_i32_0 : i32, i32
  }
  func.func @transform_16(%arg0: i32) -> (i32, i32) {
    %c0_i32 = arith.constant 0 : i32
    %c0_i32_0 = arith.constant 0 : i32
    %c0_i32_1 = arith.constant 0 : i32
    return %c0_i32, %c0_i32_0 : i32, i32
  }
  func.func @transform_17(%arg0: i32) -> (i32, i32) {
    %c0_i32 = arith.constant 0 : i32
    %c0_i32_0 = arith.constant 0 : i32
    %c0_i32_1 = arith.constant 0 : i32
    return %c0_i32, %c0_i32_0 : i32, i32
  }
  func.func @transform_18(%arg0: i32) -> (i32, i32) {
    %c0_i32 = arith.constant 0 : i32
    %c0_i32_0 = arith.constant 0 : i32
    %c0_i32_1 = arith.constant 0 : i32
    return %c0_i32, %c0_i32_0 : i32, i32
  }
  func.func @transform_19(%arg0: i32) -> (i32, i32) {
    %c0_i32 = arith.constant 0 : i32
    %c0_i32_0 = arith.constant 0 : i32
    %c0_i32_1 = arith.constant 0 : i32
    return %c0_i32, %c0_i32_0 : i32, i32
  }
  func.func @transform_20(%arg0: i32) -> (i32, i32) {
    %c0_i32 = arith.constant 0 : i32
    %c0_i32_0 = arith.constant 0 : i32
    return %arg0, %c0_i32 : i32, i32
  }
}

</mosaic_0001>

<bundles_post_ra>
// kernel: tpu_custom_call.1
= control target key start
LH: loop header
LB: loop body
LE: loop exit
PB: predicated region body
PF: predicated region fallthrough
CT: control target
= control target key end

     0   :  { %s8917_s0 = inlined_call_operand.hbm [shape: f32[128,128], index: 0, kind: input, shape index: {}]   ;;  %s8918_s1 = inlined_call_operand.vmem [shape: f32[256,128], index: 1, kind: input, shape index: {}]   ;;  %s8919_s2 = inlined_call_operand.hbm [shape: f32[256,128], index: 2, kind: input, shape index: {}]   ;;  %s8920_s3 = inlined_call_operand.vmem [shape: s32[256,1], index: 3, kind: input, shape index: {}]   ;;  %s8921_s4 = inlined_call_operand.vmem [shape: s32[1,256], index: 4, kind: input, shape index: {}]   ;;  %s8922_s5 = inlined_call_operand.hbm [shape: f32[128,128], index: 5, kind: input, shape index: {}]   ;;  %s8923_s6 = inlined_call_operand.vmem [shape: f32[1,128], index: 6, kind: input, shape index: {}]   ;;  %s8924_s7 = inlined_call_operand.hbm [shape: f32[128,128], index: 7, kind: input, shape index: {}]   ;;  %s8925_s8 = inlined_call_operand.vmem [shape: f32[1,128], index: 8, kind: input, shape index: {}]   ;;  %s8926_s9 = inlined_call_operand.hbm [shape: f32[128,128], index: 9, kind: input, shape index: {}]   ;;  %s8927_s10 = inlined_call_operand.vmem [shape: f32[1,128], index: 10, kind: input, shape index: {}]   ;;  %s8928_s11 = inlined_call_operand.hbm [shape: f32[128,128], index: 11, kind: input, shape index: {}]   ;;  %s8929_s12 = inlined_call_operand.vmem [shape: f32[1,128], index: 12, kind: input, shape index: {}]   ;;  %s8930_s13 = inlined_call_operand.hbm [shape: f32[128,128], index: 13, kind: input, shape index: {}]   ;;  %s8931_s14 = inlined_call_operand.vmem [shape: f32[1,128], index: 14, kind: input, shape index: {}]   ;;  %s8932_s15 = inlined_call_operand.hbm [shape: f32[128,128], index: 15, kind: input, shape index: {}]   ;;  %s8933_s16 = inlined_call_operand.vmem [shape: f32[1,128], index: 16, kind: input, shape index: {}]   ;;  %s8934_s17 = inlined_call_operand.hbm [shape: f32[128,128], index: 17, kind: input, shape index: {}]   ;;  %s8935_s18 = inlined_call_operand.vmem [shape: f32[1,128], index: 18, kind: input, shape index: {}]   ;;  %s8936_s19 = inlined_call_operand.hbm [shape: f32[128,128], index: 19, kind: output, shape index: {0}]   ;;  %s8937_s20 = inlined_call_operand.hbm [shape: f32[256,128], index: 20, kind: output, shape index: {1}]  }
   0x1   :  { %9019 = sst [smem:[#allocation70_spill]] %s8917_s0 }
   0x2   :  { %9020 = sst [smem:[#allocation71_spill]] %s8918_s1 }
   0x3   :  { %9021 = sst [smem:[#allocation72_spill]] %s8919_s2 }
   0x4   :  { %9022 = sst [smem:[#allocation73_spill]] %s8920_s3 }
   0x5   :  { %9023 = sst [smem:[#allocation74_spill]] %s8921_s4 }
   0x6   :  { %9024 = sst [smem:[#allocation75_spill]] %s8936_s19 }
   0x7   :  { %26 = vsyncpa [#allocation5], 0 }
   0x8   :  { %27 = vsyncpa [#allocation8], 0 }
   0x9   :  { %28 = vsyncpa [#allocation11], 0 }
   0xa   :  { %29 = vsyncpa [#allocation14], 0 }
   0xb   :  { %30 = vsyncpa [#allocation17], 0 }
   0xc   :  { %31 = vsyncpa [#allocation6], 0 }
   0xd   :  { %32 = vsyncpa [#allocation21], 0  ;;  %s6080_s1 = smov [#allocation7]   ;;  %s6081_s23 = smov [#allocation10]  }
   0xe   :  { %s52_s22 = sshll.u32 %s6080_s1, 4  ;;  %s82_s24 = sshll.u32 %s6081_s23, 4  ;;  %s53_s22 = int_to_ptr.vmem [resolvable:$true] %s52_s22  ;;  %s6200_s24 = int_to_ptr.vmem [resolvable:$true] %s82_s24 }
   0xf   :  { %s9025_s3 = sld [smem:[#allocation72_spill]] }
  0x15   :  { %s5824_s26 = scalar_lea.hbm %s9025_s3, 4096 }
  0x16   :  { %p5825_p0 = scmp.ne.s32.totalorder %s9025_s3, %s5824_s26  ;;  %p5828_p1 = scmp.lt.u32.totalorder %s5824_s26, %s9025_s3 }
  0x18   :  { %p5830_p2 = pnand %p5828_p1, %p5825_p0 }
  0x1a   :  { %5833 = shalt.err (!%p5830_p2)
}
  0x1b   :  { %s5834_s30 = scalar_lea.vmem %s53_s22, 4096  ;;  %p5839_p4 = scmp.lt.s32.totalorder %s53_s22, %s53_s22 }
  0x1c   :  { %p5835_p3 = scmp.ne.s32.totalorder %s53_s22, %s5834_s30  ;;  %p5840_p5 = scmp.lt.s32.totalorder %s5834_s30, %s5834_s30 }
  0x1e   :  { %p5841_p6 = por %p5840_p5, %p5839_p4 }
  0x20   :  { %p5842_p7 = pnand %p5841_p6, %p5835_p3 }
  0x22   :  { %5845 = shalt.err (!%p5842_p7)
}
  0x23   :  { %s6082_s0 = smov 128   ;;  %s6083_s21 = smov 8  }
  0x24   :  { %58 = dma.hbm_to_vmem [thread:$0]  %s9025_s3, 4096, %s53_s22, [#allocation8], %s6082_s0, %s6082_s0, %s6083_s21  }
  0x25   :  { %s5846_s26 = scalar_lea.hbm %s8924_s7, 2048 }
  0x26   :  { %p5847_p8 = scmp.ne.s32.totalorder %s8924_s7, %s5846_s26  ;;  %p5850_p9 = scmp.lt.u32.totalorder %s5846_s26, %s8924_s7 }
  0x28   :  { %p5852_p10 = pnand %p5850_p9, %p5847_p8 }
  0x2a   :  { %5855 = shalt.err (!%p5852_p10)
}
  0x2b   :  { %s5856_s30 = scalar_lea.vmem %s6200_s24, 2048  ;;  %p5861_p12 = scmp.lt.s32.totalorder %s6200_s24, %s6200_s24 }
  0x2c   :  { %p5857_p11 = scmp.ne.s32.totalorder %s6200_s24, %s5856_s30  ;;  %p5862_p13 = scmp.lt.s32.totalorder %s5856_s30, %s5856_s30 }
  0x2e   :  { %p5863_p0 = por %p5862_p13, %p5861_p12 }
  0x30   :  { %p5864_p1 = pnand %p5863_p0, %p5857_p11 }
  0x32   :  { %5867 = shalt.err (!%p5864_p1)
}
  0x33   :  { %88 = dma.hbm_to_vmem [thread:$0]  %s8924_s7, 2048, %s6200_s24, [#allocation11], %s6082_s0, %s6082_s0, %s6083_s21  }
  0x34   :  { %s6084_s1 = smov [#allocation13]   ;;  %s6085_s2 = smov [#allocation16]  }
  0x35   :  { %s110_s23 = sshll.u32 %s6084_s1, 4  ;;  %s138_s25 = sshll.u32 %s6085_s2, 4  ;;  %s111_s23 = int_to_ptr.vmem [resolvable:$true] %s110_s23  ;;  %s6237_s25 = int_to_ptr.vmem [resolvable:$true] %s138_s25 }
  0x36   :  { %s5868_s28 = scalar_lea.hbm %s8928_s11, 2048 }
  0x37   :  { %p5869_p2 = scmp.ne.s32.totalorder %s8928_s11, %s5868_s28  ;;  %p5872_p3 = scmp.lt.u32.totalorder %s5868_s28, %s8928_s11 }
  0x39   :  { %p5874_p4 = pnand %p5872_p3, %p5869_p2 }
  0x3b   :  { %5877 = shalt.err (!%p5874_p4)
}
  0x3c   :  { %s5878_s7 = scalar_lea.vmem %s111_s23, 2048  ;;  %p5883_p6 = scmp.lt.s32.totalorder %s111_s23, %s111_s23 }
  0x3d   :  { %p5879_p5 = scmp.ne.s32.totalorder %s111_s23, %s5878_s7  ;;  %p5884_p7 = scmp.lt.s32.totalorder %s5878_s7, %s5878_s7 }
  0x3f   :  { %p5885_p8 = por %p5884_p7, %p5883_p6 }
  0x41   :  { %p5886_p9 = pnand %p5885_p8, %p5879_p5 }
  0x43   :  { %5889 = shalt.err (!%p5886_p9)
}
  0x44   :  { %116 = dma.hbm_to_vmem [thread:$0]  %s8928_s11, 2048, %s111_s23, [#allocation14], %s6082_s0, %s6082_s0, %s6083_s21  }
  0x45   :  { %s5890_s19 = scalar_lea.hbm %s8932_s15, 2048 }
  0x46   :  { %p5891_p10 = scmp.ne.s32.totalorder %s8932_s15, %s5890_s19  ;;  %p5894_p11 = scmp.lt.u32.totalorder %s5890_s19, %s8932_s15 }
  0x48   :  { %p5896_p12 = pnand %p5894_p11, %p5891_p10 }
  0x4a   :  { %5899 = shalt.err (!%p5896_p12)
}
  0x4b   :  { %s5900_s4 = scalar_lea.vmem %s6237_s25, 2048  ;;  %p5905_p0 = scmp.lt.s32.totalorder %s6237_s25, %s6237_s25 }
  0x4c   :  { %p5901_p13 = scmp.ne.s32.totalorder %s6237_s25, %s5900_s4  ;;  %p5906_p1 = scmp.lt.s32.totalorder %s5900_s4, %s5900_s4 }
  0x4e   :  { %p5907_p2 = por %p5906_p1, %p5905_p0 }
  0x50   :  { %p5908_p3 = pnand %p5907_p2, %p5901_p13 }
  0x52   :  { %5911 = shalt.err (!%p5908_p3)
}
  0x53   :  { %144 = dma.hbm_to_vmem [thread:$0]  %s8932_s15, 2048, %s6237_s25, [#allocation17], %s6082_s0, %s6082_s0, %s6083_s21  }
  0x54   :  { %s6086_s29 = smov [#allocation4]   ;;  %s6087_s7 = smov [#allocation9]  }
  0x55   :  { %s38_s30 = sshll.u32 %s6086_s29, 4  ;;  %s68_s24 = sshll.u32 %s6087_s7, 4  ;;  %s39_s30 = int_to_ptr.vmem [resolvable:$true] %s38_s30  ;;  %s6274_s24 = int_to_ptr.vmem [resolvable:$true] %s68_s24 }
  0x56   :  { %s9026_s1 = sld [smem:[#allocation70_spill]] }
  0x5c   :  { %s5912_s19 = scalar_lea.hbm %s9026_s1, 2048 }
  0x5d   :  { %p5913_p4 = scmp.ne.s32.totalorder %s9026_s1, %s5912_s19  ;;  %p5916_p5 = scmp.lt.u32.totalorder %s5912_s19, %s9026_s1 }
  0x5f   :  { %p5918_p6 = pnand %p5916_p5, %p5913_p4 }
  0x61   :  { %5921 = shalt.err (!%p5918_p6)
}
  0x62   :  { %s5922_s15 = scalar_lea.vmem %s39_s30, 2048  ;;  %p5927_p8 = scmp.lt.s32.totalorder %s39_s30, %s39_s30 }
  0x63   :  { %p5923_p7 = scmp.ne.s32.totalorder %s39_s30, %s5922_s15  ;;  %p5928_p9 = scmp.lt.s32.totalorder %s5922_s15, %s5922_s15 }
  0x65   :  { %p5929_p10 = por %p5928_p9, %p5927_p8 }
  0x67   :  { %p5930_p11 = pnand %p5929_p10, %p5923_p7 }
  0x69   :  { %5933 = shalt.err (!%p5930_p11)
}
  0x6a   :  { %44 = dma.hbm_to_vmem [thread:$0]  %s9026_s1, 2048, %s39_s30, [#allocation5], %s6082_s0, %s6082_s0, %s6083_s21  }
  0x6b   :  { %s5934_s29 = scalar_lea.hbm %s8922_s5, 2048 }
  0x6c   :  { %p5935_p12 = scmp.ne.s32.totalorder %s8922_s5, %s5934_s29  ;;  %p5938_p13 = scmp.lt.u32.totalorder %s5934_s29, %s8922_s5 }
  0x6e   :  { %p5940_p0 = pnand %p5938_p13, %p5935_p12 }
  0x70   :  { %5943 = shalt.err (!%p5940_p0)
}
  0x71   :  { %s5944_s2 = scalar_lea.vmem %s6274_s24, 2048  ;;  %p5949_p2 = scmp.lt.s32.totalorder %s6274_s24, %s6274_s24 }
  0x72   :  { %p5945_p1 = scmp.ne.s32.totalorder %s6274_s24, %s5944_s2  ;;  %p5950_p3 = scmp.lt.s32.totalorder %s5944_s2, %s5944_s2 }
  0x74   :  { %p5951_p4 = por %p5950_p3, %p5949_p2 }
  0x76   :  { %p5952_p5 = pnand %p5951_p4, %p5945_p1 }
  0x78   :  { %5955 = shalt.err (!%p5952_p5)
}
  0x79   :  { %74 = dma.hbm_to_vmem [thread:$0]  %s8922_s5, 2048, %s6274_s24, [#allocation8], %s6082_s0, %s6082_s0, %s6083_s21  }
  0x7a   :  { %s6088_s26 = smov [#allocation12]   ;;  %s6089_s28 = smov [#allocation15]  }
  0x7b   :  { %s96_s27 = sshll.u32 %s6088_s26, 4  ;;  %s124_s15 = sshll.u32 %s6089_s28, 4  ;;  %s97_s27 = int_to_ptr.vmem [resolvable:$true] %s96_s27  ;;  %s6311_s15 = int_to_ptr.vmem [resolvable:$true] %s124_s15 }
  0x7c   :  { %s5956_s11 = scalar_lea.hbm %s8926_s9, 2048 }
  0x7d   :  { %p5957_p6 = scmp.ne.s32.totalorder %s8926_s9, %s5956_s11  ;;  %p5960_p7 = scmp.lt.u32.totalorder %s5956_s11, %s8926_s9 }
  0x7f   :  { %p5962_p8 = pnand %p5960_p7, %p5957_p6 }
  0x81   :  { %5965 = shalt.err (!%p5962_p8)
}
  0x82   :  { %s5966_s5 = scalar_lea.vmem %s97_s27, 2048  ;;  %p5971_p10 = scmp.lt.s32.totalorder %s97_s27, %s97_s27 }
  0x83   :  { %p5967_p9 = scmp.ne.s32.totalorder %s97_s27, %s5966_s5  ;;  %p5972_p11 = scmp.lt.s32.totalorder %s5966_s5, %s5966_s5 }
  0x85   :  { %p5973_p12 = por %p5972_p11, %p5971_p10 }
  0x87   :  { %p5974_p13 = pnand %p5973_p12, %p5967_p9 }
  0x89   :  { %5977 = shalt.err (!%p5974_p13)
}
  0x8a   :  { %102 = dma.hbm_to_vmem [thread:$0]  %s8926_s9, 2048, %s97_s27, [#allocation11], %s6082_s0, %s6082_s0, %s6083_s21  }
  0x8b   :  { %s5978_s30 = scalar_lea.hbm %s8930_s13, 2048 }
  0x8c   :  { %p5979_p0 = scmp.ne.s32.totalorder %s8930_s13, %s5978_s30  ;;  %p5982_p1 = scmp.lt.u32.totalorder %s5978_s30, %s8930_s13 }
  0x8e   :  { %p5984_p2 = pnand %p5982_p1, %p5979_p0 }
  0x90   :  { %5987 = shalt.err (!%p5984_p2)
}
  0x91   :  { %s5988_s4 = scalar_lea.vmem %s6311_s15, 2048  ;;  %p5993_p4 = scmp.lt.s32.totalorder %s6311_s15, %s6311_s15 }
  0x92   :  { %p5989_p3 = scmp.ne.s32.totalorder %s6311_s15, %s5988_s4  ;;  %p5994_p5 = scmp.lt.s32.totalorder %s5988_s4, %s5988_s4 }
  0x94   :  { %p5995_p6 = por %p5994_p5, %p5993_p4 }
  0x96   :  { %p5996_p7 = pnand %p5995_p6, %p5989_p3 }
  0x98   :  { %5999 = shalt.err (!%p5996_p7)
}
  0x99   :  { %130 = dma.hbm_to_vmem [thread:$0]  %s8930_s13, 2048, %s6311_s15, [#allocation14], %s6082_s0, %s6082_s0, %s6083_s21  }
  0x9a   :  { %s6090_s11 = smov [#allocation18]   ;;  %s6000_s22 = scalar_lea.hbm %s8934_s17, 2048 }
  0x9b   :  { %s152_s23 = sshll.u32 %s6090_s11, 4  ;;  %p6001_p8 = scmp.ne.s32.totalorder %s8934_s17, %s6000_s22  ;;  %s153_s23 = int_to_ptr.vmem [resolvable:$true] %s152_s23 }
  0x9c   :  { %p6004_p9 = scmp.lt.u32.totalorder %s6000_s22, %s8934_s17 }
  0x9e   :  { %p6006_p10 = pnand %p6004_p9, %p6001_p8 }
  0xa0   :  { %6009 = shalt.err (!%p6006_p10)
}
  0xa1   :  { %s6010_s2 = scalar_lea.vmem %s153_s23, 2048  ;;  %p6015_p12 = scmp.lt.s32.totalorder %s153_s23, %s153_s23 }
  0xa2   :  { %p6011_p11 = scmp.ne.s32.totalorder %s153_s23, %s6010_s2  ;;  %p6016_p13 = scmp.lt.s32.totalorder %s6010_s2, %s6010_s2 }
  0xa4   :  { %p6017_p0 = por %p6016_p13, %p6015_p12 }
  0xa6   :  { %p6018_p1 = pnand %p6017_p0, %p6011_p11 }
  0xa8   :  { %6021 = shalt.err (!%p6018_p1)
}
  0xa9   :  { %158 = dma.hbm_to_vmem [thread:$0]  %s8934_s17, 2048, %s153_s23, [#allocation17], %s6082_s0, %s6082_s0, %s6083_s21  }
  0xaa   :  { %6066 = dma.done.wait [#allocation5], 2048  }
  0xab   :  { %6067 = vsyncadd [#allocation5], 4294965248 }
  0xac   :  { %6068 = dma.done.wait [#allocation8], 6144  }
  0xad   :  { %6069 = vsyncadd [#allocation8], 4294961152 }
  0xae   :  { %6070 = dma.done.wait [#allocation11], 4096  }
  0xaf   :  { %6071 = vsyncadd [#allocation11], 4294963200 }
  0xb0   :  { %6072 = dma.done.wait [#allocation14], 4096  }
  0xb1   :  { %6073 = vsyncadd [#allocation14], 4294963200 }
  0xb2   :  { %6074 = dma.done.wait [#allocation17], 4096  }
  0xb3   :  { %6075 = vsyncadd [#allocation17], 4294963200  ;;  %v6091_v0 = vmov 0   ;;  %v440_v1 = vld [vmem:[#allocation10] sm:$0xff]  ;;  %v441_v2 = vld [vmem:[#allocation10 + $0x8] sm:$0xff]  ;;  %s9027_s1 = sld [smem:[#allocation71_spill]] }
  0xb4   :  { %5500 = vset.pattern.permute.xlu0 %v6091_v0  ;;  %5501 = vset.pattern.permute.xlu1 %v6091_v0  ;;  %v442_v3 = vld [vmem:[#allocation10 + $0x10] sm:$0xff]  ;;  %v5213_v4 = vpack.c.bf16 %v441_v2, %v440_v1  ;;  %v443_v5 = vld [vmem:[#allocation10 + $0x18] sm:$0xff]  ;;  %v444_v7 = vld [vmem:[#allocation10 + $0x20] sm:$0xff]  ;;  %s9028_s25 = sld [smem:[#allocation73_spill]]  ;;  %s9134_s17 = sld [smem:[#allocation74_spill]] }
  0xb5   :  { %v5217_v6 = vpack.c.bf16 %v443_v5, %v442_v3  ;;  %v445_v8 = vld [vmem:[#allocation10 + $0x28] sm:$0xff]  ;;  %v446_v11 = vld [vmem:[#allocation10 + $0x30] sm:$0xff]  ;;  %v447_v12 = vld [vmem:[#allocation10 + $0x38] sm:$0xff] }
  0xb6   :  { %5214 = vmatprep.subr.bf16.mxu1 %v5213_v4  ;;  %v5221_v9 = vpack.c.bf16 %v445_v8, %v444_v7  ;;  %v5225_v13 = vpack.c.bf16 %v447_v12, %v446_v11  ;;  %v448_v14 = vld [vmem:[#allocation10 + $0x40] sm:$0xff]  ;;  %v449_v15 = vld [vmem:[#allocation10 + $0x48] sm:$0xff]  ;;  %v210_v19 = vld [vmem:[#allocation9 + $0x10] sm:$0xff] }
  0xb7   :  { %5216 = vmatpush3.bf16.msra.mxu1 %v5213_v4  ;;  %v208_v16 = vld [vmem:[#allocation9] sm:$0xff]  ;;  %v209_v17 = vld [vmem:[#allocation9 + $0x8] sm:$0xff]  ;;  %v5229_v20 = vpack.c.bf16 %v449_v15, %v448_v14  ;;  %v450_v21 = vld [vmem:[#allocation10 + $0x50] sm:$0xff] }
  0xb8   :  { %5218 = vmatprep.subr.bf16.mxu1 %v5217_v6  ;;  %v5181_v18 = vpack.c.bf16 %v209_v17, %v208_v16  ;;  %v211_v22 = vld [vmem:[#allocation9 + $0x18] sm:$0xff]  ;;  %v212_v25 = vld [vmem:[#allocation9 + $0x20] sm:$0xff]  ;;  %v213_v26 = vld [vmem:[#allocation9 + $0x28] sm:$0xff] }
  0xb9   :  { %v408_v10 = vld [vmem:[%s9027_s1] sm:$0xff]  ;;  %v451_v23 = vld [vmem:[#allocation10 + $0x58] sm:$0xff]  ;;  %v5185_v24 = vpack.c.bf16 %v211_v22, %v210_v19  ;;  %v5189_v27 = vpack.c.bf16 %v213_v26, %v212_v25  ;;  %v214_v29 = vld [vmem:[#allocation9 + $0x30] sm:$0xff] }
  0xba   :  { %4701 = vmatprep.mubr.f32.mxu1 %v408_v10  ;;  %5182 = vmatprep.subr.bf16.mxu0 %v5181_v18  ;;  %v5233_v28 = vpack.c.bf16 %v451_v23, %v450_v21  ;;  %v215_v30 = vld [vmem:[#allocation9 + $0x38] sm:$0xff]  ;;  %v452_v31 = vld [vmem:[#allocation10 + $0x60] sm:$0xff]  ;;  %v453_v32 = vld [vmem:[#allocation10 + $0x68] sm:$0xff] }
  0xbb   :  { %5220 = vmatpush3.bf16.msra.mxu1 %v5217_v6  ;;  %5184 = vmatpush3.bf16.msra.mxu0 %v5181_v18  ;;  %v5193_v33 = vpack.c.bf16 %v215_v30, %v214_v29  ;;  %v5237_v34 = vpack.c.bf16 %v453_v32, %v452_v31  ;;  %v216_v35 = vld [vmem:[#allocation9 + $0x40] sm:$0xff]  ;;  %v217_v36 = vld [vmem:[#allocation9 + $0x48] sm:$0xff]  ;;  %v454_v38 = vld [vmem:[#allocation10 + $0x70] sm:$0xff] }
  0xbc   :  { %5222 = vmatprep.subr.bf16.mxu1 %v5221_v9  ;;  %5186 = vmatprep.subr.bf16.mxu0 %v5185_v24  ;;  %v192_v37 = vld [vmem:[#allocation4] sm:$0xff]  ;;  %v455_v39 = vld [vmem:[#allocation10 + $0x78] sm:$0xff]  ;;  %v5197_v40 = vpack.c.bf16 %v217_v36, %v216_v35  ;;  %v218_v42 = vld [vmem:[#allocation9 + $0x50] sm:$0xff] }
  0xbd   :  { %4645 = vmatprep.mubr.f32.mxu0 %v192_v37  ;;  %v5241_v41 = vpack.c.bf16 %v455_v39, %v454_v38  ;;  %v219_v43 = vld [vmem:[#allocation9 + $0x58] sm:$0xff]  ;;  %v1728_v44 = vld [vmem:[%s9028_s25] sm:$0xff]  ;;  %v1730_v45 = vld [vmem:[%s9028_s25 + $0x10] sm:$0xff] }
  0xbe   :  { %1763 = vperm.xlu0 %5500, %v1728_v44   ;;  %v5201_v46 = vpack.c.bf16 %v219_v43, %v218_v42  ;;  %v1729_v47 = vld [vmem:[%s9028_s25 + $0x8] sm:$0xff]  ;;  %v220_v48 = vld [vmem:[#allocation9 + $0x60] sm:$0xff]  ;;  %1769 = vperm.xlu1 %5501, %v1730_v45   ;;  %v1731_v50 = vld [vmem:[%s9028_s25 + $0x18] sm:$0xff] }
  0xbf   :  { %5224 = vmatpush3.bf16.msra.mxu1 %v5221_v9  ;;  %5188 = vmatpush3.bf16.msra.mxu0 %v5185_v24  ;;  %v221_v49 = vld [vmem:[#allocation9 + $0x68] sm:$0xff]  ;;  %v410_v53 = vld [vmem:[%s9027_s1 + $0x10] sm:$0xff]  ;;  %v223_v55 = vld [vmem:[#allocation9 + $0x78] sm:$0xff] }
  0xc0   :  { %5226 = vmatprep.subr.bf16.mxu1 %v5225_v13  ;;  %5190 = vmatprep.subr.bf16.mxu0 %v5189_v27  ;;  %v409_v51 = vld [vmem:[%s9027_s1 + $0x8] sm:$0xff]  ;;  %v5205_v52 = vpack.c.bf16 %v221_v49, %v220_v48  ;;  %v222_v54 = vld [vmem:[#allocation9 + $0x70] sm:$0xff]  ;;  %v1732_v56 = vld [vmem:[%s9028_s25 + $0x20] sm:$0xff] }
  0xc1   :  { %v1733_v57 = vld [vmem:[%s9028_s25 + $0x28] sm:$0xff]  ;;  %v411_v58 = vld [vmem:[%s9027_s1 + $0x18] sm:$0xff]  ;;  %v5209_v59 = vpack.c.bf16 %v223_v55, %v222_v54  ;;  %v412_v60 = vld [vmem:[%s9027_s1 + $0x20] sm:$0xff] }
  0xc2   :  { %1766 = vperm.xlu0 %5500, %v1729_v47   ;;  %1772 = vperm.xlu1 %5501, %v1731_v50   ;;  %v1734_v61 = vld [vmem:[%s9028_s25 + $0x30] sm:$0xff]  ;;  %v1735_v62 = vld [vmem:[%s9028_s25 + $0x38] sm:$0xff]  ;;  %v413_v63 = vld [vmem:[%s9027_s1 + $0x28] sm:$0xff] }
  0xc3   :  { %5228 = vmatpush3.bf16.msra.mxu1 %v5225_v13  ;;  %5192 = vmatpush3.bf16.msra.mxu0 %v5189_v27  ;;  %v414_v0 = vld [vmem:[%s9027_s1 + $0x30] sm:$0xff]  ;;  %v1736_v1 = vld [vmem:[%s9028_s25 + $0x40] sm:$0xff]  ;;  %v1737_v2 = vld [vmem:[%s9028_s25 + $0x48] sm:$0xff] }
  0xc4   :  { %5230 = vmatprep.subr.bf16.mxu1 %v5229_v20  ;;  %5194 = vmatprep.subr.bf16.mxu0 %v5193_v33  ;;  %v193_v3 = vld [vmem:[#allocation4 + $0x8] sm:$0xff]  ;;  %v415_v4 = vld [vmem:[%s9027_s1 + $0x38] sm:$0xff]  ;;  %v194_v5 = vld [vmem:[#allocation4 + $0x10] sm:$0xff] }
  0xc5   :  { %v416_v6 = vld [vmem:[%s9027_s1 + $0x40] sm:$0xff]  ;;  %v1738_v7 = vld [vmem:[%s9028_s25 + $0x50] sm:$0xff]  ;;  %v1739_v8 = vld [vmem:[%s9028_s25 + $0x58] sm:$0xff] }
  0xc6   :  { %1775 = vperm.xlu0 %5500, %v1732_v56   ;;  %1778 = vperm.xlu1 %5501, %v1733_v57   ;;  %v195_v9 = vld [vmem:[#allocation4 + $0x18] sm:$0xff]  ;;  %v417_v10 = vld [vmem:[%s9027_s1 + $0x48] sm:$0xff]  ;;  %v196_v11 = vld [vmem:[#allocation4 + $0x20] sm:$0xff] }
  0xc7   :  { %5232 = vmatpush3.bf16.msra.mxu1 %v5229_v20  ;;  %5196 = vmatpush3.bf16.msra.mxu0 %v5193_v33  ;;  %v418_v12 = vld [vmem:[%s9027_s1 + $0x50] sm:$0xff]  ;;  %v1740_v13 = vld [vmem:[%s9028_s25 + $0x60] sm:$0xff]  ;;  %v1741_v14 = vld [vmem:[%s9028_s25 + $0x68] sm:$0xff] }
  0xc8   :  { %5234 = vmatprep.subr.bf16.mxu1 %v5233_v28  ;;  %5198 = vmatprep.subr.bf16.mxu0 %v5197_v40  ;;  %v197_v15 = vld [vmem:[#allocation4 + $0x28] sm:$0xff]  ;;  %v419_v16 = vld [vmem:[%s9027_s1 + $0x58] sm:$0xff]  ;;  %v198_v17 = vld [vmem:[#allocation4 + $0x30] sm:$0xff] }
  0xc9   :  { %v420_v18 = vld [vmem:[%s9027_s1 + $0x60] sm:$0xff]  ;;  %v1742_v19 = vld [vmem:[%s9028_s25 + $0x70] sm:$0xff]  ;;  %v1743_v20 = vld [vmem:[%s9028_s25 + $0x78] sm:$0xff] }
  0xca   :  { %1781 = vperm.xlu0 %5500, %v1734_v61   ;;  %1784 = vperm.xlu1 %5501, %v1735_v62   ;;  %v199_v21 = vld [vmem:[#allocation4 + $0x38] sm:$0xff]  ;;  %v421_v22 = vld [vmem:[%s9027_s1 + $0x68] sm:$0xff]  ;;  %v200_v23 = vld [vmem:[#allocation4 + $0x40] sm:$0xff] }
  0xcb   :  { %5236 = vmatpush3.bf16.msra.mxu1 %v5233_v28  ;;  %5200 = vmatpush3.bf16.msra.mxu0 %v5197_v40  ;;  %v422_v24 = vld [vmem:[%s9027_s1 + $0x70] sm:$0xff]  ;;  %v1744_v25 = vld [vmem:[%s9028_s25 + $0x80] sm:$0xff]  ;;  %v1745_v26 = vld [vmem:[%s9028_s25 + $0x88] sm:$0xff] }
  0xcc   :  { %5238 = vmatprep.subr.bf16.mxu1 %v5237_v34  ;;  %5202 = vmatprep.subr.bf16.mxu0 %v5201_v46  ;;  %v201_v27 = vld [vmem:[#allocation4 + $0x48] sm:$0xff]  ;;  %v423_v28 = vld [vmem:[%s9027_s1 + $0x78] sm:$0xff]  ;;  %v202_v29 = vld [vmem:[#allocation4 + $0x50] sm:$0xff] }
  0xcd   :  { %v424_v30 = vld [vmem:[%s9027_s1 + $0x80] sm:$0xff]  ;;  %v1746_v31 = vld [vmem:[%s9028_s25 + $0x90] sm:$0xff]  ;;  %v1747_v32 = vld [vmem:[%s9028_s25 + $0x98] sm:$0xff] }
  0xce   :  { %1787 = vperm.xlu0 %5500, %v1736_v1   ;;  %1790 = vperm.xlu1 %5501, %v1737_v2   ;;  %v203_v33 = vld [vmem:[#allocation4 + $0x58] sm:$0xff]  ;;  %v204_v35 = vld [vmem:[#allocation4 + $0x60] sm:$0xff]  ;;  %v426_v36 = vld [vmem:[%s9027_s1 + $0x90] sm:$0xff] }
  0xcf   :  { %5240 = vmatpush3.bf16.msra.mxu1 %v5237_v34  ;;  %5204 = vmatpush3.bf16.msra.mxu0 %v5201_v46  ;;  %v425_v34 = vld [vmem:[%s9027_s1 + $0x88] sm:$0xff]  ;;  %v1748_v37 = vld [vmem:[%s9028_s25 + $0xa0] sm:$0xff]  ;;  %v427_v40 = vld [vmem:[%s9027_s1 + $0x98] sm:$0xff] }
  0xd0   :  { %5242 = vmatprep.subr.bf16.mxu1 %v5241_v41  ;;  %5206 = vmatprep.subr.bf16.mxu0 %v5205_v52  ;;  %v1749_v38 = vld [vmem:[%s9028_s25 + $0xa8] sm:$0xff]  ;;  %v428_v42 = vld [vmem:[%s9027_s1 + $0xa0] sm:$0xff]  ;;  %v1750_v43 = vld [vmem:[%s9028_s25 + $0xb0] sm:$0xff] }
  0xd1   :  { %v205_v39 = vld [vmem:[#allocation4 + $0x68] sm:$0xff]  ;;  %v1751_v44 = vld [vmem:[%s9028_s25 + $0xb8] sm:$0xff]  ;;  %v430_v47 = vld [vmem:[%s9027_s1 + $0xb0] sm:$0xff] }
  0xd2   :  { %1793 = vperm.xlu0 %5500, %v1738_v7   ;;  %1796 = vperm.xlu1 %5501, %v1739_v8   ;;  %v207_v45 = vld [vmem:[#allocation4 + $0x78] sm:$0xff]  ;;  %v429_v46 = vld [vmem:[%s9027_s1 + $0xa8] sm:$0xff]  ;;  %v1752_v48 = vld [vmem:[%s9028_s25 + $0xc0] sm:$0xff] }
  0xd3   :  { %5244 = vmatpush3.bf16.msra.mxu1 %v5241_v41  ;;  %5208 = vmatpush3.bf16.msra.mxu0 %v5205_v52  ;;  %v206_v41 = vld [vmem:[#allocation4 + $0x70] sm:$0xff]  ;;  %v1753_v49 = vld [vmem:[%s9028_s25 + $0xc8] sm:$0xff]  ;;  %v431_v50 = vld [vmem:[%s9027_s1 + $0xb8] sm:$0xff] }
  0xd4   :  { %5210 = vmatprep.subr.bf16.mxu0 %v5209_v59  ;;  %v1754_v52 = vld [vmem:[%s9028_s25 + $0xd0] sm:$0xff]  ;;  %v433_v54 = vld [vmem:[%s9027_s1 + $0xc8] sm:$0xff]  ;;  %v1756_v56 = vld [vmem:[%s9028_s25 + $0xe0] sm:$0xff] }
  0xd5   :  { %v434_v55 = vld [vmem:[%s9027_s1 + $0xd0] sm:$0xff]  ;;  %v1757_v57 = vld [vmem:[%s9028_s25 + $0xe8] sm:$0xff]  ;;  %v1759_v61 = vld [vmem:[%s9028_s25 + $0xf8] sm:$0xff] }
  0xd6   :  { %4702 = vmatmul.mubr.f32.vlgmr.msra.gmra.mrb[0].mxu1 %v409_v51  ;;  %1799 = vperm.xlu0 %5500, %v1740_v13   ;;  %v432_v51 = vld [vmem:[%s9027_s1 + $0xc0] sm:$0xff]  ;;  %v437_v62 = vld [vmem:[%s9027_s1 + $0xe8] sm:$0xff] }
  0xd7   :  { %4704 = vmatprep.mubr.f32.mxu1 %v410_v53  ;;  %5212 = vmatpush3.bf16.msra.mxu0 %v5209_v59  ;;  %v1755_v53 = vld [vmem:[%s9028_s25 + $0xd8] sm:$0xff]  ;;  %v436_v59 = vld [vmem:[%s9027_s1 + $0xe0] sm:$0xff]  ;;  %v1201_v2 = vld [vmem:[#allocation12 + $0x8] sm:$0xff] }
  0xd8   :  { %1802 = vperm.xlu1 %5501, %v1741_v14   ;;  %v1200_v1 = vld [vmem:[#allocation12] sm:$0xff]  ;;  %v1205_v8 = vld [vmem:[#allocation12 + $0x28] sm:$0xff] }
  0xd9   :  { %v1204_v7 = vld [vmem:[#allocation12 + $0x20] sm:$0xff]  ;;  %v1209_v14 = vld [vmem:[#allocation12 + $0x48] sm:$0xff] }
  0xda   :  { %4705 = vmatmul.mubr.f32.gmra.mrb[2].mxu1 %v411_v58  ;;  %4646 = vmatmul.mubr.f32.vlgmr.msra.gmra.mrb[0].mxu0 %v193_v3  ;;  %v435_v58 = vld [vmem:[%s9027_s1 + $0xd8] sm:$0xff]  ;;  %v5245_v3 = vpack.c.bf16 %v1201_v2, %v1200_v1  ;;  %v1208_v13 = vld [vmem:[#allocation12 + $0x40] sm:$0xff] }
  0xdb   :  { %4707 = vmatprep.mubr.f32.mxu1 %v412_v60  ;;  %4648 = vmatprep.mubr.f32.mxu0 %v194_v5  ;;  %v1758_v60 = vld [vmem:[%s9028_s25 + $0xf0] sm:$0xff]  ;;  %v1203_v5 = vld [vmem:[#allocation12 + $0x18] sm:$0xff] }
  0xdc   :  { %1805 = vperm.xlu0 %5500, %v1742_v19   ;;  %1808 = vperm.xlu1 %5501, %v1743_v20   ;;  %v1212_v19 = vld [vmem:[#allocation12 + $0x60] sm:$0xff]  ;;  %v1213_v20 = vld [vmem:[#allocation12 + $0x68] sm:$0xff] }
  0xdd   :  { %5246 = vmatprep.subr.bf16.mxu0 %v5245_v3 }
  0xde   :  { %4708 = vmatmul.mubr.f32.gmra.mrb[4].mxu1 %v413_v63  ;;  %4649 = vmatmul.mubr.f32.gmra.mrb[2].mxu0 %v195_v9  ;;  %v438_v63 = vld [vmem:[%s9027_s1 + $0xf0] sm:$0xff]  ;;  %v5253_v9 = vpack.c.bf16 %v1205_v8, %v1204_v7 }
  0xdf   :  { %4710 = vmatprep.mubr.f32.mxu1 %v414_v0  ;;  %4651 = vmatprep.mubr.f32.mxu0 %v196_v11  ;;  %v439_v0 = vld [vmem:[%s9027_s1 + $0xf8] sm:$0xff]  ;;  %v1458_v8 = vld [vmem:[#allocation7 + $0x50] sm:$0xff] }
  0xe0   :  { %1811 = vperm.xlu0 %5500, %v1744_v25   ;;  %1814 = vperm.xlu1 %5501, %v1745_v26   ;;  %v1207_v11 = vld [vmem:[#allocation12 + $0x38] sm:$0xff]  ;;  %v1214_v25 = vld [vmem:[#allocation12 + $0x70] sm:$0xff] }
  0xe1   :  { %5248 = vmatpush3.bf16.msra.mxu0 %v5245_v3  ;;  %v1215_v26 = vld [vmem:[#allocation12 + $0x78] sm:$0xff] }
  0xe2   :  { %4711 = vmatmul.mubr.f32.gmra.mrb[6].mxu1 %v415_v4  ;;  %4652 = vmatmul.mubr.f32.gmra.mrb[4].mxu0 %v197_v15  ;;  %v1202_v4 = vld [vmem:[#allocation12 + $0x10] sm:$0xff]  ;;  %v5261_v15 = vpack.c.bf16 %v1209_v14, %v1208_v13 }
  0xe3   :  { %4713 = vmatprep.mubr.f32.mxu1 %v416_v6  ;;  %4654 = vmatprep.mubr.f32.mxu0 %v198_v17  ;;  %v5249_v6 = vpack.c.bf16 %v1203_v5, %v1202_v4  ;;  %v1211_v17 = vld [vmem:[#allocation12 + $0x58] sm:$0xff] }
  0xe4   :  { %1817 = vperm.xlu0 %5500, %v1746_v31   ;;  %1820 = vperm.xlu1 %5501, %v1747_v32   ;;  %v1484_v31 = vld [vmem:[#allocation13 + $0x20] sm:$0xff]  ;;  %v1485_v32 = vld [vmem:[#allocation13 + $0x28] sm:$0xff] }
  0xe5   :  { %5250 = vmatprep.subr.bf16.mxu0 %v5249_v6 }
  0xe6   :  { %4714 = vmatmul.mubr.f32.gmra.mrb[8].mxu1 %v417_v10  ;;  %4655 = vmatmul.mubr.f32.gmra.mrb[6].mxu0 %v199_v21  ;;  %v1206_v10 = vld [vmem:[#allocation12 + $0x30] sm:$0xff]  ;;  %v5269_v21 = vpack.c.bf16 %v1213_v20, %v1212_v19 }
  0xe7   :  { %4716 = vmatprep.mubr.f32.mxu1 %v418_v12  ;;  %4657 = vmatprep.mubr.f32.mxu0 %v200_v23  ;;  %v5257_v12 = vpack.c.bf16 %v1207_v11, %v1206_v10  ;;  %v1481_v23 = vld [vmem:[#allocation13 + $0x8] sm:$0xff] }
  0xe8   :  { %1823 = vperm.xlu0 %5500, %v1748_v37   ;;  %1826 = vperm.xlu1 %5501, %v1749_v38   ;;  %v1488_v37 = vld [vmem:[#allocation13 + $0x40] sm:$0xff]  ;;  %v1489_v38 = vld [vmem:[#allocation13 + $0x48] sm:$0xff] }
  0xe9   :  { %5252 = vmatpush3.bf16.msra.mxu0 %v5249_v6 }
  0xea   :  { %4717 = vmatmul.mubr.f32.gmra.mrb[10].mxu1 %v419_v16  ;;  %4658 = vmatmul.mubr.f32.gmra.mrb[8].mxu0 %v201_v27  ;;  %v1210_v16 = vld [vmem:[#allocation12 + $0x50] sm:$0xff]  ;;  %v5273_v27 = vpack.c.bf16 %v1215_v26, %v1214_v25 }
  0xeb   :  { %4719 = vmatprep.mubr.f32.mxu1 %v420_v18  ;;  %4660 = vmatprep.mubr.f32.mxu0 %v202_v29  ;;  %v5265_v18 = vpack.c.bf16 %v1211_v17, %v1210_v16  ;;  %v1483_v29 = vld [vmem:[#allocation13 + $0x18] sm:$0xff] }
  0xec   :  { %1829 = vperm.xlu0 %5500, %v1750_v43   ;;  %1832 = vperm.xlu1 %5501, %v1751_v44   ;;  %v1492_v43 = vld [vmem:[#allocation13 + $0x60] sm:$0xff]  ;;  %v1493_v44 = vld [vmem:[#allocation13 + $0x68] sm:$0xff] }
  0xed   :  { %5254 = vmatprep.subr.bf16.mxu0 %v5253_v9 }
  0xee   :  { %4720 = vmatmul.mubr.f32.gmra.mrb[12].mxu1 %v421_v22  ;;  %4661 = vmatmul.mubr.f32.gmra.mrb[10].mxu0 %v203_v33  ;;  %v1480_v22 = vld [vmem:[#allocation13] sm:$0xff]  ;;  %v5285_v33 = vpack.c.bf16 %v1485_v32, %v1484_v31  ;;  %v1461_v31 = vld [vmem:[#allocation7 + $0x68] sm:$0xff] }
  0xef   :  { %4722 = vmatprep.mubr.f32.mxu1 %v422_v24  ;;  %4663 = vmatprep.mubr.f32.mxu0 %v204_v35  ;;  %v5277_v24 = vpack.c.bf16 %v1481_v23, %v1480_v22  ;;  %v1487_v35 = vld [vmem:[#allocation13 + $0x38] sm:$0xff]  ;;  %v6600_v22 = vld [vmem:[%s8923_s6] ss:$0 sm:$0xff] }
  0xf0   :  { %1835 = vperm.xlu0 %5500, %v1752_v48   ;;  %1838 = vperm.xlu1 %5501, %v1753_v49   ;;  %v1448_v49 = vld [vmem:[#allocation7] sm:$0xff] }
  0xf1   :  { %5256 = vmatpush3.bf16.msra.mxu0 %v5253_v9  ;;  %5278 = vmatprep.subr.bf16.mxu1 %v5277_v24  ;;  %v1459_v9 = vld [vmem:[#allocation7 + $0x58] sm:$0xff] }
  0xf2   :  { %4723 = vmatmul.mubr.f32.gmra.mrb[14].mxu1 %v423_v28  ;;  %4664 = vmatmul.mubr.f32.gmra.mrb[12].mxu0 %v205_v39  ;;  %v1482_v28 = vld [vmem:[#allocation13 + $0x10] sm:$0xff]  ;;  %v5293_v39 = vpack.c.bf16 %v1489_v38, %v1488_v37 }
  0xf3   :  { %4725 = vmatprep.mubr.f32.mxu1 %v424_v30  ;;  %4666 = vmatprep.mubr.f32.mxu0 %v206_v41  ;;  %v5281_v30 = vpack.c.bf16 %v1483_v29, %v1482_v28  ;;  %v1491_v41 = vld [vmem:[#allocation13 + $0x58] sm:$0xff] }
  0xf4   :  { %1841 = vperm.xlu0 %5500, %v1754_v52   ;;  %1844 = vperm.xlu1 %5501, %v1755_v53   ;;  %v1451_v52 = vld [vmem:[#allocation7 + $0x18] sm:$0xff]  ;;  %v1452_v53 = vld [vmem:[#allocation7 + $0x20] sm:$0xff] }
  0xf5   :  { %5258 = vmatprep.subr.bf16.mxu0 %v5257_v12  ;;  %5280 = vmatpush3.bf16.msra.mxu1 %v5277_v24 }
  0xf6   :  { %4726 = vmatmul.mubr.f32.gmra.mrb[16].mxu1 %v425_v34  ;;  %4667 = vmatmul.mubr.f32.gmra.mrb[14].mxu0 %v207_v45  ;;  %v1486_v34 = vld [vmem:[#allocation13 + $0x30] sm:$0xff]  ;;  %v5301_v45 = vpack.c.bf16 %v1493_v44, %v1492_v43 }
  0xf7   :  { %4728 = vmatprep.mubr.f32.mxu1 %v426_v36  ;;  %5260 = vmatpush3.bf16.msra.mxu0 %v5257_v12  ;;  %v5289_v36 = vpack.c.bf16 %v1487_v35, %v1486_v34 }
  0xf8   :  { %1847 = vperm.xlu0 %5500, %v1756_v56   ;;  %1850 = vperm.xlu1 %5501, %v1757_v57   ;;  %v1455_v56 = vld [vmem:[#allocation7 + $0x38] sm:$0xff]  ;;  %v6558_v57 = vld [vmem:[%s8925_s8] ss:$0 sm:$0xff] }
  0xf9   :  { %5262 = vmatprep.subr.bf16.mxu0 %v5261_v15  ;;  %5282 = vmatprep.subr.bf16.mxu1 %v5281_v30 }
  0xfa   :  { %4729 = vmatmul.mubr.f32.gmra.mrb[18].mxu1 %v427_v40  ;;  %v1490_v40 = vld [vmem:[#allocation13 + $0x50] sm:$0xff] }
  0xfb   :  { %4731 = vmatprep.mubr.f32.mxu1 %v428_v42  ;;  %5264 = vmatpush3.bf16.msra.mxu0 %v5261_v15  ;;  %v5297_v42 = vpack.c.bf16 %v1491_v41, %v1490_v40 }
  0xfc   :  { %1853 = vperm.xlu0 %5500, %v1758_v60   ;;  %1856 = vperm.xlu1 %5501, %v1759_v61  }
  0xfd   :  { %5266 = vmatprep.subr.bf16.mxu0 %v5265_v18  ;;  %5284 = vmatpush3.bf16.msra.mxu1 %v5281_v30  ;;  %v1460_v30 = vld [vmem:[#allocation7 + $0x60] sm:$0xff] }
  0xfe   :  { %4732 = vmatmul.mubr.f32.gmra.mrb[20].mxu1 %v429_v46  ;;  %5286 = vmatprep.subr.bf16.mxu1 %v5285_v33  ;;  %v1494_v46 = vld [vmem:[#allocation13 + $0x70] sm:$0xff] }
  0xff   :  { %4734 = vmatprep.mubr.f32.mxu1 %v430_v47  ;;  %5268 = vmatpush3.bf16.msra.mxu0 %v5265_v18  ;;  %v1495_v47 = vld [vmem:[#allocation13 + $0x78] sm:$0xff] }
 0x100   :  { %5270 = vmatprep.subr.bf16.mxu0 %v5269_v21  ;;  %v5305_v48 = vpack.c.bf16 %v1495_v47, %v1494_v46 }
 0x101   :  { %5288 = vmatpush3.bf16.msra.mxu1 %v5285_v33 }
 0x102   :  { %4735 = vmatmul.mubr.f32.gmra.mrb[22].mxu1 %v431_v50  ;;  %5290 = vmatprep.subr.bf16.mxu1 %v5289_v36  ;;  %v1449_v50 = vld [vmem:[#allocation7 + $0x8] sm:$0xff] }
 0x103   :  { %4737 = vmatprep.mubr.f32.mxu1 %v432_v51  ;;  %5272 = vmatpush3.bf16.msra.mxu0 %v5269_v21  ;;  %v1450_v51 = vld [vmem:[#allocation7 + $0x10] sm:$0xff] }
 0x104   :  { %5274 = vmatprep.subr.bf16.mxu0 %v5273_v27 }
 0x105   :  { %5292 = vmatpush3.bf16.msra.mxu1 %v5289_v36 }
 0x106   :  { %4738 = vmatmul.mubr.f32.gmra.mrb[24].mxu1 %v433_v54  ;;  %5294 = vmatprep.subr.bf16.mxu1 %v5293_v39  ;;  %v1453_v54 = vld [vmem:[#allocation7 + $0x28] sm:$0xff] }
 0x107   :  { %4740 = vmatprep.mubr.f32.mxu1 %v434_v55  ;;  %5276 = vmatpush3.bf16.msra.mxu0 %v5273_v27  ;;  %v1454_v55 = vld [vmem:[#allocation7 + $0x30] sm:$0xff] }
 0x109   :  { %5296 = vmatpush3.bf16.msra.mxu1 %v5293_v39 }
 0x10a   :  { %4741 = vmatmul.mubr.f32.gmra.mrb[26].mxu1 %v435_v58  ;;  %5298 = vmatprep.subr.bf16.mxu1 %v5297_v42  ;;  %v1456_v58 = vld [vmem:[#allocation7 + $0x40] sm:$0xff] }
 0x10b   :  { %4743 = vmatprep.mubr.f32.mxu1 %v436_v59  ;;  %v1457_v59 = vld [vmem:[#allocation7 + $0x48] sm:$0xff] }
 0x10d   :  { %5300 = vmatpush3.bf16.msra.mxu1 %v5297_v42 }
 0x10e   :  { %4744 = vmatmul.mubr.f32.gmra.mrb[28].mxu1 %v437_v62  ;;  %5302 = vmatprep.subr.bf16.mxu1 %v5301_v45 }
 0x10f   :  { %4746 = vmatprep.mubr.f32.mxu1 %v438_v63 }
 0x111   :  { %5304 = vmatpush3.bf16.msra.mxu1 %v5301_v45 }
 0x112   :  { %4747 = vmatmul.mubr.f32.gmra.mrb[30].mxu1 %v439_v0  ;;  %5306 = vmatprep.subr.bf16.mxu1 %v5305_v48 }
 0x113   :  { %4861 = vmatprep.mubr.f32.mxu1 %v1448_v49 }
 0x115   :  { %5308 = vmatpush3.bf16.msra.mxu1 %v5305_v48 }
 0x118   :  { %4862 = vmatmul.mubr.f32.vlgmr.msra.gmra.mrb[32].mxu1 %v1449_v50 }
 0x119   :  { %4864 = vmatprep.mubr.f32.mxu1 %v1450_v51 }
 0x11c   :  { %4865 = vmatmul.mubr.f32.gmra.mrb[34].mxu1 %v1451_v52 }
 0x11d   :  { %4867 = vmatprep.mubr.f32.mxu1 %v1452_v53 }
 0x120   :  { %4868 = vmatmul.mubr.f32.gmra.mrb[36].mxu1 %v1453_v54 }
 0x121   :  { %4870 = vmatprep.mubr.f32.mxu1 %v1454_v55 }
 0x124   :  { %4871 = vmatmul.mubr.f32.gmra.mrb[38].mxu1 %v1455_v56 }
 0x125   :  { %4873 = vmatprep.mubr.f32.mxu1 %v1456_v58 }
 0x128   :  { %4874 = vmatmul.mubr.f32.gmra.mrb[40].mxu1 %v1457_v59 }
 0x129   :  { %4876 = vmatprep.mubr.f32.mxu1 %v1458_v8 }
 0x12c   :  { %4877 = vmatmul.mubr.f32.gmra.mrb[42].mxu1 %v1459_v9 }
 0x12d   :  { %4879 = vmatprep.mubr.f32.mxu1 %v1460_v30 }
 0x130   :  { %4880 = vmatmul.mubr.f32.gmra.mrb[44].mxu1 %v1461_v31 }
 0x1a9   :  { %v4703_v60 = vpop.f32.mrb[0].mxu1 }
 0x1aa   :  { %v6561_v61 = vadd.f32 %v4703_v60, %v6558_v57  ;;  %v529_v62 = vpop.f32.mrb[1].mxu1 }
 0x1ab   :  { %v6564_v63 = vadd.f32 %v6558_v57, %v529_v62 }
 0x1ac   :  { %v6567_v0 = vmul.f32 0.5, %v6561_v61 }
 0x1ad   :  { %v6570_v1 = vmul.f32 0.5, %v6564_v63  ;;  %v4706_v2 = vpop.f32.mrb[2].mxu1  ;;  %v4647_v21 = vpop.f32.mrb[0].mxu0 }
 0x1ae   :  { %v753_v3 = vmin.f32 %v6567_v0, 14.0  ;;  %v6574_v4 = vadd.f32 %v4706_v2, %v6558_v57  ;;  %v539_v5 = vpop.f32.mrb[3].mxu1  ;;  %v297_v26 = vpop.f32.mrb[1].mxu0  ;;  %v303_v36 = vadd.f32 %v4647_v21, %v6600_v22  ;;  %vm721_vm3 = vcmp.gt.f32.partialorder %v6567_v0, 14.0 }
 0x1af   :  { %v752_v6 = vmin.f32 %v6570_v1, 14.0  ;;  %v6578_v7 = vadd.f32 %v6558_v57, %v539_v5  ;;  %v298_v37 = vadd.f32 %v6600_v22, %v297_v26  ;;  %vm720_vm2 = vcmp.gt.f32.partialorder %v6570_v1, 14.0 }
 0x1b0   :  { %v786_v10 = vmul.f32 1.442695, %v753_v3  ;;  %v6581_v11 = vmul.f32 0.5, %v6574_v4  ;;  %v1462_v3 = vld [vmem:[#allocation7 + $0x70] sm:$0xff] }
 0x1b1   :  { %v784_v12 = vmul.f32 1.442695, %v752_v6  ;;  %v6584_v13 = vmul.f32 0.5, %v6578_v7  ;;  %v4709_v14 = vpop.f32.mrb[4].mxu1  ;;  %v4650_v38 = vpop.f32.mrb[2].mxu0  ;;  %v6636_v51 = vpack.c.bf16 %v303_v36, %v298_v37  ;;  %4882 = vmatprep.mubr.f32.mxu1 %v1462_v3 }
 0x1b2   :  { %5502 = vpow2.f32 %v786_v10  ;;  %v6587_v15 = vadd.f32 %v4709_v14, %v6558_v57  ;;  %v549_v16 = vpop.f32.mrb[5].mxu1  ;;  %v755_v17 = vmin.f32 %v6581_v11, 14.0  ;;  %v6621_v41 = vpop.f32.mrb[3].mxu0  ;;  %v6656_v9 = vadd.f32 %v4650_v38, %v6600_v22  ;;  %v1463_v10 = vld [vmem:[#allocation7 + $0x78] sm:$0xff]  ;;  %v1464_v38 = vld [vmem:[#allocation7 + $0x80] sm:$0xff] }
 0x1b3   :  { %5504 = vpow2.f32 %v784_v12  ;;  %v754_v18 = vmin.f32 %v6584_v13, 14.0  ;;  %v6592_v19 = vadd.f32 %v6558_v57, %v549_v16  ;;  %5310 = vmatprep.subr.bf16.mxu0 %v6636_v51  ;;  %4883 = vmatmul.mubr.f32.gmra.mrb[46].mxu1 %v1463_v10  ;;  %vm722_vm5 = vcmp.gt.f32.partialorder %v6584_v13, 14.0 }
 0x1b4   :  { %v6595_v20 = vmul.f32 0.5, %v6587_v15  ;;  %v790_v32 = vmul.f32 1.442695, %v755_v17  ;;  %4885 = vmatprep.mubr.f32.mxu1 %v1464_v38  ;;  %vm723_vm7 = vcmp.gt.f32.partialorder %v6581_v11, 14.0 }
 0x1b5   :  { %v788_v23 = vmul.f32 1.442695, %v754_v18  ;;  %v6603_v24 = vmul.f32 0.5, %v6592_v19  ;;  %v4712_v25 = vpop.f32.mrb[6].mxu1  ;;  %v6638_v52 = vpop.f32.mrb[4].mxu0 }
 0x1b6   :  { %v757_v27 = vmin.f32 %v6595_v20, 14.0  ;;  %v6607_v28 = vadd.f32 %v4712_v25, %v6558_v57  ;;  %v559_v29 = vpop.f32.mrb[7].mxu1  ;;  %v6650_v2 = vpop.f32.mrb[5].mxu0  ;;  %vm725_vm10 = vcmp.gt.f32.partialorder %v6595_v20, 14.0 }
 0x1b7   :  { %5506 = vpow2.f32 %v788_v23  ;;  %v6610_v33 = vadd.f32 %v6558_v57, %v559_v29  ;;  %v756_v34 = vmin.f32 %v6603_v24, 14.0  ;;  %vm724_vm8 = vcmp.gt.f32.partialorder %v6603_v24, 14.0 }
 0x1b8   :  { %v6614_v35 = vmul.f32 0.5, %v6607_v28  ;;  %v794_v42 = vmul.f32 1.442695, %v757_v27  ;;  %5508 = vpow2.f32 %v790_v32 }
 0x1b9   :  { %v6619_v39 = vmul.f32 0.5, %v6610_v33  ;;  %v4715_v40 = vpop.f32.mrb[8].mxu1  ;;  %v792_v49 = vmul.f32 1.442695, %v756_v34  ;;  %v6663_v17 = vpop.f32.mrb[6].mxu0 }
 0x1ba   :  { %v759_v43 = vmin.f32 %v6614_v35, 14.0  ;;  %v6625_v44 = vadd.f32 %v4715_v40, %v6558_v57  ;;  %v569_v45 = vpop.f32.mrb[9].mxu1  ;;  %5510 = vpow2.f32 %v794_v42  ;;  %9029 = vst [vmem:[#allocation29_spill] sm:$0xff] %v6663_v17  ;;  %v6671_v27 = vpop.f32.mrb[7].mxu0  ;;  %v1465_v40 = vld [vmem:[#allocation7 + $0x88] sm:$0xff]  ;;  %vm727_vm15 = vcmp.gt.f32.partialorder %v6614_v35, 14.0 }
 0x1bb   :  { %v758_v46 = vmin.f32 %v6619_v39, 14.0  ;;  %v6629_v47 = vadd.f32 %v6558_v57, %v569_v45  ;;  %9030 = vst [vmem:[#allocation30_spill] sm:$0xff] %v6671_v27  ;;  %4886 = vmatmul.mubr.f32.gmra.mrb[48].mxu1 %v1465_v40  ;;  %vm726_vm12 = vcmp.gt.f32.partialorder %v6619_v39, 14.0 }
 0x1bc   :  { %v6631_v48 = vpop.eup %5502  ;;  %v6634_v50 = vmul.f32 0.5, %v6625_v44  ;;  %v798_v56 = vmul.f32 1.442695, %v759_v43 }
 0x1bd   :  { %v6640_v53 = vpop.eup %5504  ;;  %v857_v54 = vadd.f32 1.0, %v6631_v48  ;;  %v860_v55 = vmul.f32 -0.5, %v6631_v48  ;;  %v6646_v59 = vmul.f32 0.5, %v6629_v47  ;;  %v4718_v60 = vpop.f32.mrb[10].mxu1  ;;  %v796_v5 = vmul.f32 1.442695, %v758_v46 }
 0x1be   :  { %v761_v58 = vmin.f32 %v6634_v50, 14.0  ;;  %v848_v62 = vadd.f32 1.0, %v6640_v53  ;;  %v6653_v6 = vadd.f32 %v4718_v60, %v6558_v57  ;;  %v579_v8 = vpop.f32.mrb[11].mxu1  ;;  %v863_v12 = vand.u32 2147483647, %v6631_v48 }
 0x1bf   :  { %5512 = vlog2.f32 %v857_v54  ;;  %v760_v14 = vmin.f32 %v6646_v59, 14.0  ;;  %v6661_v16 = vadd.f32 %v6558_v57, %v579_v8  ;;  %v851_v26 = vmul.f32 -0.5, %v6640_v53 }
 0x1c0   :  { %5514 = vpow2.f32 %v792_v49  ;;  %v802_v21 = vmul.f32 1.442695, %v761_v58  ;;  %v6668_v23 = vmul.f32 0.5, %v6653_v6  ;;  %v861_v29 = vadd.f32 1.0, %v860_v55  ;;  %v6689_v49 = vpop.f32.mrb[8].mxu0 }
 0x1c1   :  { %v6665_v18 = vpop.eup %5506  ;;  %v4721_v25 = vpop.f32.mrb[12].mxu1  ;;  %5516 = vlog2.f32 %v848_v62  ;;  %v6674_v30 = vmul.f32 0.5, %v6661_v16  ;;  %v800_v34 = vmul.f32 1.442695, %v760_v14  ;;  %v854_v45 = vand.u32 2147483647, %v6640_v53 }
 0x1c2   :  { %5518 = vpow2.f32 %v798_v56  ;;  %v6677_v31 = vadd.f32 %v4721_v25, %v6558_v57  ;;  %v589_v32 = vpop.f32.mrb[13].mxu1  ;;  %v763_v36 = vmin.f32 %v6668_v23, 14.0  ;;  %v866_v46 = vadd.f32 1.0, %v6665_v18  ;;  %9033 = vst [vmem:[#allocation33_spill] sm:$0xff] %v6689_v49  ;;  %v6698_v60 = vpop.eup %5508 }
 0x1c3   :  { %5520 = vpow2.f32 %v796_v5  ;;  %v6681_v37 = vadd.f32 %v6558_v57, %v589_v32  ;;  %v762_v42 = vmin.f32 %v6674_v30, 14.0  ;;  %vm6691_vm0 = vcmp.lt.f32.partialorder %v863_v12, 0.0004427343  ;;  %v6704_v10 = vpop.f32.mrb[9].mxu0 }
 0x1c4   :  { %9031 = vst [vmem:[#allocation31_spill] sm:$0xff] %v6677_v31  ;;  %v6685_v43 = vmul.f32 0.5, %v6677_v31  ;;  %5522 = vpow2.f32 %v802_v21  ;;  %v852_v58 = vadd.f32 1.0, %v851_v26  ;;  %v806_v62 = vmul.f32 1.442695, %v763_v36  ;;  %9037 = vst [vmem:[#allocation35_spill] sm:$0xff] %v6704_v10  ;;  %v6711_v26 = vpop.eup %5510 }
 0x1c5   :  { %9032 = vst [vmem:[#allocation32_spill] sm:$0xff] %v6681_v37  ;;  %v6696_v55 = vmul.f32 0.5, %v6681_v37  ;;  %v4724_v56 = vpop.f32.mrb[14].mxu1  ;;  %5524 = vlog2.f32 %v866_v46  ;;  %v804_v12 = vmul.f32 1.442695, %v762_v42  ;;  %v869_v25 = vmul.f32 -0.5, %v6665_v18 }
 0x1c6   :  { %v765_v3 = vmin.f32 %v6685_v43, 14.0  ;;  %v6702_v5 = vadd.f32 %v4724_v56, %v6558_v57  ;;  %v599_v8 = vpop.f32.mrb[15].mxu1  ;;  %v862_v32 = vmul.f32 %v6631_v48, %v861_v29  ;;  %5526 = vpow2.f32 %v800_v34  ;;  %v6721_v40 = vpop.f32.mrb[10].mxu0 }
 0x1c7   :  { %v764_v14 = vmin.f32 %v6696_v55, 14.0  ;;  %v6708_v21 = vadd.f32 %v6558_v57, %v599_v8  ;;  %vm6717_vm1 = vcmp.lt.f32.partialorder %v854_v45, 0.0004427343  ;;  %9042 = vst [vmem:[#allocation38_spill] sm:$0xff] %v6721_v40  ;;  %v853_v48 = vmul.f32 %v6640_v53, %v852_v58  ;;  %v6736_v49 = vpop.f32.mrb[11].mxu0 }
 0x1c8   :  { %9036 = vst [vmem:[#allocation34_spill] sm:$0xff] %v6702_v5  ;;  %v6715_v36 = vmul.f32 0.5, %v6702_v5  ;;  %v810_v46 = vmul.f32 1.442695, %v765_v3  ;;  %v875_v29 = vadd.f32 1.0, %v6698_v60  ;;  %5528 = vpow2.f32 %v806_v62  ;;  %9044 = vst [vmem:[#allocation40_spill] sm:$0xff] %v6736_v49 }
 0x1c9   :  { %9038 = vst [vmem:[#allocation36_spill] sm:$0xff] %v6708_v21  ;;  %v5513_v42 = vpop.eup %5512  ;;  %v6724_v56 = vmul.f32 0.5, %v6708_v21  ;;  %v4727_v8 = vpop.f32.mrb[16].mxu1  ;;  %5530 = vpow2.f32 %v804_v12  ;;  %v808_v27 = vmul.f32 1.442695, %v764_v14  ;;  %v870_v58 = vadd.f32 1.0, %v869_v25 }
 0x1ca   :  { %9039 = vst [vmem:[#allocation37_spill] sm:$0xff] %v6715_v36  ;;  %v6729_v34 = vpop.eup %5514  ;;  %v859_v45 = vmul.f32 0.6931472, %v5513_v42  ;;  %v767_v40 = vmin.f32 %v6715_v36, 14.0  ;;  %v6734_v3 = vadd.f32 %v4727_v8, %v6558_v57  ;;  %v609_v10 = vpop.f32.mrb[17].mxu1  ;;  %5532 = vlog2.f32 %v875_v29 }
 0x1cb   :  { %v5517_v5 = vpop.eup %5516  ;;  %v6739_v53 = vadd.f32 %v6558_v57, %v609_v10  ;;  %v766_v42 = vmin.f32 %v6724_v56, 14.0  ;;  %v6749_v17 = vpop.f32.mrb[12].mxu0  ;;  %v872_v10 = vand.u32 2147483647, %v6665_v18  ;;  %v308_v25 = vadd.f32 %v6600_v22, %v6621_v41 }
 0x1cc   :  { %9043 = vst [vmem:[#allocation39_spill] sm:$0xff] %v6734_v3  ;;  %v6741_v21 = vpop.eup %5518  ;;  %v865_v62 = vsel %vm6691_vm0, %v862_v32, %v859_v45  ;;  %v6747_v8 = vmul.f32 0.5, %v6734_v3  ;;  %v850_v36 = vmul.f32 0.6931472, %v5517_v5  ;;  %9047 = vst [vmem:[#allocation43_spill] sm:$0xff] %v6749_v17  ;;  %v6756_v54 = vpop.f32.mrb[13].mxu0  ;;  %5534 = vpow2.f32 %v810_v46 }
 0x1cd   :  { %9045 = vst [vmem:[#allocation41_spill] sm:$0xff] %v6739_v53  ;;  %v6751_v49 = vpop.eup %5520  ;;  %v814_v12 = vmul.f32 1.442695, %v767_v40  ;;  %v4730_v14 = vpop.f32.mrb[18].mxu1  ;;  %9048 = vst [vmem:[#allocation44_spill] sm:$0xff] %v6756_v54  ;;  %v6759_v32 = vmul.f32 0.5, %v6739_v53  ;;  %5536 = vpow2.f32 %v808_v27  ;;  %v871_v46 = vmul.f32 %v6665_v18, %v870_v58 }
 0x1ce   :  { %9046 = vst [vmem:[#allocation42_spill] sm:$0xff] %v6747_v8  ;;  %v6762_v5 = vadd.f32 %v4730_v14, %v6558_v57  ;;  %v619_v45 = vpop.f32.mrb[19].mxu1  ;;  %v856_v40 = vsel %vm6717_vm1, %v853_v48, %v850_v36  ;;  %v1466_v17 = vld [vmem:[#allocation7 + $0x90] sm:$0xff]  ;;  %v6766_v3 = vpop.eup %5522  ;;  %v1137_v29 = vmul.f32 2.0, %v865_v62  ;;  %v1467_v54 = vld [vmem:[#allocation7 + $0x98] sm:$0xff]  ;;  %v769_v14 = vmin.f32 %v6747_v8, 14.0 }
 0x1cf   :  { %9049 = vst [vmem:[#allocation45_spill] sm:$0xff] %v6759_v32  ;;  %v6769_v41 = vadd.f32 %v6558_v57, %v619_v45  ;;  %4888 = vmatprep.mubr.f32.mxu1 %v1466_v17  ;;  %v5525_v53 = vpop.eup %5524  ;;  %v812_v31 = vmul.f32 1.442695, %v766_v42  ;;  %v1136_v36 = vmul.f32 2.0, %v856_v40  ;;  %5538 = vpow2.f32 %v814_v12  ;;  %v6789_v12 = vpop.f32.mrb[14].mxu0 }
 0x1d0   :  { %9050 = vst [vmem:[#allocation46_spill] sm:$0xff] %v6762_v5  ;;  %v6774_v37 = vmul.f32 0.5, %v6762_v5  ;;  %4889 = vmatmul.mubr.f32.gmra.mrb[50].mxu1 %v1467_v54  ;;  %v868_v48 = vmul.f32 0.6931472, %v5525_v53  ;;  %v5313_v62 = vpack.c.bf16 %v6656_v9, %v308_v25  ;;  %v6780_v18 = vpop.eup %5526  ;;  %v768_v17 = vmin.f32 %v6759_v32, 14.0  ;;  %9055 = vst [vmem:[#allocation51_spill] sm:$0xff] %v6789_v12 }
 0x1d1   :  { %9051 = vst [vmem:[#allocation47_spill] sm:$0xff] %v6769_v41  ;;  %v6777_v38 = vmul.f32 0.5, %v6769_v41  ;;  %v4733_v27 = vpop.f32.mrb[20].mxu1  ;;  %v1168_v42 = vsel %vm720_vm2, %v6564_v63, %v1136_v36  ;;  %vm873_vm4 = vcmp.lt.f32.partialorder %v872_v10, 0.0004427343  ;;  %v1169_v53 = vsel %vm721_vm3, %v6561_v61, %v1137_v29  ;;  %v6798_v40 = vpop.f32.mrb[15].mxu0 }
 0x1d2   :  { %9052 = vst [vmem:[#allocation48_spill] sm:$0xff] %v6774_v37  ;;  %v6784_v58 = vadd.f32 %v4733_v27, %v6558_v57  ;;  %v629_v54 = vpop.f32.mrb[21].mxu1  ;;  %v771_v9 = vmin.f32 %v6774_v37, 14.0  ;;  %4781 = vmatprep.mubr.f32.mxu0 %v1168_v42  ;;  %v874_v45 = vsel %vm873_vm4, %v871_v46, %v868_v48  ;;  %9057 = vst [vmem:[#allocation53_spill] sm:$0xff] %v6798_v40  ;;  %v6800_v27 = vpop.eup %5528  ;;  %v818_v63 = vmul.f32 1.442695, %v769_v14 }
 0x1d3   :  { %9053 = vst [vmem:[#allocation49_spill] sm:$0xff] %v6777_v38  ;;  %v6796_v25 = vadd.f32 %v6558_v57, %v629_v54  ;;  %4782 = vmatmul.mubr.f32.vlgmr.msra.gmra.mrb[16].mxu0 %v1169_v53  ;;  %v1138_v10 = vmul.f32 2.0, %v874_v45  ;;  %v878_v0 = vmul.f32 -0.5, %v6698_v60  ;;  %v6806_v61 = vpop.eup %5530  ;;  %5540 = vpow2.f32 %v812_v31  ;;  %v1468_v31 = vld [vmem:[#allocation7 + $0xa0] sm:$0xff] }
 0x1d4   :  { %9054 = vst [vmem:[#allocation50_spill] sm:$0xff] %v6784_v58  ;;  %v6803_v1 = vmul.f32 0.5, %v6784_v58  ;;  %v770_v29 = vmin.f32 %v6777_v38, 14.0  ;;  %5312 = vmatpush3.bf16.msra.mxu0 %v6636_v51  ;;  %v816_v14 = vmul.f32 1.442695, %v768_v17  ;;  %v5533_v45 = vpop.eup %5532  ;;  %4891 = vmatprep.mubr.f32.mxu1 %v1468_v31  ;;  %v1469_v17 = vld [vmem:[#allocation7 + $0xa8] sm:$0xff]  ;;  %5542 = vpow2.f32 %v818_v63 }
 0x1d5   :  { %9056 = vst [vmem:[#allocation52_spill] sm:$0xff] %v6796_v25  ;;  %v6810_v36 = vmul.f32 0.5, %v6796_v25  ;;  %v4736_v46 = vpop.f32.mrb[22].mxu1  ;;  %v1170_v42 = vsel %vm722_vm5, %v6578_v7, %v1138_v10  ;;  %v881_v53 = vand.u32 2147483647, %v6698_v60  ;;  %5314 = vmatprep.subr.bf16.mxu0 %v5313_v62  ;;  %v879_v51 = vadd.f32 1.0, %v878_v0  ;;  %4892 = vmatmul.mubr.f32.gmra.mrb[52].mxu1 %v1469_v17 }
 0x1d6   :  { %9058 = vst [vmem:[#allocation54_spill] sm:$0xff] %v6803_v1  ;;  %v6815_v48 = vadd.f32 %v4736_v46, %v6558_v57  ;;  %v639_v54 = vpop.f32.mrb[23].mxu1  ;;  %v822_v40 = vmul.f32 1.442695, %v771_v9  ;;  %v773_v12 = vmin.f32 %v6803_v1, 14.0  ;;  %4784 = vmatprep.mubr.f32.mxu0 %v1170_v42  ;;  %v6823_v46 = vpop.eup %5534  ;;  %v884_v58 = vadd.f32 1.0, %v6729_v34 }
 0x1d7   :  { %9059 = vst [vmem:[#allocation55_spill] sm:$0xff] %v6810_v36  ;;  %v6821_v13 = vadd.f32 %v6558_v57, %v639_v54  ;;  %v877_v10 = vmul.f32 0.6931472, %v5533_v45  ;;  %v6829_v9 = vpop.eup %5536  ;;  %v820_v1 = vmul.f32 1.442695, %v770_v29  ;;  %v772_v42 = vmin.f32 %v6810_v36, 14.0 }
 0x1d8   :  { %9060 = vst [vmem:[#allocation56_spill] sm:$0xff] %v6815_v48  ;;  %v6826_v7 = vmul.f32 0.5, %v6815_v48  ;;  %v880_v0 = vmul.f32 %v6698_v60, %v879_v51  ;;  %5316 = vmatpush3.bf16.msra.mxu0 %v5313_v62  ;;  %5544 = vpow2.f32 %v816_v14  ;;  %vm882_vm6 = vcmp.lt.f32.partialorder %v881_v53, 0.0004427343 }
 0x1d9   :  { %9061 = vst [vmem:[#allocation57_spill] sm:$0xff] %v6821_v13  ;;  %v6833_v54 = vmul.f32 0.5, %v6821_v13  ;;  %v4739_v31 = vpop.f32.mrb[24].mxu1  ;;  %v6840_v48 = vpop.eup %5538  ;;  %5546 = vpow2.f32 %v822_v40  ;;  %v826_v29 = vmul.f32 1.442695, %v773_v12  ;;  %v893_v12 = vadd.f32 1.0, %v6711_v26 }
 0x1da   :  { %9062 = vst [vmem:[#allocation58_spill] sm:$0xff] %v6826_v7  ;;  %v775_v63 = vmin.f32 %v6826_v7, 14.0  ;;  %v6838_v45 = vadd.f32 %v4739_v31, %v6558_v57  ;;  %v649_v17 = vpop.f32.mrb[25].mxu1  ;;  %v883_v25 = vsel %vm882_vm6, %v880_v0, %v877_v10  ;;  %5548 = vlog2.f32 %v884_v58  ;;  %v1471_v58 = vld [vmem:[#allocation7 + $0xb8] sm:$0xff] }
 0x1db   :  { %9063 = vst [vmem:[#allocation59_spill] sm:$0xff] %v6833_v54  ;;  %v1139_v36 = vmul.f32 2.0, %v883_v25  ;;  %5550 = vpow2.f32 %v820_v1  ;;  %v824_v60 = vmul.f32 1.442695, %v772_v42  ;;  %v774_v62 = vmin.f32 %v6833_v54, 14.0  ;;  %v1470_v25 = vld [vmem:[#allocation7 + $0xb0] sm:$0xff] }
 0x1dc   :  { %9064 = vst [vmem:[#allocation60_spill] sm:$0xff] %v6838_v45  ;;  %v6843_v13 = vmul.f32 0.5, %v6838_v45  ;;  %v830_v53 = vmul.f32 1.442695, %v775_v63  ;;  %v887_v31 = vmul.f32 -0.5, %v6729_v34  ;;  %5552 = vpow2.f32 %v826_v29  ;;  %4894 = vmatprep.mubr.f32.mxu1 %v1470_v25  ;;  %v1472_v54 = vld [vmem:[#allocation7 + $0xc0] sm:$0xff] }
 0x1dd   :  { %v4742_v14 = vpop.f32.mrb[26].mxu1  ;;  %v1171_v51 = vsel %vm723_vm7, %v6574_v4, %v1139_v36  ;;  %v6850_v10 = vpop.eup %5540  ;;  %v6854_v11 = vadd.f32 %v6558_v57, %v649_v17  ;;  %5554 = vlog2.f32 %v893_v12  ;;  %4895 = vmatmul.mubr.f32.gmra.mrb[54].mxu1 %v1471_v58  ;;  %v828_v4 = vmul.f32 1.442695, %v774_v62 }
 0x1de   :  { %9065 = vst [vmem:[#allocation61_spill] sm:$0xff] %v6843_v13  ;;  %v659_v40 = vpop.f32.mrb[27].mxu1  ;;  %4785 = vmatmul.mubr.f32.gmra.mrb[18].mxu0 %v1171_v51  ;;  %v777_v1 = vmin.f32 %v6843_v13, 14.0  ;;  %5556 = vpow2.f32 %v824_v60  ;;  %v6857_v36 = vadd.f32 %v4742_v14, %v6558_v57  ;;  %v902_v42 = vadd.f32 1.0, %v6751_v49  ;;  %v6860_v63 = vpop.eup %5542  ;;  %4897 = vmatprep.mubr.f32.mxu1 %v1472_v54 }
 0x1df   :  { %9066 = vst [vmem:[#allocation62_spill] sm:$0xff] %v6854_v11  ;;  %5558 = vpow2.f32 %v830_v53  ;;  %v888_v29 = vadd.f32 1.0, %v887_v31  ;;  %v890_v51 = vand.u32 2147483647, %v6729_v34  ;;  %v896_v17 = vmul.f32 -0.5, %v6711_v26 }
 0x1e0   :  { %9067 = vst [vmem:[#allocation63_spill] sm:$0xff] %v6857_v36  ;;  %5560 = vlog2.f32 %v902_v42  ;;  %v834_v60 = vmul.f32 1.442695, %v777_v1  ;;  %v6867_v62 = vmul.f32 0.5, %v6854_v11  ;;  %v899_v14 = vand.u32 2147483647, %v6711_v26 }
 0x1e1   :  { %v4745_v0 = vpop.f32.mrb[28].mxu1  ;;  %v911_v58 = vadd.f32 1.0, %v6741_v21  ;;  %5562 = vpow2.f32 %v828_v4  ;;  %v6875_v53 = vmul.f32 0.5, %v6857_v36  ;;  %v905_v31 = vmul.f32 -0.5, %v6751_v49 }
 0x1e2   :  { %v669_v25 = vpop.f32.mrb[29].mxu1  ;;  %v6864_v12 = vpop.eup %5544  ;;  %9068 = vst [vmem:[#allocation64_spill] sm:$0xff] %v6867_v62  ;;  %v889_v13 = vmul.f32 %v6729_v34, %v888_v29  ;;  %vm6881_vm9 = vcmp.lt.f32.partialorder %v890_v51, 0.0004427343  ;;  %v6886_v7 = vadd.f32 %v6558_v57, %v659_v40  ;;  %v897_v37 = vadd.f32 1.0, %v896_v17 }
 0x1e3   :  { %v6871_v45 = vpop.eup %5546  ;;  %9069 = vst [vmem:[#allocation65_spill] sm:$0xff] %v6875_v53  ;;  %5564 = vlog2.f32 %v911_v58  ;;  %v914_v41 = vmul.f32 -0.5, %v6741_v21  ;;  %v6895_v34 = vadd.f32 %v4745_v0, %v6558_v57  ;;  %v776_v40 = vmin.f32 %v6867_v62, 14.0  ;;  %v1473_v58 = vld [vmem:[#allocation7 + $0xc8] sm:$0xff] }
 0x1e4   :  { %v5549_v1 = vpop.eup %5548  ;;  %9072 = vst [vmem:[#allocation66_spill] sm:$0xff] %v6886_v7  ;;  %5566 = vpow2.f32 %v834_v60  ;;  %vm6898_vm11 = vcmp.lt.f32.partialorder %v899_v14, 0.0004427343  ;;  %v920_v51 = vadd.f32 1.0, %v6780_v18  ;;  %v779_v38 = vmin.f32 %v6875_v53, 14.0  ;;  %4898 = vmatmul.mubr.f32.gmra.mrb[56].mxu1 %v1473_v58  ;;  %v1475_v58 = vld [vmem:[#allocation7 + $0xd8] sm:$0xff] }
 0x1e5   :  { %v6878_v42 = vpop.f32.mrb[30].mxu1  ;;  %v6890_v36 = vpop.eup %5550  ;;  %v886_v5 = vmul.f32 0.6931472, %v5549_v1  ;;  %9073 = vst [vmem:[#allocation67_spill] sm:$0xff] %v6895_v34  ;;  %v906_v0 = vadd.f32 1.0, %v905_v31  ;;  %v6911_v14 = vmul.f32 0.5, %v6886_v7 }
 0x1e6   :  { %v6888_v4 = vpop.f32.mrb[31].mxu1  ;;  %v6903_v1 = vpop.eup %5552  ;;  %v908_v54 = vand.u32 2147483647, %v6751_v49  ;;  %v917_v8 = vand.u32 2147483647, %v6741_v21  ;;  %5568 = vlog2.f32 %v920_v51  ;;  %v915_v11 = vadd.f32 1.0, %v914_v41 }
 0x1e7   :  { %9076 = vst [vmem:[#allocation68_spill] sm:$0xff] %v6903_v1  ;;  %v892_v17 = vsel %vm6881_vm9, %v889_v13, %v886_v5  ;;  %v5555_v60 = vpop.eup %5554  ;;  %v1474_v1 = vld [vmem:[#allocation7 + $0xd0] sm:$0xff]  ;;  %v898_v13 = vmul.f32 %v6711_v26, %v897_v37  ;;  %v6918_v31 = vmul.f32 0.5, %v6895_v34  ;;  %v832_v7 = vmul.f32 1.442695, %v776_v40  ;;  %v1476_v40 = vld [vmem:[#allocation7 + $0xe0] sm:$0xff] }
 0x1e8   :  { %v1140_v62 = vmul.f32 2.0, %v892_v17  ;;  %v6914_v32 = vpop.eup %5556  ;;  %v895_v5 = vmul.f32 0.6931472, %v5555_v60  ;;  %4900 = vmatprep.mubr.f32.mxu1 %v1474_v1  ;;  %v923_v51 = vmul.f32 -0.5, %v6780_v18  ;;  %v838_v26 = vmul.f32 1.442695, %v779_v38 }
 0x1e9   :  { %9077 = vst [vmem:[#allocation69_spill] sm:$0xff] %v6914_v32  ;;  %v6920_v17 = vpop.eup %5558  ;;  %v6927_v32 = vadd.f32 %v6558_v57, %v669_v25  ;;  %vm6931_vm13 = vcmp.lt.f32.partialorder %v908_v54, 0.0004427343  ;;  %v929_v1 = vadd.f32 1.0, %v6766_v3  ;;  %4901 = vmatmul.mubr.f32.gmra.mrb[58].mxu1 %v1475_v58  ;;  %v778_v25 = vmin.f32 %v6911_v14, 14.0  ;;  %v1477_v54 = vld [vmem:[#allocation7 + $0xe8] sm:$0xff] }
 0x1ea   :  { %v1172_v53 = vsel %vm724_vm8, %v6592_v19, %v1140_v62  ;;  %v5561_v60 = vpop.eup %5560  ;;  %v901_v37 = vsel %vm6898_vm11, %v898_v13, %v895_v5  ;;  %v907_v62 = vmul.f32 %v6751_v49, %v906_v0  ;;  %vm6941_vm14 = vcmp.lt.f32.partialorder %v917_v8, 0.0004427343  ;;  %4903 = vmatprep.mubr.f32.mxu1 %v1476_v40  ;;  %v1478_v41 = vld [vmem:[#allocation7 + $0xf0] sm:$0xff] }
 0x1eb   :  { %4787 = vmatprep.mubr.f32.mxu0 %v1172_v53  ;;  %v1141_v19 = vmul.f32 2.0, %v901_v37  ;;  %v904_v24 = vmul.f32 0.6931472, %v5561_v60  ;;  %v6938_v34 = vpop.eup %5562  ;;  %v916_v53 = vmul.f32 %v6741_v21, %v915_v11  ;;  %v781_v29 = vmin.f32 %v6918_v31, 14.0 }
 0x1ec   :  { %5570 = vlog2.f32 %v929_v1  ;;  %v924_v13 = vadd.f32 1.0, %v923_v51  ;;  %v6952_v21 = vmul.f32 0.5, %v6927_v32  ;;  %v932_v58 = vmul.f32 -0.5, %v6766_v3 }
 0x1ed   :  { %v5565_v5 = vpop.eup %5564  ;;  %v1173_v49 = vsel %vm725_vm10, %v6587_v15, %v1141_v19  ;;  %v910_v0 = vsel %vm6931_vm13, %v907_v62, %v904_v24  ;;  %v6957_v60 = vadd.f32 %v6878_v42, %v6558_v57  ;;  %4904 = vmatmul.mubr.f32.gmra.mrb[60].mxu1 %v1477_v54  ;;  %5572 = vpow2.f32 %v832_v7  ;;  %v1479_v24 = vld [vmem:[#allocation7 + $0xf8] sm:$0xff] }
 0x1ee   :  { %4788 = vmatmul.mubr.f32.gmra.mrb[20].mxu0 %v1173_v49  ;;  %v1142_v8 = vmul.f32 2.0, %v910_v0  ;;  %v913_v11 = vmul.f32 0.6931472, %v5565_v5  ;;  %v6959_v37 = vpop.eup %5566  ;;  %v836_v15 = vmul.f32 1.442695, %v778_v25  ;;  %v938_v51 = vadd.f32 1.0, %v6806_v61  ;;  %4906 = vmatprep.mubr.f32.mxu1 %v1478_v41 }
 0x1ef   :  { %v926_v20 = vand.u32 2147483647, %v6780_v18  ;;  %5574 = vpow2.f32 %v838_v26  ;;  %v842_v42 = vmul.f32 1.442695, %v781_v29  ;;  %v925_v25 = vmul.f32 %v6780_v18, %v924_v13 }
 0x1f0   :  { %v1174_v1 = vsel %vm726_vm12, %v6610_v33, %v1142_v8  ;;  %v919_v19 = vsel %vm6941_vm14, %v916_v53, %v913_v11  ;;  %v5569_v62 = vpop.eup %5568  ;;  %5576 = vlog2.f32 %v938_v51  ;;  %v780_v26 = vmin.f32 %v6952_v21, 14.0 }
 0x1f1   :  { %4790 = vmatprep.mubr.f32.mxu0 %v1174_v1  ;;  %v1143_v7 = vmul.f32 2.0, %v919_v19  ;;  %v922_v40 = vmul.f32 0.6931472, %v5569_v62  ;;  %v933_v54 = vadd.f32 1.0, %v932_v58  ;;  %v6972_v33 = vmul.f32 0.5, %v6957_v60  ;;  %4907 = vmatmul.mubr.f32.gmra.mrb[62].mxu1 %v1479_v24 }
 0x1f2   :  { %5578 = vpow2.f32 %v836_v15  ;;  %vm927_vm0 = vcmp.lt.f32.partialorder %v926_v20, 0.0004427343  ;;  %v947_v53 = vadd.f32 1.0, %v6800_v27  ;;  %v935_v18 = vand.u32 2147483647, %v6766_v3 }
 0x1f3   :  { %v1175_v39 = vsel %vm727_vm15, %v6607_v28, %v1143_v7  ;;  %5580 = vpow2.f32 %v842_v42  ;;  %v928_v35 = vsel %vm927_vm0, %v925_v25, %v922_v40  ;;  %v941_v38 = vmul.f32 -0.5, %v6806_v61 }
 0x1f4   :  { %4791 = vmatmul.mubr.f32.gmra.mrb[22].mxu0 %v1175_v39  ;;  %vm728_vm1 = vcmp.gt.f32.partialorder %v6646_v59, 14.0  ;;  %v1144_v29 = vmul.f32 2.0, %v928_v35  ;;  %5582 = vlog2.f32 %v947_v53  ;;  %v6981_v5 = vadd.f32 %v6638_v52, %v6600_v22 }
 0x1f5   :  { %v840_v28 = vmul.f32 1.442695, %v780_v26  ;;  %v934_v0 = vmul.f32 %v6766_v3, %v933_v54  ;;  %v783_v13 = vmin.f32 %v6972_v33, 14.0  ;;  %v956_v8 = vadd.f32 1.0, %v6829_v9 }
 0x1f6   :  { %v5571_v49 = vpop.eup %5570  ;;  %v1176_v11 = vsel %vm728_vm1, %v6629_v47, %v1144_v29  ;;  %v6989_v59 = vadd.f32 %v6558_v57, %v6888_v4  ;;  %v950_v15 = vmul.f32 -0.5, %v6800_v27  ;;  %vm729_vm2 = vcmp.gt.f32.partialorder %v6634_v50, 14.0 }
 0x1f7   :  { %v931_v58 = vmul.f32 0.6931472, %v5571_v49  ;;  %4793 = vmatprep.mubr.f32.mxu0 %v1176_v11  ;;  %vm936_vm3 = vcmp.lt.f32.partialorder %v935_v18, 0.0004427343  ;;  %v942_v52 = vadd.f32 1.0, %v941_v38  ;;  %5584 = vlog2.f32 %v956_v8  ;;  %v6993_v3 = vpop.eup %5572 }
 0x1f8   :  { %vm730_vm4 = vcmp.gt.f32.partialorder %v6674_v30, 14.0  ;;  %v944_v47 = vand.u32 2147483647, %v6806_v61  ;;  %v965_v51 = vadd.f32 1.0, %v6823_v46  ;;  %5586 = vpow2.f32 %v840_v28 }
 0x1f9   :  { %v937_v20 = vsel %vm936_vm3, %v934_v0, %v931_v58  ;;  %v6998_v41 = vpop.eup %5574  ;;  %v846_v4 = vmul.f32 1.442695, %v783_v13  ;;  %v959_v1 = vmul.f32 -0.5, %v6829_v9  ;;  %v7002_v42 = vmul.f32 0.5, %v6989_v59 }
 0x1fa   :  { %v1145_v57 = vmul.f32 2.0, %v937_v20  ;;  %v5577_v19 = vpop.eup %5576  ;;  %v951_v24 = vadd.f32 1.0, %v950_v15  ;;  %5588 = vlog2.f32 %v965_v51  ;;  %v974_v62 = vadd.f32 1.0, %v6850_v10 }
 0x1fb   :  { %v940_v25 = vmul.f32 0.6931472, %v5577_v19  ;;  %v943_v40 = vmul.f32 %v6806_v61, %v942_v52  ;;  %vm731_vm5 = vcmp.gt.f32.partialorder %v6668_v23, 14.0  ;;  %v968_v26 = vmul.f32 -0.5, %v6823_v46 }
 0x1fc   :  { %v1177_v7 = vsel %vm729_vm2, %v6625_v44, %v1145_v57  ;;  %v7011_v54 = vpop.eup %5578  ;;  %vm945_vm6 = vcmp.lt.f32.partialorder %v944_v47, 0.0004427343  ;;  %v953_v39 = vand.u32 2147483647, %v6800_v27  ;;  %v962_v53 = vand.u32 2147483647, %v6829_v9 }
 0x1fd   :  { %4794 = vmatmul.mubr.f32.gmra.mrb[24].mxu0 %v1177_v7  ;;  %5590 = vlog2.f32 %v974_v62  ;;  %v7015_v35 = vpop.eup %5580  ;;  %v946_v44 = vsel %vm945_vm6, %v943_v40, %v940_v25  ;;  %v960_v50 = vadd.f32 1.0, %v959_v1  ;;  %v983_v61 = vadd.f32 1.0, %v6840_v48 }
 0x1fe   :  { %5592 = vpow2.f32 %v846_v4  ;;  %v5583_v18 = vpop.eup %5582  ;;  %v1146_v38 = vmul.f32 2.0, %v946_v44  ;;  %v782_v29 = vmin.f32 %v7002_v42, 14.0  ;;  %v952_v49 = vmul.f32 %v6800_v27, %v951_v24 }
 0x1ff   :  { %vm732_vm7 = vcmp.gt.f32.partialorder %v6696_v55, 14.0  ;;  %v977_v28 = vmul.f32 -0.5, %v6850_v10  ;;  %v949_v0 = vmul.f32 0.6931472, %v5583_v18  ;;  %v969_v13 = vadd.f32 1.0, %v968_v26  ;;  %v9085_v55 = vld [vmem:[#allocation31_spill] sm:$0xff] }
 0x200   :  { %5594 = vlog2.f32 %v983_v61  ;;  %v986_v8 = vmul.f32 -0.5, %v6840_v48  ;;  %v1178_v11 = vsel %vm730_vm4, %v6661_v16, %v1146_v38  ;;  %vm954_vm8 = vcmp.lt.f32.partialorder %v953_v39, 0.0004427343  ;;  %v9084_v61 = vld [vmem:[#allocation32_spill] sm:$0xff] }
 0x201   :  { %vm7026_vm9 = vcmp.lt.f32.partialorder %v962_v53, 0.0004427343  ;;  %v992_v27 = vadd.f32 1.0, %v6864_v12  ;;  %v5585_v15 = vpop.eup %5584  ;;  %4796 = vmatprep.mubr.f32.mxu0 %v1178_v11  ;;  %v955_v52 = vsel %vm954_vm8, %v952_v49, %v949_v0  ;;  %v961_v20 = vmul.f32 %v6829_v9, %v960_v50 }
 0x202   :  { %vm733_vm10 = vcmp.gt.f32.partialorder %v6685_v43, 14.0  ;;  %v971_v47 = vand.u32 2147483647, %v6823_v46  ;;  %v1147_v51 = vmul.f32 2.0, %v955_v52  ;;  %v958_v57 = vmul.f32 0.6931472, %v5585_v15  ;;  %v7034_v16 = vpop.eup %5586 }
 0x203   :  { %v978_v30 = vadd.f32 1.0, %v977_v28  ;;  %5596 = vlog2.f32 %v992_v27  ;;  %v970_v4 = vmul.f32 %v6823_v46, %v969_v13  ;;  %vm734_vm11 = vcmp.gt.f32.partialorder %v6724_v56, 14.0  ;;  %v9086_v52 = vld [vmem:[#allocation29_spill] sm:$0xff] }
 0x204   :  { %v980_v1 = vand.u32 2147483647, %v6850_v10  ;;  %v987_v19 = vadd.f32 1.0, %v986_v8  ;;  %v1001_v24 = vadd.f32 1.0, %v6860_v63  ;;  %v5589_v9 = vpop.eup %5588  ;;  %v1179_v62 = vsel %vm731_vm5, %v6653_v6, %v1147_v51 }
 0x205   :  { %v964_v7 = vsel %vm7026_vm9, %v961_v20, %v958_v57  ;;  %v995_v25 = vmul.f32 -0.5, %v6864_v12  ;;  %v318_v46 = vadd.f32 %v6600_v22, %v6650_v2  ;;  %4797 = vmatmul.mubr.f32.gmra.mrb[26].mxu0 %v1179_v62  ;;  %v967_v26 = vmul.f32 0.6931472, %v5589_v9 }
 0x206   :  { %v1148_v40 = vmul.f32 2.0, %v964_v7  ;;  %5598 = vlog2.f32 %v1001_v24  ;;  %v1004_v39 = vmul.f32 -0.5, %v6860_v63  ;;  %vm972_vm12 = vcmp.lt.f32.partialorder %v971_v47, 0.0004427343 }
 0x207   :  { %v5591_v53 = vpop.eup %5590  ;;  %v979_v44 = vmul.f32 %v6850_v10, %v978_v30  ;;  %v989_v6 = vand.u32 2147483647, %v6840_v48  ;;  %v5317_v23 = vpack.c.bf16 %v6981_v5, %v318_v46  ;;  %v973_v18 = vsel %vm972_vm12, %v970_v4, %v967_v26  ;;  %v9088_v30 = vld [vmem:[#allocation36_spill] sm:$0xff] }
 0x208   :  { %v7052_v50 = vpop.eup %5592  ;;  %v1180_v2 = vsel %vm732_vm7, %v9084_v61, %v1148_v40  ;;  %v976_v38 = vmul.f32 0.6931472, %v5591_v53  ;;  %v1010_v49 = vadd.f32 1.0, %v6890_v36  ;;  %v1149_v28 = vmul.f32 2.0, %v973_v18  ;;  %v9090_v40 = vld [vmem:[#allocation69_spill] sm:$0xff]  ;;  %v9093_v18 = vld [vmem:[#allocation68_spill] sm:$0xff] }
 0x209   :  { %4799 = vmatprep.mubr.f32.mxu0 %v1180_v2  ;;  %vm981_vm13 = vcmp.lt.f32.partialorder %v980_v1, 0.0004427343  ;;  %v988_v0 = vmul.f32 %v6840_v48, %v987_v19  ;;  %v998_v10 = vand.u32 2147483647, %v6864_v12  ;;  %5318 = vmatprep.subr.bf16.mxu0 %v5317_v23  ;;  %v996_v8 = vadd.f32 1.0, %v995_v25  ;;  %v9087_v48 = vld [vmem:[#allocation37_spill] sm:$0xff] }
 0x20a   :  { %v5595_v13 = vpop.eup %5594  ;;  %v982_v5 = vsel %vm981_vm13, %v979_v44, %v976_v38  ;;  %v1005_v11 = vadd.f32 1.0, %v1004_v39  ;;  %5600 = vlog2.f32 %v1010_v49  ;;  %5320 = vmatpush3.bf16.msra.mxu0 %v5317_v23  ;;  %v1181_v58 = vsel %vm733_vm10, %v9085_v55, %v1149_v28  ;;  %v9089_v19 = vld [vmem:[#allocation30_spill] sm:$0xff]  ;;  %v9092_v2 = vld [vmem:[#allocation45_spill] sm:$0xff] }
 0x20b   :  { %v1150_v27 = vmul.f32 2.0, %v982_v5  ;;  %v985_v15 = vmul.f32 0.6931472, %v5595_v13  ;;  %v333_v20 = vadd.f32 %v9086_v52, %v6600_v22  ;;  %4800 = vmatmul.mubr.f32.gmra.mrb[28].mxu0 %v1181_v58  ;;  %vm735_vm14 = vcmp.gt.f32.partialorder %v9087_v48, 14.0  ;;  %v9091_v39 = vld [vmem:[#allocation34_spill] sm:$0xff]  ;;  %v9094_v49 = vld [vmem:[#allocation41_spill] sm:$0xff] }
 0x20c   :  { %vm990_vm15 = vcmp.lt.f32.partialorder %v989_v6, 0.0004427343  ;;  %v1007_v47 = vand.u32 2147483647, %v6860_v63  ;;  %v1019_v51 = vadd.f32 1.0, %v6871_v45  ;;  %v1013_v1 = vmul.f32 -0.5, %v6890_v36 }
 0x20d   :  { %v5597_v57 = vpop.eup %5596  ;;  %v1182_v4 = vsel %vm734_vm11, %v9088_v30, %v1150_v27  ;;  %v991_v43 = vsel %vm990_vm15, %v988_v0, %v985_v15  ;;  %v328_v24 = vadd.f32 %v6600_v22, %v9089_v19  ;;  %v997_v7 = vmul.f32 %v6864_v12, %v996_v8  ;;  %v9095_v0 = vld [vmem:[#allocation42_spill] sm:$0xff]  ;;  %v7091_v13 = vld [vmem:[%s8923_s6] ss:$0 sm:$0xff]  ;;  %v9097_v52 = vld [vmem:[#allocation35_spill] sm:$0xff] }
 0x20e   :  { %4802 = vmatprep.mubr.f32.mxu0 %v1182_v4  ;;  %v1151_v9 = vmul.f32 2.0, %v991_v43  ;;  %v994_v62 = vmul.f32 0.6931472, %v5597_v57  ;;  %5602 = vlog2.f32 %v1019_v51  ;;  %vm999_vm0 = vcmp.lt.f32.partialorder %v998_v10, 0.0004427343  ;;  %v9096_v5 = vld [vmem:[#allocation33_spill] sm:$0xff] }
 0x20f   :  { %v1006_v25 = vmul.f32 %v6860_v63, %v1005_v11  ;;  %v5321_v46 = vpack.c.bf16 %v333_v20, %v328_v24  ;;  %v1028_v26 = vadd.f32 1.0, %v9090_v40  ;;  %v1016_v22 = vand.u32 2147483647, %v6890_v36  ;;  %v9098_v48 = vld [vmem:[#allocation39_spill] sm:$0xff]  ;;  %v9099_v4 = vld [vmem:[#allocation49_spill] sm:$0xff] }
 0x210   :  { %v5599_v56 = vpop.eup %5598  ;;  %v1183_v53 = vsel %vm735_vm14, %v9091_v39, %v1151_v9  ;;  %v1000_v44 = vsel %vm999_vm0, %v997_v7, %v994_v62  ;;  %v1022_v6 = vmul.f32 -0.5, %v6871_v45  ;;  %v1014_v61 = vadd.f32 1.0, %v1013_v1 }
 0x211   :  { %4803 = vmatmul.mubr.f32.gmra.mrb[30].mxu0 %v1183_v53  ;;  %v1152_v23 = vmul.f32 2.0, %v1000_v44  ;;  %v1003_v12 = vmul.f32 0.6931472, %v5599_v56  ;;  %5604 = vlog2.f32 %v1028_v26  ;;  %5322 = vmatprep.subr.bf16.mxu0 %v5321_v46  ;;  %v844_v63 = vmul.f32 1.442695, %v782_v29  ;;  %v9101_v56 = vld [vmem:[#allocation47_spill] sm:$0xff] }
 0x212   :  { %vm736_vm1 = vcmp.gt.f32.partialorder %v9092_v2, 14.0  ;;  %vm1008_vm2 = vcmp.lt.f32.partialorder %v1007_v47, 0.0004427343  ;;  %v1037_v38 = vadd.f32 1.0, %v9093_v18  ;;  %5324 = vmatpush3.bf16.msra.mxu0 %v5321_v46  ;;  %vm737_vm3 = vcmp.gt.f32.partialorder %v9095_v0, 14.0  ;;  %v9102_v53 = vld [vmem:[#allocation48_spill] sm:$0xff] }
 0x213   :  { %v1184_v28 = vsel %vm736_vm1, %v9094_v49, %v1152_v23  ;;  %v1009_v10 = vsel %vm1008_vm2, %v1006_v25, %v1003_v12  ;;  %v343_v8 = vadd.f32 %v7091_v13, %v9096_v5  ;;  %v1023_v55 = vadd.f32 1.0, %v1022_v6  ;;  %v9100_v25 = vld [vmem:[#allocation38_spill] sm:$0xff]  ;;  %v9103_v23 = vld [vmem:[#allocation40_spill] sm:$0xff] }
 0x214   :  { %v5601_v29 = vpop.eup %5600  ;;  %4805 = vmatprep.mubr.f32.mxu0 %v1184_v28  ;;  %v1153_v11 = vmul.f32 2.0, %v1009_v10  ;;  %v1031_v58 = vmul.f32 -0.5, %v9090_v40  ;;  %5606 = vlog2.f32 %v1037_v38  ;;  %v1015_v15 = vmul.f32 %v6890_v36, %v1014_v61  ;;  %v9104_v5 = vld [vmem:[#allocation46_spill] sm:$0xff] }
 0x215   :  { %v1012_v27 = vmul.f32 0.6931472, %v5601_v29  ;;  %vm1017_vm4 = vcmp.lt.f32.partialorder %v1016_v22, 0.0004427343  ;;  %v338_v20 = vadd.f32 %v7091_v13, %v9097_v52  ;;  %v1025_v51 = vand.u32 2147483647, %v6871_v45 }
 0x216   :  { %v1185_v47 = vsel %vm737_vm3, %v9098_v48, %v1153_v11  ;;  %v1040_v57 = vmul.f32 -0.5, %v9093_v18  ;;  %v1046_v30 = vadd.f32 1.0, %v6938_v34  ;;  %5608 = vpow2.f32 %v844_v63  ;;  %v9105_v29 = vld [vmem:[#allocation55_spill] sm:$0xff] }
 0x217   :  { %4806 = vmatmul.mubr.f32.gmra.mrb[32].mxu0 %v1185_v47  ;;  %vm738_vm5 = vcmp.gt.f32.partialorder %v9099_v4, 14.0  ;;  %v1018_v43 = vsel %vm1017_vm4, %v1015_v15, %v1012_v27  ;;  %v5325_v1 = vpack.c.bf16 %v343_v8, %v338_v20  ;;  %v1024_v24 = vmul.f32 %v6871_v45, %v1023_v55  ;;  %v9106_v52 = vld [vmem:[#allocation43_spill] sm:$0xff] }
 0x218   :  { %v5603_v19 = vpop.eup %5602  ;;  %v1154_v36 = vmul.f32 2.0, %v1018_v43  ;;  %v1032_v9 = vadd.f32 1.0, %v1031_v58  ;;  %5610 = vlog2.f32 %v1046_v30  ;;  %v1034_v7 = vand.u32 2147483647, %v9090_v40 }
 0x219   :  { %v1021_v62 = vmul.f32 0.6931472, %v5603_v19  ;;  %v353_v46 = vadd.f32 %v7091_v13, %v9100_v25  ;;  %v1055_v26 = vadd.f32 1.0, %v6920_v17  ;;  %5326 = vmatprep.subr.bf16.mxu0 %v5325_v1  ;;  %vm739_vm6 = vcmp.gt.f32.partialorder %v9102_v53, 14.0 }
 0x21a   :  { %v1186_v39 = vsel %vm738_vm5, %v9101_v56, %v1154_v36  ;;  %vm1026_vm7 = vcmp.lt.f32.partialorder %v1025_v51, 0.0004427343  ;;  %v1041_v44 = vadd.f32 1.0, %v1040_v57  ;;  %5328 = vmatpush3.bf16.msra.mxu0 %v5325_v1  ;;  %v1049_v6 = vmul.f32 -0.5, %v6938_v34  ;;  %v9107_v51 = vld [vmem:[#allocation52_spill] sm:$0xff] }
 0x21b   :  { %v5605_v22 = vpop.eup %5604  ;;  %4808 = vmatprep.mubr.f32.mxu0 %v1186_v39  ;;  %v1027_v45 = vsel %vm1026_vm7, %v1024_v24, %v1021_v62  ;;  %5612 = vlog2.f32 %v1055_v26  ;;  %v348_v12 = vadd.f32 %v7091_v13, %v9103_v23  ;;  %v1033_v2 = vmul.f32 %v9090_v40, %v1032_v9  ;;  %v9109_v36 = vld [vmem:[#allocation44_spill] sm:$0xff] }
 0x21c   :  { %v1155_v61 = vmul.f32 2.0, %v1027_v45  ;;  %v1030_v63 = vmul.f32 0.6931472, %v5605_v22  ;;  %v1043_v38 = vand.u32 2147483647, %v9093_v18  ;;  %v1058_v49 = vmul.f32 -0.5, %v6920_v17 }
 0x21d   :  { %vm1035_vm8 = vcmp.lt.f32.partialorder %v1034_v7, 0.0004427343  ;;  %v5329_v28 = vpack.c.bf16 %v353_v46, %v348_v12  ;;  %v1064_v0 = vadd.f32 1.0, %v6993_v3  ;;  %vm740_vm9 = vcmp.gt.f32.partialorder %v9105_v29, 14.0  ;;  %v9110_v46 = vld [vmem:[#allocation50_spill] sm:$0xff] }
 0x21e   :  { %v5607_v10 = vpop.eup %5606  ;;  %v1187_v8 = vsel %vm739_vm6, %v9104_v5, %v1155_v61  ;;  %v1036_v11 = vsel %vm1035_vm8, %v1033_v2, %v1030_v63  ;;  %v1042_v55 = vmul.f32 %v9093_v18, %v1041_v44  ;;  %v1050_v27 = vadd.f32 1.0, %v1049_v6  ;;  %v9108_v18 = vld [vmem:[#allocation54_spill] sm:$0xff]  ;;  %v9111_v44 = vld [vmem:[#allocation59_spill] sm:$0xff]  ;;  %v7141_v6 = vpop.permute.xlu0 %1763  ;;  %v9114_v5 = vld [vmem:[#allocation53_spill] sm:$0xff] }
 0x21f   :  { %4809 = vmatmul.mubr.f32.gmra.mrb[34].mxu0 %v1187_v8  ;;  %v1156_v40 = vmul.f32 2.0, %v1036_v11  ;;  %v1039_v58 = vmul.f32 0.6931472, %v5607_v10  ;;  %5614 = vlog2.f32 %v1064_v0  ;;  %5330 = vmatprep.subr.bf16.mxu0 %v5329_v28  ;;  %vm1044_vm10 = vcmp.lt.f32.partialorder %v1043_v38, 0.0004427343  ;;  %v9112_v61 = vld [vmem:[#allocation51_spill] sm:$0xff]  ;;  %v7151_v11 = vpop.permute.xlu1 %1769 }
 0x220   :  { %v1052_v15 = vand.u32 2147483647, %v6938_v34  ;;  %v363_v20 = vadd.f32 %v7091_v13, %v9106_v52  ;;  %v1073_v48 = vadd.f32 1.0, %v6959_v37  ;;  %5332 = vmatpush3.bf16.msra.mxu0 %v5329_v28  ;;  %v7127_v47 = vpop.eup %5608  ;;  %vm741_vm11 = vcmp.gt.f32.partialorder %v9108_v18, 14.0  ;;  %v9113_v28 = vld [vmem:[#allocation57_spill] sm:$0xff] }
 0x221   :  { %v1188_v57 = vsel %vm740_vm9, %v9107_v51, %v1156_v40  ;;  %v1045_v30 = vsel %vm1044_vm10, %v1042_v55, %v1039_v58  ;;  %v1059_v4 = vadd.f32 1.0, %v1058_v49  ;;  %v1067_v19 = vmul.f32 -0.5, %v6993_v3  ;;  %v9115_v55 = vld [vmem:[#allocation58_spill] sm:$0xff] }
 0x222   :  { %v5611_v43 = vpop.eup %5610  ;;  %4811 = vmatprep.mubr.f32.mxu0 %v1188_v57  ;;  %v1157_v1 = vmul.f32 2.0, %v1045_v30  ;;  %5616 = vlog2.f32 %v1073_v48  ;;  %v358_v24 = vadd.f32 %v7091_v13, %v9109_v36  ;;  %v1051_v62 = vmul.f32 %v6938_v34, %v1050_v27  ;;  %v7158_v18 = vpop.permute.xlu0 %1766 }
 0x223   :  { %v1048_v9 = vmul.f32 0.6931472, %v5611_v43  ;;  %v1061_v7 = vand.u32 2147483647, %v6920_v17  ;;  %v1082_v25 = vadd.f32 1.0, %v7011_v54  ;;  %v1076_v56 = vmul.f32 -0.5, %v6959_v37 }
 0x224   :  { %v1189_v26 = vsel %vm741_vm11, %v9110_v46, %v1157_v1  ;;  %vm1053_vm12 = vcmp.lt.f32.partialorder %v1052_v15, 0.0004427343  ;;  %v5333_v39 = vpack.c.bf16 %v363_v20, %v358_v24  ;;  %vm742_vm13 = vcmp.gt.f32.partialorder %v9111_v44, 14.0  ;;  %v9116_v20 = vld [vmem:[#allocation56_spill] sm:$0xff]  ;;  %v9119_v44 = vld [vmem:[#allocation61_spill] sm:$0xff] }
 0x225   :  { %v5613_v53 = vpop.eup %5612  ;;  %4812 = vmatmul.mubr.f32.gmra.mrb[36].mxu0 %v1189_v26  ;;  %v1054_v22 = vsel %vm1053_vm12, %v1051_v62, %v1048_v9  ;;  %v1060_v45 = vmul.f32 %v6920_v17, %v1059_v4  ;;  %5618 = vlog2.f32 %v1082_v25  ;;  %v1068_v12 = vadd.f32 1.0, %v1067_v19  ;;  %v9117_v24 = vld [vmem:[#allocation64_spill] sm:$0xff]  ;;  %v7165_v62 = vpop.permute.xlu1 %1772 }
 0x226   :  { %v1158_v34 = vmul.f32 2.0, %v1054_v22  ;;  %v1057_v23 = vmul.f32 0.6931472, %v5613_v53  ;;  %v373_v63 = vadd.f32 %v7091_v13, %v9112_v61  ;;  %5334 = vmatprep.subr.bf16.mxu0 %v5333_v39  ;;  %vm1062_vm14 = vcmp.lt.f32.partialorder %v1061_v7, 0.0004427343  ;;  %v9118_v7 = vld [vmem:[#allocation62_spill] sm:$0xff] }
 0x227   :  { %v1070_v2 = vand.u32 2147483647, %v6993_v3  ;;  %v1085_v38 = vmul.f32 -0.5, %v7011_v54  ;;  %v1091_v49 = vadd.f32 1.0, %v6998_v41  ;;  %5336 = vmatpush3.bf16.msra.mxu0 %v5333_v39  ;;  %v1077_v10 = vadd.f32 1.0, %v1076_v56 }
 0x228   :  { %v1190_v17 = vsel %vm742_vm13, %v9113_v28, %v1158_v34  ;;  %v1063_v0 = vsel %vm1062_vm14, %v1060_v45, %v1057_v23  ;;  %v368_v8 = vadd.f32 %v7091_v13, %v9114_v5  ;;  %vm743_vm15 = vcmp.gt.f32.partialorder %v9115_v55, 14.0  ;;  %v7173_v34 = vpop.permute.xlu0 %1775  ;;  %v9120_v23 = vld [vmem:[#allocation60_spill] sm:$0xff] }
 0x229   :  { %v5615_v29 = vpop.eup %5614  ;;  %4814 = vmatprep.mubr.f32.mxu0 %v1190_v17  ;;  %v1159_v40 = vmul.f32 2.0, %v1063_v0  ;;  %5620 = vlog2.f32 %v1091_v49  ;;  %v1069_v27 = vmul.f32 %v6993_v3, %v1068_v12  ;;  %v1079_v15 = vand.u32 2147483647, %v6959_v37  ;;  %v2574_v0 = vld [vmem:[#allocation15] sm:$0xff]  ;;  %v7180_v5 = vpop.permute.xlu1 %1778 }
 0x22a   :  { %v1066_v58 = vmul.f32 0.6931472, %v5615_v29  ;;  %v5337_v52 = vpack.c.bf16 %v373_v63, %v368_v8  ;;  %vm1071_vm0 = vcmp.lt.f32.partialorder %v1070_v2, 0.0004427343  ;;  %v1086_v51 = vadd.f32 1.0, %v1085_v38  ;;  %v9121_v8 = vld [vmem:[#allocation66_spill] sm:$0xff] }
 0x22b   :  { %v1191_v48 = vsel %vm743_vm15, %v9116_v20, %v1159_v40  ;;  %v1100_v13 = vadd.f32 1.0, %v7034_v16  ;;  %v1078_v4 = vmul.f32 %v6959_v37, %v1077_v10  ;;  %v1088_v43 = vand.u32 2147483647, %v7011_v54  ;;  %v2575_v10 = vld [vmem:[#allocation15 + $0x8] sm:$0xff] }
 0x22c   :  { %v5617_v57 = vpop.eup %5616  ;;  %4815 = vmatmul.mubr.f32.gmra.mrb[38].mxu0 %v1191_v48  ;;  %v1072_v30 = vsel %vm1071_vm0, %v1069_v27, %v1066_v58  ;;  %v1094_v3 = vmul.f32 -0.5, %v6998_v41  ;;  %5338 = vmatprep.subr.bf16.mxu0 %v5337_v52  ;;  %v1109_v36 = vadd.f32 1.0, %v7015_v35  ;;  %vm744_vm1 = vcmp.gt.f32.partialorder %v9117_v24, 14.0  ;;  %v7188_v20 = vpop.permute.xlu0 %1781  ;;  %v9122_v48 = vld [vmem:[#allocation65_spill] sm:$0xff] }
 0x22d   :  { %v1160_v1 = vmul.f32 2.0, %v1072_v30  ;;  %v1075_v19 = vmul.f32 0.6931472, %v5617_v57  ;;  %5622 = vlog2.f32 %v1100_v13  ;;  %5340 = vmatpush3.bf16.msra.mxu0 %v5337_v52  ;;  %vm1080_vm2 = vcmp.lt.f32.partialorder %v1079_v15, 0.0004427343  ;;  %v9123_v30 = vld [vmem:[#allocation63_spill] sm:$0xff]  ;;  %v7196_v24 = vpop.permute.xlu1 %1784 }
 0x22e   :  { %v1087_v46 = vmul.f32 %v7011_v54, %v1086_v51  ;;  %5624 = vlog2.f32 %v1109_v36  ;;  %v1095_v39 = vadd.f32 1.0, %v1094_v3  ;;  %v1103_v53 = vmul.f32 -0.5, %v7034_v16 }
 0x22f   :  { %v5619_v9 = vpop.eup %5618  ;;  %v1192_v25 = vsel %vm744_vm1, %v9118_v7, %v1160_v1  ;;  %v1081_v37 = vsel %vm1080_vm2, %v1078_v4, %v1075_v19  ;;  %vm745_vm3 = vcmp.gt.f32.partialorder %v9119_v44, 14.0  ;;  %vm1089_vm4 = vcmp.lt.f32.partialorder %v1088_v43, 0.0004427343 }
 0x230   :  { %4817 = vmatprep.mubr.f32.mxu0 %v1192_v25  ;;  %v1161_v26 = vmul.f32 2.0, %v1081_v37  ;;  %v1084_v56 = vmul.f32 0.6931472, %v5619_v9  ;;  %v1097_v22 = vand.u32 2147483647, %v6998_v41  ;;  %v1118_v45 = vadd.f32 1.0, %v7127_v47 }
 0x231   :  { %v1112_v54 = vmul.f32 -0.5, %v7015_v35  ;;  %vm746_vm5 = vcmp.gt.f32.partialorder %v6911_v14, 14.0  ;;  %v1096_v49 = vmul.f32 %v6998_v41, %v1095_v39  ;;  %v1104_v28 = vadd.f32 1.0, %v1103_v53  ;;  %v7201_v39 = vpop.permute.xlu0 %1787 }
 0x232   :  { %v1193_v12 = vsel %vm745_vm3, %v9120_v23, %v1161_v26  ;;  %v1090_v61 = vsel %vm1089_vm4, %v1087_v46, %v1084_v56  ;;  %5626 = vlog2.f32 %v1118_v45  ;;  %v1127_v17 = vadd.f32 1.0, %v7052_v50 }
 0x233   :  { %v5621_v63 = vpop.eup %5620  ;;  %4818 = vmatmul.mubr.f32.gmra.mrb[40].mxu0 %v1193_v12  ;;  %v1162_v2 = vmul.f32 2.0, %v1090_v61  ;;  %vm1098_vm6 = vcmp.lt.f32.partialorder %v1097_v22, 0.0004427343  ;;  %v1106_v55 = vand.u32 2147483647, %v7034_v16  ;;  %v1113_v14 = vadd.f32 1.0, %v1112_v54  ;;  %v7210_v12 = vpop.permute.xlu1 %1790 }
 0x234   :  { %v1093_v38 = vmul.f32 0.6931472, %v5621_v63  ;;  %v1121_v58 = vmul.f32 -0.5, %v7127_v47  ;;  %5628 = vlog2.f32 %v1127_v17  ;;  %v1115_v15 = vand.u32 2147483647, %v7015_v35  ;;  %v9124_v22 = vld [vmem:[#allocation67_spill] sm:$0xff] }
 0x235   :  { %v1194_v29 = vsel %vm746_vm5, %v9121_v8, %v1162_v2  ;;  %v7186_v52 = vpack.c.bf16 %v2575_v10, %v2574_v0  ;;  %vm747_vm7 = vcmp.gt.f32.partialorder %v9122_v48, 14.0  ;;  %v1105_v13 = vmul.f32 %v7034_v16, %v1104_v28  ;;  %v1794_v2 = vpop.permute.xlu0 %1793  ;;  %v2576_v28 = vld [vmem:[#allocation15 + $0x10] sm:$0xff]  ;;  %v2577_v17 = vld [vmem:[#allocation15 + $0x18] sm:$0xff]  ;;  %v2579_v10 = vld [vmem:[#allocation15 + $0x28] sm:$0xff] }
 0x236   :  { %4820 = vmatprep.mubr.f32.mxu0 %v1194_v29  ;;  %v1099_v40 = vsel %vm1098_vm6, %v1096_v49, %v1093_v38  ;;  %vm1107_vm8 = vcmp.lt.f32.partialorder %v1106_v55, 0.0004427343  ;;  %v1130_v43 = vmul.f32 -0.5, %v7052_v50  ;;  %v1114_v19 = vmul.f32 %v7015_v35, %v1113_v14  ;;  %v2581_v8 = vld [vmem:[#allocation15 + $0x38] sm:$0xff]  ;;  %v2582_v55 = vld [vmem:[#allocation15 + $0x40] sm:$0xff] }
 0x237   :  { %v5623_v27 = vpop.eup %5622  ;;  %v1163_v41 = vmul.f32 2.0, %v1099_v40  ;;  %5374 = vmatprep.subr.bf16.mxu0 %v7186_v52  ;;  %v1122_v36 = vadd.f32 1.0, %v1121_v58  ;;  %vm1116_vm9 = vcmp.lt.f32.partialorder %v1115_v15, 0.0004427343  ;;  %v1124_v16 = vand.u32 2147483647, %v7127_v47  ;;  %v1797_v0 = vpop.permute.xlu1 %1796 }
 0x238   :  { %v1102_v51 = vmul.f32 0.6931472, %v5623_v27  ;;  %v5625_v57 = vpop.eup %5624  ;;  %vm748_vm10 = vcmp.gt.f32.partialorder %v6952_v21, 14.0  ;;  %v1760_v37 = vlaneseq  ;;  %v1131_v56 = vadd.f32 1.0, %v1130_v43  ;;  %v2583_v40 = vld [vmem:[#allocation15 + $0x48] sm:$0xff]  ;;  %v2584_v58 = vld [vmem:[#allocation15 + $0x50] sm:$0xff] }
 0x239   :  { %v1195_v4 = vsel %vm747_vm7, %v9123_v30, %v1163_v41  ;;  %v1111_v1 = vmul.f32 0.6931472, %v5625_v57  ;;  %vm749_vm11 = vcmp.gt.f32.partialorder %v6918_v31, 14.0  ;;  %v1123_v53 = vmul.f32 %v7127_v47, %v1122_v36  ;;  %v2585_v27 = vld [vmem:[#allocation15 + $0x58] sm:$0xff]  ;;  %v2586_v15 = vld [vmem:[#allocation15 + $0x60] sm:$0xff]  ;;  %v2588_v57 = vld [vmem:[#allocation15 + $0x70] sm:$0xff] }
 0x23a   :  { %4821 = vmatmul.mubr.f32.gmra.mrb[42].mxu0 %v1195_v4  ;;  %v1108_v3 = vsel %vm1107_vm8, %v1105_v13, %v1102_v51  ;;  %v1133_v44 = vand.u32 2147483647, %v7052_v50  ;;  %vm1125_vm12 = vcmp.lt.f32.partialorder %v1124_v16, 0.0004427343  ;;  %v1132_v31 = vmul.f32 %v7052_v50, %v1131_v56  ;;  %v7254_v13 = vpop.f32.mrb[32].mxu1  ;;  %v2589_v30 = vld [vmem:[#allocation15 + $0x78] sm:$0xff] }
 0x23b   :  { %v1164_v9 = vmul.f32 2.0, %v1108_v3  ;;  %v1117_v7 = vsel %vm1116_vm9, %v1114_v19, %v1111_v1  ;;  %vm750_vm13 = vcmp.gt.f32.partialorder %v7002_v42, 14.0  ;;  %vm751_vm0 = vcmp.gt.f32.partialorder %v6972_v33, 14.0  ;;  %v1800_v42 = vpop.permute.xlu0 %1799  ;;  %v1569_v43 = vpop.f32.mrb[33].mxu1 }
 0x23c   :  { %v5627_v25 = vpop.eup %5626  ;;  %v1165_v26 = vmul.f32 2.0, %v1117_v7  ;;  %vm1134_vm14 = vcmp.lt.f32.partialorder %v1133_v44, 0.0004427343  ;;  %v8976_v50 = vmov 1.0   ;;  %v5393_v41 = vpack.c.bf16 %v2585_v27, %v2584_v58  ;;  %v4866_v19 = vpop.f32.mrb[34].mxu1 }
 0x23d   :  { %v1196_v46 = vsel %vm748_vm10, %v6927_v32, %v1164_v9  ;;  %v1120_v35 = vmul.f32 0.6931472, %v5627_v25  ;;  %v7208_v32 = vand.u32 127, %v1760_v37  ;;  %v5401_v3 = vpack.c.bf16 %v2589_v30, %v2588_v57  ;;  %v1579_v36 = vpop.f32.mrb[35].mxu1 }
 0x23e   :  { %4823 = vmatprep.mubr.f32.mxu0 %v1196_v46  ;;  %v1197_v45 = vsel %vm749_vm11, %v9124_v22, %v1165_v26  ;;  %v5629_v21 = vpop.eup %5628  ;;  %v4869_v16 = vpop.f32.mrb[36].mxu1 }
 0x23f   :  { %4824 = vmatmul.mubr.f32.gmra.mrb[44].mxu0 %v1197_v45  ;;  %v1126_v23 = vsel %vm1125_vm12, %v1123_v53, %v1120_v35  ;;  %v1129_v54 = vmul.f32 0.6931472, %v5629_v21  ;;  %vm1858_vm15 = vcmp.eq.s32.totalorder %v7208_v32, %v7141_v6  ;;  %vm1860_vm1 = vcmp.eq.s32.totalorder %v7208_v32, %v7151_v11  ;;  %v2578_v6 = vld [vmem:[#allocation15 + $0x20] sm:$0xff]  ;;  %v2580_v11 = vld [vmem:[#allocation15 + $0x30] sm:$0xff]  ;;  %v1589_v7 = vpop.f32.mrb[37].mxu1 }
 0x240   :  { %v1166_v61 = vmul.f32 2.0, %v1126_v23  ;;  %vm1859_vm2 = vcmp.eq.s32.totalorder %v7208_v32, %v7158_v18  ;;  %v5381_v33 = vpack.c.bf16 %v2579_v10, %v2578_v6  ;;  %vm1861_vm3 = vcmp.eq.s32.totalorder %v7208_v32, %v7165_v62  ;;  %v1806_v18 = vpop.permute.xlu0 %1805  ;;  %v4872_v56 = vpop.f32.mrb[38].mxu1  ;;  %v7291_v23 = vld [vmem:[%s8929_s12] ss:$0 sm:$0xff] }
 0x241   :  { %v1135_v63 = vsel %vm1134_vm14, %v1132_v31, %v1129_v54  ;;  %vm1862_vm4 = vcmp.eq.s32.totalorder %v7208_v32, %v7173_v34  ;;  %v5385_v29 = vpack.c.bf16 %v2581_v8, %v2580_v11  ;;  %vm1863_vm5 = vcmp.eq.s32.totalorder %v7208_v32, %v7180_v5 }
 0x242   :  { %v1198_v47 = vsel %vm750_vm13, %v6989_v59, %v1166_v61  ;;  %v1167_v38 = vmul.f32 2.0, %v1135_v63  ;;  %v5377_v59 = vpack.c.bf16 %v2577_v17, %v2576_v28  ;;  %vm1864_vm6 = vcmp.eq.s32.totalorder %v7208_v32, %v7188_v20 }
 0x243   :  { %4826 = vmatprep.mubr.f32.mxu0 %v1198_v47  ;;  %v5389_v34 = vpack.c.bf16 %v2583_v40, %v2582_v55  ;;  %vm1865_vm7 = vcmp.eq.s32.totalorder %v7208_v32, %v7196_v24  ;;  %vm1866_vm8 = vcmp.eq.s32.totalorder %v7208_v32, %v7201_v39  ;;  %vm1867_vm9 = vcmp.eq.s32.totalorder %v7208_v32, %v7210_v12  ;;  %v1599_v39 = vpop.f32.mrb[39].mxu1 }
 0x244   :  { %v1199_v49 = vsel %vm751_vm0, %v6957_v60, %v1167_v38  ;;  %v1803_v60 = vpop.permute.xlu1 %1802  ;;  %v1812_v14 = vpop.permute.xlu0 %1811  ;;  %vm1868_vm10 = vcmp.eq.s32.totalorder %v7208_v32, %v1794_v2  ;;  %vm1869_vm11 = vcmp.eq.s32.totalorder %v7208_v32, %v1797_v0  ;;  %vm1870_vm12 = vcmp.eq.s32.totalorder %v7208_v32, %v1800_v42 }
 0x245   :  { %4827 = vmatmul.mubr.f32.gmra.mrb[46].mxu0 %v1199_v49  ;;  %vm1871_vm13 = vcmp.eq.s32.totalorder %v7208_v32, %v1803_v60  ;;  %vm1872_vm14 = vcmp.eq.s32.totalorder %v7208_v32, %v1806_v18  ;;  %vm1874_vm0 = vcmp.eq.s32.totalorder %v7208_v32, %v1812_v14  ;;  %v4875_v44 = vpop.f32.mrb[40].mxu1  ;;  %v7298_v31 = vadd.f32 %v7291_v23, %v1569_v43 }
 0x246   :  { %4941 = vmatprep.mubr.msk.f32.mxu0 %vm1858_vm15, %v8976_v50  ;;  %v1609_v22 = vpop.f32.mrb[41].mxu1  ;;  %v7304_v47 = vadd.f32 %v7254_v13, %v7291_v23  ;;  %v7308_v63 = vadd.f32 %v7291_v23, %v1579_v36  ;;  %v7311_v49 = vadd.f32 %v4866_v19, %v7291_v23  ;;  %v7319_v28 = vadd.f32 %v4869_v16, %v7291_v23 }
 0x247   :  { %v4878_v12 = vpop.f32.mrb[42].mxu1  ;;  %v7324_v17 = vadd.f32 %v7291_v23, %v1599_v39  ;;  %v7327_v42 = vadd.f32 %v4872_v56, %v7291_v23  ;;  %v7332_v6 = vadd.f32 %v7291_v23, %v1609_v22 }
 0x248   :  { %v1809_v62 = vpop.permute.xlu1 %1808  ;;  %v1818_v20 = vpop.permute.xlu0 %1817  ;;  %v7343_v8 = vadd.f32 %v4878_v12, %v7291_v23 }
 0x249   :  { %4942 = vmatmul.mubr.msk.f32.vlgmr.msra.gmra.mrb[48].mxu0 %vm1859_vm2, %v8976_v50  ;;  %vm1873_vm15 = vcmp.eq.s32.totalorder %v7208_v32, %v1809_v62  ;;  %vm1876_vm2 = vcmp.eq.s32.totalorder %v7208_v32, %v1818_v20  ;;  %v1619_v61 = vpop.f32.mrb[43].mxu1 }
 0x24a   :  { %4944 = vmatprep.mubr.msk.f32.mxu0 %vm1860_vm1, %v8976_v50  ;;  %5376 = vmatpush3.bf16.msra.mxu0 %v7186_v52  ;;  %v2587_v52 = vld [vmem:[#allocation15 + $0x68] sm:$0xff]  ;;  %v4881_v2 = vpop.f32.mrb[44].mxu1  ;;  %v7340_v11 = vadd.f32 %v7291_v23, %v1619_v61 }
 0x24b   :  { %5378 = vmatprep.subr.bf16.mxu0 %v5377_v59  ;;  %v5397_v48 = vpack.c.bf16 %v2587_v52, %v2586_v15  ;;  %v1629_v38 = vpop.f32.mrb[45].mxu1 }
 0x24c   :  { %v1815_v5 = vpop.permute.xlu1 %1814  ;;  %v1824_v4 = vpop.permute.xlu0 %1823  ;;  %v7348_v18 = vadd.f32 %v7291_v23, %v1629_v38 }
 0x24d   :  { %4945 = vmatmul.mubr.msk.f32.gmra.mrb[50].mxu0 %vm1861_vm3, %v8976_v50  ;;  %vm1875_vm1 = vcmp.eq.s32.totalorder %v7208_v32, %v1815_v5 }
 0x24e   :  { %4947 = vmatprep.mubr.msk.f32.mxu0 %vm1862_vm4, %v8976_v50  ;;  %5380 = vmatpush3.bf16.msra.mxu0 %v5377_v59  ;;  %vm1878_vm4 = vcmp.eq.s32.totalorder %v7208_v32, %v1824_v4 }
 0x24f   :  { %5382 = vmatprep.subr.bf16.mxu0 %v5381_v33 }
 0x250   :  { %v1821_v51 = vpop.permute.xlu1 %1820  ;;  %v1830_v24 = vpop.permute.xlu0 %1829 }
 0x251   :  { %4948 = vmatmul.mubr.msk.f32.gmra.mrb[52].mxu0 %vm1863_vm5, %v8976_v50  ;;  %vm1877_vm3 = vcmp.eq.s32.totalorder %v7208_v32, %v1821_v51 }
 0x252   :  { %4950 = vmatprep.mubr.msk.f32.mxu0 %vm1864_vm6, %v8976_v50  ;;  %5384 = vmatpush3.bf16.msra.mxu0 %v5381_v33  ;;  %vm1880_vm6 = vcmp.eq.s32.totalorder %v7208_v32, %v1830_v24  ;;  %v7335_v33 = vadd.f32 %v4875_v44, %v7291_v23 }
 0x253   :  { %5386 = vmatprep.subr.bf16.mxu0 %v5385_v29 }
 0x254   :  { %v1827_v1 = vpop.permute.xlu1 %1826  ;;  %v1836_v25 = vpop.permute.xlu0 %1835 }
 0x255   :  { %4951 = vmatmul.mubr.msk.f32.gmra.mrb[54].mxu0 %vm1865_vm7, %v8976_v50  ;;  %vm1879_vm5 = vcmp.eq.s32.totalorder %v7208_v32, %v1827_v1 }
 0x256   :  { %4953 = vmatprep.mubr.msk.f32.mxu0 %vm1866_vm8, %v8976_v50  ;;  %5388 = vmatpush3.bf16.msra.mxu0 %v5385_v29  ;;  %vm1882_vm8 = vcmp.eq.s32.totalorder %v7208_v32, %v1836_v25  ;;  %v7351_v29 = vadd.f32 %v4881_v2, %v7291_v23 }
 0x257   :  { %5390 = vmatprep.subr.bf16.mxu0 %v5389_v34 }
 0x258   :  { %v1833_v9 = vpop.permute.xlu1 %1832  ;;  %v1842_v26 = vpop.permute.xlu0 %1841 }
 0x259   :  { %4954 = vmatmul.mubr.msk.f32.gmra.mrb[56].mxu0 %vm1867_vm9, %v8976_v50  ;;  %vm1881_vm7 = vcmp.eq.s32.totalorder %v7208_v32, %v1833_v9 }
 0x25a   :  { %4956 = vmatprep.mubr.msk.f32.mxu0 %vm1868_vm10, %v8976_v50  ;;  %5392 = vmatpush3.bf16.msra.mxu0 %v5389_v34  ;;  %vm1884_vm10 = vcmp.eq.s32.totalorder %v7208_v32, %v1842_v26 }
 0x25b   :  { %5394 = vmatprep.subr.bf16.mxu0 %v5393_v41 }
 0x25c   :  { %v1839_v46 = vpop.permute.xlu1 %1838  ;;  %v1848_v53 = vpop.permute.xlu0 %1847 }
 0x25d   :  { %4957 = vmatmul.mubr.msk.f32.gmra.mrb[58].mxu0 %vm1869_vm11, %v8976_v50  ;;  %vm1883_vm9 = vcmp.eq.s32.totalorder %v7208_v32, %v1839_v46 }
 0x25e   :  { %4959 = vmatprep.mubr.msk.f32.mxu0 %vm1870_vm12, %v8976_v50  ;;  %5396 = vmatpush3.bf16.msra.mxu0 %v5393_v41  ;;  %vm1886_vm12 = vcmp.eq.s32.totalorder %v7208_v32, %v1848_v53 }
 0x25f   :  { %5398 = vmatprep.subr.bf16.mxu0 %v5397_v48 }
 0x260   :  { %v1845_v35 = vpop.permute.xlu1 %1844  ;;  %v1854_v21 = vpop.permute.xlu0 %1853 }
 0x261   :  { %4960 = vmatmul.mubr.msk.f32.gmra.mrb[60].mxu0 %vm1871_vm13, %v8976_v50  ;;  %vm1885_vm11 = vcmp.eq.s32.totalorder %v7208_v32, %v1845_v35 }
 0x262   :  { %4962 = vmatprep.mubr.msk.f32.mxu0 %vm1872_vm14, %v8976_v50  ;;  %5400 = vmatpush3.bf16.msra.mxu0 %v5397_v48  ;;  %vm1888_vm14 = vcmp.eq.s32.totalorder %v7208_v32, %v1854_v21 }
 0x263   :  { %5402 = vmatprep.subr.bf16.mxu0 %v5401_v3 }
 0x264   :  { %v1851_v45 = vpop.permute.xlu1 %1850 }
 0x265   :  { %4963 = vmatmul.mubr.msk.f32.gmra.mrb[62].mxu0 %vm1873_vm15, %v8976_v50  ;;  %vm1887_vm13 = vcmp.eq.s32.totalorder %v7208_v32, %v1851_v45 }
 0x266   :  { %4965 = vmatprep.mubr.msk.f32.mxu0 %vm1874_vm0, %v8976_v50  ;;  %5404 = vmatpush3.bf16.msra.mxu0 %v5401_v3 }
 0x268   :  { %v1857_v54 = vpop.permute.xlu1 %1856 }
 0x269   :  { %4966 = vmatmul.mubr.msk.f32.gmra.mrb[64].mxu0 %vm1875_vm1, %v8976_v50  ;;  %vm1889_vm15 = vcmp.eq.s32.totalorder %v7208_v32, %v1857_v54  ;;  %v7316_v32 = vadd.f32 %v7291_v23, %v1589_v7 }
 0x26a   :  { %4968 = vmatprep.mubr.msk.f32.mxu0 %vm1876_vm2, %v8976_v50 }
 0x26d   :  { %4969 = vmatmul.mubr.msk.f32.gmra.mrb[66].mxu0 %vm1877_vm3, %v8976_v50 }
 0x26e   :  { %4971 = vmatprep.mubr.msk.f32.mxu0 %vm1878_vm4, %v8976_v50 }
 0x271   :  { %4972 = vmatmul.mubr.msk.f32.gmra.mrb[68].mxu0 %vm1879_vm5, %v8976_v50 }
 0x272   :  { %4974 = vmatprep.mubr.msk.f32.mxu0 %vm1880_vm6, %v8976_v50 }
 0x275   :  { %4975 = vmatmul.mubr.msk.f32.gmra.mrb[70].mxu0 %vm1881_vm7, %v8976_v50 }
 0x276   :  { %4977 = vmatprep.mubr.msk.f32.mxu0 %vm1882_vm8, %v8976_v50 }
 0x279   :  { %4978 = vmatmul.mubr.msk.f32.gmra.mrb[72].mxu0 %vm1883_vm9, %v8976_v50 }
 0x27a   :  { %4980 = vmatprep.mubr.msk.f32.mxu0 %vm1884_vm10, %v8976_v50 }
 0x27d   :  { %4981 = vmatmul.mubr.msk.f32.gmra.mrb[74].mxu0 %vm1885_vm11, %v8976_v50 }
 0x27e   :  { %4983 = vmatprep.mubr.msk.f32.mxu0 %vm1886_vm12, %v8976_v50 }
 0x281   :  { %4984 = vmatmul.mubr.msk.f32.gmra.mrb[76].mxu0 %vm1887_vm13, %v8976_v50 }
 0x282   :  { %4986 = vmatprep.mubr.msk.f32.mxu0 %vm1888_vm14, %v8976_v50 }
 0x285   :  { %4987 = vmatmul.mubr.msk.f32.gmra.mrb[78].mxu0 %vm1889_vm15, %v8976_v50 }
 0x286   :  { %5021 = vmatprep.mubr.f32.mxu0 %v7298_v31  ;;  %v4884_v0 = vpop.f32.mrb[46].mxu1 }
 0x287   :  { %v1639_v59 = vpop.f32.mrb[47].mxu1  ;;  %v7359_v40 = vadd.f32 %v4884_v0, %v7291_v23 }
 0x288   :  { %v7356_v55 = vadd.f32 %v7291_v23, %v1639_v59 }
 0x289   :  { %5022 = vmatmul.mubr.f32.vlgmr.msra.gmra.mrb[80].mxu0 %v7304_v47 }
 0x28a   :  { %5024 = vmatprep.mubr.f32.mxu0 %v7308_v63 }
 0x28d   :  { %5025 = vmatmul.mubr.f32.gmra.mrb[82].mxu0 %v7311_v49 }
 0x28e   :  { %5027 = vmatprep.mubr.f32.mxu0 %v7316_v32  ;;  %v4887_v10 = vpop.f32.mrb[48].mxu1 }
 0x28f   :  { %v1649_v60 = vpop.f32.mrb[49].mxu1  ;;  %v7371_v5 = vadd.f32 %v4887_v10, %v7291_v23 }
 0x290   :  { %v7366_v34 = vadd.f32 %v7291_v23, %v1649_v60 }
 0x291   :  { %5028 = vmatmul.mubr.f32.gmra.mrb[84].mxu0 %v7319_v28 }
 0x292   :  { %5030 = vmatprep.mubr.f32.mxu0 %v7324_v17 }
 0x295   :  { %5031 = vmatmul.mubr.f32.gmra.mrb[86].mxu0 %v7327_v42 }
 0x296   :  { %5033 = vmatprep.mubr.f32.mxu0 %v7332_v6 }
 0x299   :  { %5034 = vmatmul.mubr.f32.gmra.mrb[88].mxu0 %v7335_v33 }
 0x29a   :  { %5036 = vmatprep.mubr.f32.mxu0 %v7340_v11 }
 0x29d   :  { %5037 = vmatmul.mubr.f32.gmra.mrb[90].mxu0 %v7343_v8 }
 0x29e   :  { %5039 = vmatprep.mubr.f32.mxu0 %v7348_v18 }
 0x2a1   :  { %5040 = vmatmul.mubr.f32.gmra.mrb[92].mxu0 %v7351_v29 }
 0x2a2   :  { %5042 = vmatprep.mubr.f32.mxu0 %v7356_v55 }
 0x2a3   :  { %v4890_v14 = vpop.f32.mrb[50].mxu1 }
 0x2a4   :  { %v1659_v27 = vpop.f32.mrb[51].mxu1  ;;  %v7380_v15 = vadd.f32 %v4890_v14, %v7291_v23  ;;  %v2259_v14 = vld [vmem:[%s9134_s17] sm:$0x3] }
 0x2a5   :  { %5043 = vmatmul.mubr.f32.gmra.mrb[94].mxu0 %v7359_v40  ;;  %v7376_v41 = vadd.f32 %v7291_v23, %v1659_v27 }
 0x2a6   :  { %v7362_v62 = vpop.f32.mrb[16].mxu0  ;;  %5045 = vmatprep.mubr.f32.mxu0 %v7366_v34 }
 0x2a7   :  { %v7368_v58 = vpop.f32.mrb[17].mxu0 }
 0x2a8   :  { %v4893_v52 = vpop.f32.mrb[52].mxu1 }
 0x2a9   :  { %5046 = vmatmul.mubr.f32.gmra.mrb[96].mxu0 %v7371_v5  ;;  %v1669_v20 = vpop.f32.mrb[53].mxu1  ;;  %v7390_v13 = vadd.f32 %v4893_v52, %v7291_v23 }
 0x2aa   :  { %5048 = vmatprep.mubr.f32.mxu0 %v7376_v41  ;;  %v7384_v48 = vadd.f32 %v7291_v23, %v1669_v20 }
 0x2ad   :  { %5049 = vmatmul.mubr.f32.gmra.mrb[98].mxu0 %v7380_v15 }
 0x2ae   :  { %5051 = vmatprep.mubr.f32.mxu0 %v7384_v48 }
 0x2b0   :  { %v4896_v30 = vpop.f32.mrb[54].mxu1 }
 0x2b1   :  { %v7386_v51 = vpop.f32.mrb[18].mxu0  ;;  %5052 = vmatmul.mubr.f32.gmra.mrb[100].mxu0 %v7390_v13  ;;  %v7397_v4 = vadd.f32 %v4896_v30, %v7291_v23  ;;  %v1679_v43 = vpop.f32.mrb[55].mxu1 }
 0x2b2   :  { %v7392_v57 = vpop.f32.mrb[19].mxu0  ;;  %v7400_v3 = vadd.f32 %v7291_v23, %v1679_v43 }
 0x2b4   :  { %5054 = vmatprep.mubr.f32.mxu0 %v7400_v3 }
 0x2b5   :  { %5055 = vmatmul.mubr.f32.gmra.mrb[102].mxu0 %v7397_v4 }
 0x2b7   :  { %v4899_v1 = vpop.f32.mrb[56].mxu1 }
 0x2b8   :  { %v1689_v19 = vpop.f32.mrb[57].mxu1  ;;  %v7405_v36 = vadd.f32 %v4899_v1, %v7291_v23 }
 0x2b9   :  { %v7408_v24 = vadd.f32 %v7291_v23, %v1689_v19 }
 0x2ba   :  { %9125 = vst [vmem:[#allocation32_spill] sm:$0xff] %v7405_v36 }
 0x2bb   :  { %9126 = vst [vmem:[#allocation31_spill] sm:$0xff] %v7408_v24  ;;  %5057 = vmatprep.mubr.f32.mxu0 %v7408_v24 }
 0x2bc   :  { %v4902_v9 = vpop.f32.mrb[58].mxu1  ;;  %5058 = vmatmul.mubr.f32.gmra.mrb[104].mxu0 %v7405_v36 }
 0x2bd   :  { %v1699_v16 = vpop.f32.mrb[59].mxu1  ;;  %v7413_v7 = vadd.f32 %v4902_v9, %v7291_v23 }
 0x2be   :  { %v7416_v25 = vadd.f32 %v7291_v23, %v1699_v16 }
 0x2bf   :  { %9127 = vst [vmem:[#allocation29_spill] sm:$0xff] %v7413_v7 }
 0x2c0   :  { %9128 = vst [vmem:[#allocation37_spill] sm:$0xff] %v7416_v25  ;;  %5060 = vmatprep.mubr.f32.mxu0 %v7416_v25  ;;  %v4905_v26 = vpop.f32.mrb[60].mxu1 }
 0x2c1   :  { %v7418_v46 = vpop.f32.mrb[20].mxu0  ;;  %5061 = vmatmul.mubr.f32.gmra.mrb[106].mxu0 %v7413_v7  ;;  %v1709_v39 = vpop.f32.mrb[61].mxu1  ;;  %v7425_v35 = vadd.f32 %v4905_v26, %v7291_v23 }
 0x2c2   :  { %v7421_v56 = vpop.f32.mrb[21].mxu0  ;;  %v7428_v53 = vadd.f32 %v7291_v23, %v1709_v39 }
 0x2c3   :  { %9129 = vst [vmem:[#allocation36_spill] sm:$0xff] %v7425_v35 }
 0x2c4   :  { %9130 = vst [vmem:[#allocation30_spill] sm:$0xff] %v7428_v53  ;;  %5063 = vmatprep.mubr.f32.mxu0 %v7428_v53  ;;  %v4908_v44 = vpop.f32.mrb[62].mxu1 }
 0x2c5   :  { %5064 = vmatmul.mubr.f32.gmra.mrb[108].mxu0 %v7425_v35  ;;  %v1719_v22 = vpop.f32.mrb[63].mxu1  ;;  %v7435_v21 = vadd.f32 %v4908_v44, %v7291_v23 }
 0x2c6   :  { %v7438_v12 = vadd.f32 %v7291_v23, %v1719_v22  ;;  %v7457_v23 = vshrl.u32 %v1760_v37, 7 }
 0x2c7   :  { %v7432_v45 = vpop.f32.mrb[22].mxu0  ;;  %9131 = vst [vmem:[#allocation69_spill] sm:$0xff] %v7435_v21 }
 0x2c8   :  { %9132 = vst [vmem:[#allocation34_spill] sm:$0xff] %v7438_v12  ;;  %v7440_v61 = vpop.f32.mrb[23].mxu0  ;;  %5066 = vmatprep.mubr.f32.mxu0 %v7438_v12  ;;  %9133 = vst [vmem:[#allocation45_spill] sm:$0xff] %v7457_v23  ;;  %v2279_v52 = vsub.s32 0, %v7457_v23  ;;  %v2283_v20 = vsub.s32 1, %v7457_v23  ;;  %v7469_v30 = vadd.s32 8, %v7457_v23 }
 0x2c9   :  { %5067 = vmatmul.mubr.f32.gmra.mrb[110].mxu0 %v7435_v21  ;;  %v7487_v19 = vadd.s32 16, %v7457_v23  ;;  %v7496_v16 = vadd.s32 24, %v7457_v23  ;;  %v7505_v39 = vadd.s32 32, %v7457_v23  ;;  %v7514_v22 = vadd.s32 40, %v7457_v23 }
 0x2ca   :  { %9135 = vst [vmem:[#allocation68_spill] sm:$0xff] %v7469_v30  ;;  %v7471_v43 = vrot.slane %v2259_v14, %v2279_v52  ;;  %v7473_v1 = vrot.slane %v2259_v14, %v2283_v20  ;;  %v7525_v20 = vadd.s32 48, %v7457_v23  ;;  %v7572_v21 = vadd.s32 88, %v7457_v23 }
 0x2cb   :  { %9137 = vst [vmem:[#allocation42_spill] sm:$0xff] %v7487_v19  ;;  %9138 = vst [vmem:[#allocation33_spill] sm:$0xff] %v7496_v16 }
 0x2cc   :  { %9136 = vst [vmem:[#allocation41_spill] sm:$0xff] %v7473_v1  ;;  %vm2286_vm0 = vcmp.eq.s32.totalorder %v7457_v23, %v7473_v1  ;;  %vm2285_vm1 = vcmp.eq.s32.totalorder %v7457_v23, %v7471_v43  ;;  %vm2288_vm2 = vcmp.eq.s32.totalorder %v7469_v30, %v7473_v1  ;;  %vm2287_vm3 = vcmp.eq.s32.totalorder %v7469_v30, %v7471_v43 }
 0x2cd   :  { %4162 = vmatprep.mubr.msk.f32.mxu1 %vm2286_vm0, %v8976_v50  ;;  %vm2290_vm4 = vcmp.eq.s32.totalorder %v7487_v19, %v7473_v1  ;;  %vm2289_vm5 = vcmp.eq.s32.totalorder %v7487_v19, %v7471_v43  ;;  %vm2292_vm6 = vcmp.eq.s32.totalorder %v7496_v16, %v7473_v1  ;;  %vm2291_vm7 = vcmp.eq.s32.totalorder %v7496_v16, %v7471_v43 }
 0x2ce   :  { %9139 = vst [vmem:[#allocation35_spill] sm:$0xff] %v7505_v39  ;;  %vm2294_vm8 = vcmp.eq.s32.totalorder %v7505_v39, %v7473_v1  ;;  %vm2293_vm9 = vcmp.eq.s32.totalorder %v7505_v39, %v7471_v43  ;;  %9140 = vst [vmem:[#allocation39_spill] sm:$0xff] %v7514_v22  ;;  %vm2296_vm10 = vcmp.eq.s32.totalorder %v7514_v22, %v7473_v1  ;;  %v7532_v50 = vadd.s32 56, %v7457_v23 }
 0x2cf   :  { %vm2295_vm11 = vcmp.eq.s32.totalorder %v7514_v22, %v7471_v43  ;;  %9141 = vst [vmem:[#allocation49_spill] sm:$0xff] %v7525_v20  ;;  %vm2298_vm12 = vcmp.eq.s32.totalorder %v7525_v20, %v7473_v1  ;;  %v7543_v22 = vadd.s32 64, %v7457_v23  ;;  %v7552_v19 = vadd.s32 72, %v7457_v23  ;;  %9147 = vst [vmem:[#allocation55_spill] sm:$0xff] %v7572_v21  ;;  %v7599_v21 = vld [vmem:[%s8927_s10] ss:$0 sm:$0xff] }
 0x2d0   :  { %v7444_v54 = vpop.f32.mrb[24].mxu0  ;;  %9142 = vst [vmem:[#allocation38_spill] sm:$0xff] %v7532_v50  ;;  %v7561_v50 = vadd.s32 80, %v7457_v23  ;;  %v1290_v7 = vadd.f32 %v7599_v21, %v7368_v58  ;;  %v1300_v58 = vadd.f32 %v7599_v21, %v7392_v57 }
 0x2d1   :  { %v7446_v2 = vpop.f32.mrb[25].mxu0  ;;  %9143 = vst [vmem:[#allocation47_spill] sm:$0xff] %v7543_v22  ;;  %9144 = vst [vmem:[#allocation48_spill] sm:$0xff] %v7552_v19  ;;  %v7579_v19 = vadd.s32 96, %v7457_v23 }
 0x2d2   :  { %9145 = vst [vmem:[#allocation40_spill] sm:$0xff] %v7561_v50  ;;  %v7590_v50 = vadd.s32 104, %v7457_v23 }
 0x2d3   :  { %9148 = vst [vmem:[#allocation43_spill] sm:$0xff] %v7579_v19  ;;  %vm2310_vm13 = vcmp.eq.s32.totalorder %v7579_v19, %v7473_v1 }
 0x2d4   :  { %9151 = vst [vmem:[#allocation44_spill] sm:$0xff] %v7590_v50  ;;  %v1295_v50 = vadd.f32 %v7362_v62, %v7599_v21 }
 0x2d8   :  { %v7448_v38 = vpop.f32.mrb[26].mxu0 }
 0x2d9   :  { %v7450_v0 = vpop.f32.mrb[27].mxu0 }
 0x2de   :  { %v7452_v59 = vpop.f32.mrb[28].mxu0 }
 0x2df   :  { %v7454_v10 = vpop.f32.mrb[29].mxu0 }
 0x2e4   :  { %v7459_v60 = vpop.f32.mrb[30].mxu0 }
 0x2e5   :  { %v7464_v27 = vpop.f32.mrb[31].mxu0 }
 0x2ea   :  { %v7483_v37 = vpop.f32.mrb[32].mxu0 }
 0x2eb   :  { %v7489_v9 = vpop.f32.mrb[33].mxu0 }
 0x2f2   :  { %v7502_v26 = vpop.f32.mrb[34].mxu0 }
 0x2f3   :  { %v7507_v44 = vpop.f32.mrb[35].mxu0 }
 0x2f8   :  { %v7516_v14 = vpop.f32.mrb[36].mxu0 }
 0x2f9   :  { %v7522_v52 = vpop.f32.mrb[37].mxu0 }
 0x2ff   :  { %v7534_v39 = vpop.f32.mrb[38].mxu0 }
 0x300   :  { %v7536_v16 = vpop.f32.mrb[39].mxu0 }
 0x306   :  { %v7549_v20 = vpop.f32.mrb[40].mxu0 }
 0x307   :  { %v7554_v30 = vpop.f32.mrb[41].mxu0 }
 0x30d   :  { %v7567_v22 = vpop.f32.mrb[42].mxu0 }
 0x30e   :  { %v7569_v12 = vpop.f32.mrb[43].mxu0 }
 0x30f   :  { %9146 = vst [vmem:[#allocation46_spill] sm:$0xff] %v7569_v12 }
 0x312   :  { %v7581_v53 = vpop.f32.mrb[44].mxu0 }
 0x313   :  { %9149 = vst [vmem:[#allocation52_spill] sm:$0xff] %v7581_v53  ;;  %v7583_v35 = vpop.f32.mrb[45].mxu0 }
 0x314   :  { %9150 = vst [vmem:[#allocation54_spill] sm:$0xff] %v7583_v35  ;;  %v7604_v35 = vadd.s32 112, %v7457_v23 }
 0x316   :  { %9153 = vst [vmem:[#allocation59_spill] sm:$0xff] %v7604_v35  ;;  %vm2313_vm14 = vcmp.eq.s32.totalorder %v7604_v35, %v7471_v43  ;;  %v1305_v35 = vadd.f32 %v7386_v51, %v7599_v21 }
 0x318   :  { %v7601_v25 = vpop.f32.mrb[46].mxu0 }
 0x319   :  { %9152 = vst [vmem:[#allocation50_spill] sm:$0xff] %v7601_v25  ;;  %v7606_v19 = vpop.f32.mrb[47].mxu0  ;;  %v7617_v25 = vadd.s32 120, %v7457_v23 }
 0x31b   :  { %9154 = vst [vmem:[#allocation51_spill] sm:$0xff] %v7617_v25  ;;  %vm2316_vm15 = vcmp.eq.s32.totalorder %v7617_v25, %v7473_v1  ;;  %vm2315_vm0 = vcmp.eq.s32.totalorder %v7617_v25, %v7471_v43  ;;  %v1315_v25 = vadd.f32 %v7418_v46, %v7599_v21 }
 0x31c   :  { %v4943_v53 = vpop.f32.mrb[48].mxu0 }
 0x31d   :  { %v2196_v24 = vmul.f32 %v4943_v53, %v1295_v50  ;;  %v2036_v12 = vpop.f32.mrb[49].mxu0 }
 0x31e   :  { %v2195_v36 = vmul.f32 %v2036_v12, %v1290_v7 }
 0x31f   :  { %v7626_v62 = vadd.f32 %v2196_v24, %v7304_v47  ;;  %v1310_v47 = vadd.f32 %v7599_v21, %v7421_v56 }
 0x320   :  { %v7631_v23 = vadd.f32 %v2195_v36, %v7298_v31  ;;  %v4946_v50 = vpop.f32.mrb[50].mxu0 }
 0x321   :  { %v2198_v7 = vmul.f32 %v4946_v50, %v1305_v35  ;;  %v2046_v53 = vpop.f32.mrb[51].mxu0 }
 0x322   :  { %v5343_v12 = vpack.c.bf16 %v7626_v62, %v7631_v23  ;;  %v2197_v1 = vmul.f32 %v2046_v53, %v1300_v58  ;;  %v1325_v58 = vadd.f32 %v7432_v45, %v7599_v21 }
 0x323   :  { %v7638_v51 = vadd.f32 %v2198_v7, %v7311_v49  ;;  %v1320_v49 = vadd.f32 %v7599_v21, %v7440_v61 }
 0x324   :  { %v7643_v57 = vadd.f32 %v2197_v1, %v7308_v63  ;;  %v4949_v31 = vpop.f32.mrb[52].mxu0 }
 0x325   :  { %v2200_v36 = vmul.f32 %v4949_v31, %v1315_v25  ;;  %v2056_v24 = vpop.f32.mrb[53].mxu0 }
 0x326   :  { %v5347_v35 = vpack.c.bf16 %v7638_v51, %v7643_v57  ;;  %v2199_v50 = vmul.f32 %v2056_v24, %v1310_v47  ;;  %v1335_v47 = vadd.f32 %v7444_v54, %v7599_v21 }
 0x327   :  { %v7650_v46 = vadd.f32 %v2200_v36, %v7319_v28  ;;  %v1330_v28 = vadd.f32 %v7599_v21, %v7446_v2 }
 0x328   :  { %v7655_v56 = vadd.f32 %v2199_v50, %v7316_v32  ;;  %v4952_v63 = vpop.f32.mrb[54].mxu0 }
 0x329   :  { %v2202_v1 = vmul.f32 %v4952_v63, %v1325_v58  ;;  %v2066_v25 = vpop.f32.mrb[55].mxu0  ;;  %v1345_v58 = vadd.f32 %v7448_v38, %v7599_v21 }
 0x32a   :  { %v5351_v7 = vpack.c.bf16 %v7650_v46, %v7655_v56  ;;  %v2201_v53 = vmul.f32 %v2066_v25, %v1320_v49 }
 0x32b   :  { %v7662_v45 = vadd.f32 %v2202_v1, %v7327_v42  ;;  %v1340_v42 = vadd.f32 %v7599_v21, %v7450_v0 }
 0x32c   :  { %v7667_v61 = vadd.f32 %v2201_v53, %v7324_v17  ;;  %v4955_v32 = vpop.f32.mrb[56].mxu0  ;;  %v1355_v53 = vadd.f32 %v7452_v59, %v7599_v21 }
 0x32d   :  { %v2204_v31 = vmul.f32 %v4955_v32, %v1335_v47  ;;  %v2076_v36 = vpop.f32.mrb[57].mxu0 }
 0x32e   :  { %v5355_v24 = vpack.c.bf16 %v7662_v45, %v7667_v61  ;;  %v2203_v50 = vmul.f32 %v2076_v36, %v1330_v28  ;;  %v1365_v36 = vadd.f32 %v7459_v60, %v7599_v21 }
 0x32f   :  { %v7674_v54 = vadd.f32 %v2204_v31, %v7335_v33  ;;  %v1350_v33 = vadd.f32 %v7599_v21, %v7454_v10 }
 0x330   :  { %v7679_v2 = vadd.f32 %v2203_v50, %v7332_v6  ;;  %v4958_v17 = vpop.f32.mrb[58].mxu0 }
 0x331   :  { %v2206_v49 = vmul.f32 %v4958_v17, %v1345_v58  ;;  %v2086_v63 = vpop.f32.mrb[59].mxu0 }
 0x332   :  { %v5359_v1 = vpack.c.bf16 %v7674_v54, %v7679_v2  ;;  %v2205_v25 = vmul.f32 %v2086_v63, %v1340_v42 }
 0x333   :  { %v7686_v38 = vadd.f32 %v2206_v49, %v7343_v8  ;;  %v1360_v8 = vadd.f32 %v7599_v21, %v7464_v27  ;;  %v1375_v49 = vadd.f32 %v7483_v37, %v7599_v21 }
 0x334   :  { %v7691_v0 = vadd.f32 %v2205_v25, %v7340_v11  ;;  %v4961_v6 = vpop.f32.mrb[60].mxu0 }
 0x335   :  { %v2208_v47 = vmul.f32 %v4961_v6, %v1355_v53  ;;  %v2096_v28 = vpop.f32.mrb[61].mxu0  ;;  %v1385_v6 = vadd.f32 %v7502_v26, %v7599_v21  ;;  %v1390_v26 = vadd.f32 %v7599_v21, %v7522_v52  ;;  %v1400_v52 = vadd.f32 %v7599_v21, %v7536_v16 }
 0x336   :  { %v5363_v32 = vpack.c.bf16 %v7686_v38, %v7691_v0  ;;  %v2207_v31 = vmul.f32 %v2096_v28, %v1350_v33  ;;  %v1410_v16 = vadd.f32 %v7599_v21, %v7554_v30 }
 0x337   :  { %v7698_v59 = vadd.f32 %v2208_v47, %v7351_v29  ;;  %v1370_v29 = vadd.f32 %v7599_v21, %v7489_v9 }
 0x338   :  { %v7703_v10 = vadd.f32 %v2207_v31, %v7348_v18  ;;  %v4964_v11 = vpop.f32.mrb[62].mxu0 }
 0x339   :  { %v2210_v50 = vmul.f32 %v4964_v11, %v1365_v36  ;;  %v2106_v58 = vpop.f32.mrb[63].mxu0 }
 0x33a   :  { %v5367_v42 = vpack.c.bf16 %v7698_v59, %v7703_v10  ;;  %v2209_v17 = vmul.f32 %v2106_v58, %v1360_v8  ;;  %v1395_v8 = vadd.f32 %v7516_v14, %v7599_v21  ;;  %v1405_v14 = vadd.f32 %v7534_v39, %v7599_v21 }
 0x33b   :  { %v7710_v60 = vadd.f32 %v2210_v50, %v7359_v40  ;;  %v1380_v40 = vadd.f32 %v7599_v21, %v7507_v44  ;;  %v1415_v39 = vadd.f32 %v7549_v20, %v7599_v21  ;;  %v1425_v20 = vadd.f32 %v7567_v22, %v7599_v21 }
 0x33c   :  { %v7715_v27 = vadd.f32 %v2209_v17, %v7356_v55  ;;  %v4967_v18 = vpop.f32.mrb[64].mxu0 }
 0x33d   :  { %v2212_v63 = vmul.f32 %v4967_v18, %v1375_v49  ;;  %v2116_v25 = vpop.f32.mrb[65].mxu0 }
 0x33e   :  { %v5371_v53 = vpack.c.bf16 %v7710_v60, %v7715_v27  ;;  %v2211_v33 = vmul.f32 %v2116_v25, %v1370_v29 }
 0x33f   :  { %v2244_v37 = vadd.f32 %v2212_v63, %v7371_v5 }
 0x340   :  { %v2243_v9 = vadd.f32 %v2211_v33, %v7366_v34  ;;  %v4970_v47 = vpop.f32.mrb[66].mxu0  ;;  %v9156_v33 = vld [vmem:[#allocation46_spill] sm:$0xff] }
 0x341   :  { %v2214_v55 = vmul.f32 %v4970_v47, %v1385_v6  ;;  %v2126_v28 = vpop.f32.mrb[67].mxu0  ;;  %v1420_v30 = vadd.f32 %v7599_v21, %v9156_v33  ;;  %v9157_v6 = vld [vmem:[#allocation31_spill] sm:$0xff]  ;;  %v9159_v47 = vld [vmem:[#allocation29_spill] sm:$0xff] }
 0x342   :  { %v2213_v31 = vmul.f32 %v2126_v28, %v1380_v40  ;;  %v5341_v36 = vpack.c.bf16 %v2244_v37, %v2243_v9  ;;  %v9160_v28 = vld [vmem:[#allocation54_spill] sm:$0xff] }
 0x343   :  { %v2246_v11 = vadd.f32 %v2214_v55, %v7380_v15 }
 0x344   :  { %v2245_v5 = vadd.f32 %v2213_v31, %v7376_v41  ;;  %v4973_v50 = vpop.f32.mrb[68].mxu0  ;;  %5342 = vmatprep.subr.bf16.mxu1 %v5341_v36  ;;  %v1430_v31 = vadd.f32 %v7599_v21, %v9160_v28  ;;  %v9161_v36 = vld [vmem:[#allocation37_spill] sm:$0xff] }
 0x345   :  { %v2216_v44 = vmul.f32 %v4973_v50, %v1395_v8  ;;  %v2136_v58 = vpop.f32.mrb[69].mxu0  ;;  %5344 = vmatpush3.bf16.msra.mxu1 %v5343_v12 }
 0x346   :  { %v2215_v34 = vmul.f32 %v2136_v58, %v1390_v26  ;;  %v5345_v17 = vpack.c.bf16 %v2246_v11, %v2245_v5 }
 0x347   :  { %v2248_v15 = vadd.f32 %v2216_v44, %v7390_v13  ;;  %v9163_v44 = vld [vmem:[#allocation36_spill] sm:$0xff] }
 0x348   :  { %v2247_v41 = vadd.f32 %v2215_v34, %v7384_v48  ;;  %v4976_v49 = vpop.f32.mrb[70].mxu0  ;;  %5346 = vmatprep.subr.bf16.mxu1 %v5345_v17  ;;  %v1440_v34 = vadd.f32 %v7599_v21, %v7606_v19  ;;  %v9164_v17 = vld [vmem:[#allocation30_spill] sm:$0xff] }
 0x349   :  { %v2218_v29 = vmul.f32 %v4976_v49, %v1405_v14  ;;  %v2146_v18 = vpop.f32.mrb[71].mxu0  ;;  %5348 = vmatpush3.bf16.msra.mxu1 %v5347_v35  ;;  %v9155_v35 = vld [vmem:[#allocation32_spill] sm:$0xff]  ;;  %v9165_v49 = vld [vmem:[#allocation69_spill] sm:$0xff] }
 0x34a   :  { %v2217_v23 = vmul.f32 %v2146_v18, %v1400_v52  ;;  %v5349_v62 = vpack.c.bf16 %v2248_v15, %v2247_v41 }
 0x34b   :  { %v2250_v13 = vadd.f32 %v2218_v29, %v7397_v4 }
 0x34c   :  { %v2249_v48 = vadd.f32 %v2217_v23, %v7400_v3  ;;  %v4979_v12 = vpop.f32.mrb[72].mxu0  ;;  %5350 = vmatprep.subr.bf16.mxu1 %v5349_v62 }
 0x34d   :  { %v2220_v63 = vmul.f32 %v4979_v12, %v1415_v39  ;;  %v2156_v25 = vpop.f32.mrb[73].mxu0  ;;  %5352 = vmatpush3.bf16.msra.mxu1 %v5351_v7  ;;  %v9158_v7 = vld [vmem:[#allocation52_spill] sm:$0xff] }
 0x34e   :  { %v2219_v51 = vmul.f32 %v2156_v25, %v1410_v16  ;;  %v5353_v57 = vpack.c.bf16 %v2250_v13, %v2249_v48  ;;  %v1435_v22 = vadd.f32 %v9158_v7, %v7599_v21  ;;  %v9167_v25 = vmov 1.0  }
 0x34f   :  { %v2252_v4 = vadd.f32 %v2220_v63, %v9155_v35 }
 0x350   :  { %v2251_v3 = vadd.f32 %v2219_v51, %v9157_v6  ;;  %v4982_v37 = vpop.f32.mrb[74].mxu0  ;;  %5354 = vmatprep.subr.bf16.mxu1 %v5353_v57 }
 0x351   :  { %v2222_v40 = vmul.f32 %v4982_v37, %v1425_v20  ;;  %v2166_v9 = vpop.f32.mrb[75].mxu0  ;;  %5356 = vmatpush3.bf16.msra.mxu1 %v5355_v24  ;;  %v9162_v24 = vld [vmem:[#allocation50_spill] sm:$0xff]  ;;  %v9170_v20 = vld [vmem:[#allocation41_spill] sm:$0xff] }
 0x352   :  { %v2221_v46 = vmul.f32 %v2166_v9, %v1420_v30  ;;  %v5357_v56 = vpack.c.bf16 %v2252_v4, %v2251_v3  ;;  %v1445_v50 = vadd.f32 %v9162_v24, %v7599_v21  ;;  %v9166_v21 = vld [vmem:[#allocation34_spill] sm:$0xff] }
 0x353   :  { %v2254_v55 = vadd.f32 %v2222_v40, %v9159_v47 }
 0x354   :  { %v2253_v8 = vadd.f32 %v2221_v46, %v9161_v36  ;;  %v4985_v11 = vpop.f32.mrb[76].mxu0  ;;  %5358 = vmatprep.subr.bf16.mxu1 %v5357_v56 }
 0x355   :  { %v2224_v26 = vmul.f32 %v4985_v11, %v1435_v22  ;;  %v2176_v5 = vpop.f32.mrb[77].mxu0  ;;  %5360 = vmatpush3.bf16.msra.mxu1 %v5359_v1  ;;  %v7782_v1 = vld [vmem:[%s8931_s14] ss:$0 sm:$0xff] }
 0x356   :  { %v2223_v45 = vmul.f32 %v2176_v5, %v1430_v31  ;;  %v5361_v61 = vpack.c.bf16 %v2254_v55, %v2253_v8 }
 0x357   :  { %v2256_v58 = vadd.f32 %v2224_v26, %v9163_v44 }
 0x358   :  { %v2255_v14 = vadd.f32 %v2223_v45, %v9164_v17  ;;  %v4988_v15 = vpop.f32.mrb[78].mxu0  ;;  %5362 = vmatprep.subr.bf16.mxu1 %v5361_v61 }
 0x359   :  { %v2226_v52 = vmul.f32 %v4988_v15, %v1445_v50  ;;  %v2186_v41 = vpop.f32.mrb[79].mxu0  ;;  %5364 = vmatpush3.bf16.msra.mxu1 %v5363_v32  ;;  %v9197_v15 = vld [vmem:[#allocation48_spill] sm:$0xff] }
 0x35a   :  { %v2225_v54 = vmul.f32 %v2186_v41, %v1440_v34  ;;  %v5365_v2 = vpack.c.bf16 %v2256_v58, %v2255_v14 }
 0x35b   :  { %v2258_v29 = vadd.f32 %v2226_v52, %v9165_v49 }
 0x35c   :  { %v2257_v19 = vadd.f32 %v2225_v54, %v9166_v21  ;;  %5366 = vmatprep.subr.bf16.mxu1 %v5365_v2  ;;  %v5023_v18 = vpop.f32.mrb[80].mxu0 }
 0x35d   :  { %5368 = vmatpush3.bf16.msra.mxu1 %v5367_v42  ;;  %v7790_v38 = vadd.f32 %v5023_v18, %v7782_v1  ;;  %v2663_v0 = vpop.f32.mrb[81].mxu0 }
 0x35e   :  { %v5369_v32 = vpack.c.bf16 %v2258_v29, %v2257_v19  ;;  %v7793_v23 = vadd.f32 %v7782_v1, %v2663_v0 }
 0x35f   :  { %v7796_v62 = vmul.f32 0.5, %v7790_v38 }
 0x360   :  { %5370 = vmatprep.subr.bf16.mxu1 %v5369_v32  ;;  %v7799_v39 = vmul.f32 0.5, %v7793_v23  ;;  %v5026_v13 = vpop.f32.mrb[82].mxu0 }
 0x361   :  { %5372 = vmatpush3.bf16.msra.mxu1 %v5371_v53  ;;  %v2887_v59 = vmin.f32 %v7796_v62, 14.0  ;;  %v7806_v10 = vadd.f32 %v5026_v13, %v7782_v1  ;;  %v2673_v42 = vpop.f32.mrb[83].mxu0 }
 0x362   :  { %v2886_v16 = vmin.f32 %v7799_v39, 14.0  ;;  %v7810_v48 = vadd.f32 %v7782_v1, %v2673_v42 }
 0x363   :  { %v2920_v12 = vmul.f32 1.442695, %v2887_v59  ;;  %v7813_v63 = vmul.f32 0.5, %v7806_v10 }
 0x364   :  { %4163 = vmatmul.mubr.msk.f32.vlgmr.msra.gmra.mrb[64].mxu1 %vm2285_vm1, %v9167_v25  ;;  %v2918_v60 = vmul.f32 1.442695, %v2886_v16  ;;  %v7820_v27 = vmul.f32 0.5, %v7810_v48  ;;  %v5029_v53 = vpop.f32.mrb[84].mxu0 }
 0x365   :  { %4164 = vmatprep.mubr.msk.f32.mxu1 %vm2288_vm2, %v9167_v25  ;;  %5630 = vpow2.f32 %v2920_v12  ;;  %v2889_v35 = vmin.f32 %v7813_v63, 14.0  ;;  %v7828_v4 = vadd.f32 %v5029_v53, %v7782_v1  ;;  %v2683_v33 = vpop.f32.mrb[85].mxu0 }
 0x366   :  { %5632 = vpow2.f32 %v2918_v60  ;;  %v2888_v30 = vmin.f32 %v7820_v27, 14.0  ;;  %v7832_v6 = vadd.f32 %v7782_v1, %v2683_v33 }
 0x367   :  { %v2924_v3 = vmul.f32 1.442695, %v2889_v35  ;;  %v7835_v37 = vmul.f32 0.5, %v7828_v4 }
 0x368   :  { %4165 = vmatmul.mubr.msk.f32.gmra.mrb[66].mxu1 %vm2287_vm3, %v9167_v25  ;;  %v2922_v40 = vmul.f32 1.442695, %v2888_v30  ;;  %v7842_v9 = vmul.f32 0.5, %v7832_v6  ;;  %v5032_v46 = vpop.f32.mrb[86].mxu0  ;;  %vm2855_vm3 = vcmp.gt.f32.partialorder %v7796_v62, 14.0 }
 0x369   :  { %4166 = vmatprep.mubr.msk.f32.mxu1 %vm2290_vm4, %v9167_v25  ;;  %5634 = vpow2.f32 %v2924_v3  ;;  %v2891_v7 = vmin.f32 %v7835_v37, 14.0  ;;  %v7850_v22 = vadd.f32 %v5032_v46, %v7782_v1  ;;  %v2693_v47 = vpop.f32.mrb[87].mxu0  ;;  %vm2854_vm4 = vcmp.gt.f32.partialorder %v7799_v39, 14.0 }
 0x36a   :  { %5636 = vpow2.f32 %v2922_v40  ;;  %v2890_v55 = vmin.f32 %v7842_v9, 14.0  ;;  %v7854_v28 = vadd.f32 %v7782_v1, %v2693_v47 }
 0x36b   :  { %v2928_v31 = vmul.f32 1.442695, %v2891_v7  ;;  %v7857_v36 = vmul.f32 0.5, %v7850_v22 }
 0x36c   :  { %4167 = vmatmul.mubr.msk.f32.gmra.mrb[68].mxu1 %vm2289_vm5, %v9167_v25  ;;  %v2926_v8 = vmul.f32 1.442695, %v2890_v55  ;;  %v7864_v11 = vmul.f32 0.5, %v7854_v28  ;;  %v5035_v26 = vpop.f32.mrb[88].mxu0 }
 0x36d   :  { %4168 = vmatprep.mubr.msk.f32.mxu1 %vm2292_vm6, %v9167_v25  ;;  %5638 = vpow2.f32 %v2928_v31  ;;  %v2893_v45 = vmin.f32 %v7857_v36, 14.0  ;;  %v2703_v61 = vpop.f32.mrb[89].mxu0  ;;  %v7872_v24 = vadd.f32 %v5035_v26, %v7782_v1  ;;  %vm2857_vm6 = vcmp.gt.f32.partialorder %v7813_v63, 14.0 }
 0x36e   :  { %5640 = vpow2.f32 %v2926_v8  ;;  %v2892_v14 = vmin.f32 %v7864_v11, 14.0  ;;  %v7891_v18 = vadd.f32 %v7782_v1, %v2703_v61 }
 0x36f   :  { %v5631_v50 = vpop.eup %5630  ;;  %v2932_v44 = vmul.f32 1.442695, %v2893_v45  ;;  %v7886_v29 = vmul.f32 0.5, %v7872_v24  ;;  %v9179_v45 = vld [vmem:[#allocation49_spill] sm:$0xff] }
 0x370   :  { %v5633_v58 = vpop.eup %5632  ;;  %4169 = vmatmul.mubr.msk.f32.gmra.mrb[70].mxu1 %vm2291_vm7, %v9167_v25  ;;  %v2991_v34 = vadd.f32 1.0, %v5631_v50  ;;  %v2994_v17 = vmul.f32 -0.5, %v5631_v50  ;;  %v2997_v52 = vand.u32 2147483647, %v5631_v50  ;;  %v7883_v2 = vpop.f32.mrb[90].mxu0  ;;  %v7918_v7 = vmul.f32 0.5, %v7891_v18 }
 0x371   :  { %4170 = vmatprep.mubr.msk.f32.mxu1 %vm2294_vm8, %v9167_v25  ;;  %v2982_v41 = vadd.f32 1.0, %v5633_v58  ;;  %v2985_v54 = vmul.f32 -0.5, %v5633_v58  ;;  %5642 = vpow2.f32 %v2932_v44  ;;  %v2988_v49 = vand.u32 2147483647, %v5633_v58  ;;  %v7888_v21 = vpop.f32.mrb[91].mxu0 }
 0x372   :  { %5644 = vlog2.f32 %v2991_v34  ;;  %v2995_v32 = vadd.f32 1.0, %v2994_v17  ;;  %v2930_v42 = vmul.f32 1.442695, %v2892_v14  ;;  %vm7903_vm1 = vcmp.lt.f32.partialorder %v2997_v52, 0.0004427343 }
 0x373   :  { %v5635_v19 = vpop.eup %5634  ;;  %5646 = vlog2.f32 %v2982_v41  ;;  %v2986_v60 = vadd.f32 1.0, %v2985_v54  ;;  %vm7909_vm2 = vcmp.lt.f32.partialorder %v2988_v49, 0.0004427343  ;;  %v2895_v3 = vmin.f32 %v7886_v29, 14.0 }
 0x374   :  { %v5637_v0 = vpop.eup %5636  ;;  %4171 = vmatmul.mubr.msk.f32.gmra.mrb[72].mxu1 %vm2293_vm9, %v9167_v25  ;;  %v3009_v13 = vadd.f32 1.0, %v5635_v19  ;;  %v3012_v59 = vmul.f32 -0.5, %v5635_v19  ;;  %v7897_v16 = vpop.f32.mrb[92].mxu0  ;;  %v3015_v30 = vand.u32 2147483647, %v5635_v19  ;;  %v2996_v61 = vmul.f32 %v5631_v50, %v2995_v32 }
 0x375   :  { %4172 = vmatprep.mubr.msk.f32.mxu1 %vm2296_vm10, %v9167_v25  ;;  %v3000_v53 = vadd.f32 1.0, %v5637_v0  ;;  %v3003_v57 = vmul.f32 -0.5, %v5637_v0  ;;  %v7907_v35 = vpop.f32.mrb[93].mxu0  ;;  %v3006_v56 = vand.u32 2147483647, %v5637_v0  ;;  %v2987_v44 = vmul.f32 %v5633_v58, %v2986_v60 }
 0x376   :  { %5648 = vlog2.f32 %v3009_v13  ;;  %v3013_v46 = vadd.f32 1.0, %v3012_v59  ;;  %vm7940_vm5 = vcmp.lt.f32.partialorder %v3015_v30, 0.0004427343  ;;  %v2936_v41 = vmul.f32 1.442695, %v2895_v3 }
 0x377   :  { %v7914_v40 = vpop.eup %5638  ;;  %5650 = vlog2.f32 %v3000_v53  ;;  %v3004_v55 = vadd.f32 1.0, %v3003_v57  ;;  %vm7948_vm7 = vcmp.lt.f32.partialorder %v3006_v56, 0.0004427343  ;;  %v2894_v49 = vmin.f32 %v7918_v7, 14.0  ;;  %v9187_v57 = vld [vmem:[#allocation38_spill] sm:$0xff] }
 0x378   :  { %v7920_v47 = vpop.eup %5640  ;;  %4173 = vmatmul.mubr.msk.f32.gmra.mrb[74].mxu1 %vm2295_vm11, %v9167_v25  ;;  %v3027_v31 = vadd.f32 1.0, %v7914_v40  ;;  %v3030_v8 = vmul.f32 -0.5, %v7914_v40  ;;  %v3033_v26 = vand.u32 2147483647, %v7914_v40  ;;  %v7930_v5 = vpop.f32.mrb[94].mxu0  ;;  %v3014_v50 = vmul.f32 %v5635_v19, %v3013_v46 }
 0x379   :  { %4174 = vmatprep.mubr.msk.f32.mxu1 %vm2298_vm12, %v9167_v25  ;;  %v3018_v34 = vadd.f32 1.0, %v7920_v47  ;;  %v3021_v17 = vmul.f32 -0.5, %v7920_v47  ;;  %v7938_v14 = vpop.f32.mrb[95].mxu0  ;;  %v3024_v52 = vand.u32 2147483647, %v7920_v47  ;;  %vm9184_vm8 = vcmp.eq.s32.totalorder %v9179_v45, %v7471_v43 }
 0x37a   :  { %5652 = vlog2.f32 %v3027_v31  ;;  %vm2856_vm9 = vcmp.gt.f32.partialorder %v7820_v27, 14.0  ;;  %v3005_v13 = vmul.f32 %v5637_v0, %v3004_v55  ;;  %v3031_v59 = vadd.f32 1.0, %v3030_v8 }
 0x37b   :  { %v7945_v54 = vpop.eup %5642  ;;  %5654 = vlog2.f32 %v3018_v34  ;;  %vm7958_vm10 = vcmp.lt.f32.partialorder %v3033_v26, 0.0004427343  ;;  %vm9188_vm11 = vcmp.eq.s32.totalorder %v9187_v57, %v9170_v20  ;;  %v3022_v3 = vadd.f32 1.0, %v3021_v17 }
 0x37c   :  { %v5645_v32 = vpop.eup %5644  ;;  %4175 = vmatmul.mubr.msk.f32.gmra.mrb[76].mxu1 %vm9184_vm8, %v9167_v25  ;;  %v3045_v19 = vadd.f32 1.0, %v7945_v54  ;;  %v7963_v60 = vpop.f32.mrb[96].mxu0  ;;  %5656 = vpow2.f32 %v2930_v42  ;;  %v2934_v46 = vmul.f32 1.442695, %v2894_v49  ;;  %vm7971_vm12 = vcmp.lt.f32.partialorder %v3024_v52, 0.0004427343 }
 0x37d   :  { %v5647_v53 = vpop.eup %5646  ;;  %4176 = vmatprep.mubr.msk.f32.mxu1 %vm9188_vm11, %v9167_v25  ;;  %v2993_v30 = vmul.f32 0.6931472, %v5645_v32  ;;  %v7969_v0 = vpop.f32.mrb[97].mxu0  ;;  %v3048_v31 = vmul.f32 -0.5, %v7945_v54  ;;  %vm2859_vm8 = vcmp.gt.f32.partialorder %v7835_v37, 14.0  ;;  %v7981_v42 = vadd.f32 %v7883_v2, %v7782_v1  ;;  %v9192_v52 = vld [vmem:[#allocation47_spill] sm:$0xff] }
 0x37e   :  { %v2984_v56 = vmul.f32 0.6931472, %v5647_v53  ;;  %5658 = vlog2.f32 %v3045_v19  ;;  %v7985_v26 = vadd.f32 %v7782_v1, %v7888_v21  ;;  %vm9191_vm11 = vcmp.eq.s32.totalorder %v9187_v57, %v7471_v43 }
 0x37f   :  { %v2999_v8 = vsel %vm7903_vm1, %v2996_v61, %v2993_v30  ;;  %5660 = vpow2.f32 %v2936_v41  ;;  %v3051_v61 = vand.u32 2147483647, %v7945_v54  ;;  %vm9193_vm1 = vcmp.eq.s32.totalorder %v9192_v52, %v9170_v20 }
 0x380   :  { %v5649_v45 = vpop.eup %5648  ;;  %4177 = vmatmul.mubr.msk.f32.gmra.mrb[78].mxu1 %vm9191_vm11, %v9167_v25  ;;  %v3271_v34 = vmul.f32 2.0, %v2999_v8  ;;  %v2990_v51 = vsel %vm7909_vm2, %v2987_v44, %v2984_v56  ;;  %5662 = vpow2.f32 %v2934_v46  ;;  %v7994_v17 = vpop.f32.mrb[98].mxu0  ;;  %v8001_v49 = vmul.f32 0.5, %v7981_v42 }
 0x381   :  { %v5651_v2 = vpop.eup %5650  ;;  %4178 = vmatprep.mubr.msk.f32.mxu1 %vm9193_vm1, %v9167_v25  ;;  %v3270_v21 = vmul.f32 2.0, %v2990_v51  ;;  %v3011_v41 = vmul.f32 0.6931472, %v5649_v45  ;;  %v8004_v32 = vmul.f32 0.5, %v7985_v26  ;;  %v8006_v33 = vpop.f32.mrb[99].mxu0  ;;  %v3032_v53 = vmul.f32 %v7914_v40, %v3031_v59 }
 0x382   :  { %v3303_v44 = vsel %vm2855_vm3, %v7790_v38, %v3271_v34  ;;  %v3002_v19 = vmul.f32 0.6931472, %v5651_v2  ;;  %v3023_v57 = vmul.f32 %v7920_v47, %v3022_v3  ;;  %v3049_v56 = vadd.f32 1.0, %v3048_v31 }
 0x383   :  { %3335 = vst [vmem:[#allocation20 + $0x8] sm:$0xff] %v3303_v44  ;;  %v3302_v30 = vsel %vm2854_vm4, %v7793_v23, %v3270_v21  ;;  %v3017_v46 = vsel %vm7940_vm5, %v3014_v50, %v3011_v41  ;;  %v2897_v8 = vmin.f32 %v8001_v49, 14.0  ;;  %vm9194_vm2 = vcmp.eq.s32.totalorder %v9192_v52, %v7471_v43 }
 0x384   :  { %v5653_v45 = vpop.eup %5652  ;;  %4179 = vmatmul.mubr.msk.f32.gmra.mrb[80].mxu1 %vm9194_vm2, %v9167_v25  ;;  %3334 = vst [vmem:[#allocation20] sm:$0xff] %v3302_v30  ;;  %v3273_v38 = vmul.f32 2.0, %v3017_v46  ;;  %v3008_v62 = vsel %vm7948_vm7, %v3005_v13, %v3002_v19  ;;  %vm8025_vm3 = vcmp.lt.f32.partialorder %v3051_v61, 0.0004427343  ;;  %v2896_v23 = vmin.f32 %v8004_v32, 14.0  ;;  %v8030_v40 = vpop.f32.mrb[100].mxu0 }
 0x385   :  { %v5655_v47 = vpop.eup %5654  ;;  %vm9198_vm4 = vcmp.eq.s32.totalorder %v9197_v15, %v9170_v20  ;;  %v3272_v50 = vmul.f32 2.0, %v3008_v62  ;;  %v3029_v59 = vmul.f32 0.6931472, %v5653_v45  ;;  %vm2858_vm5 = vcmp.gt.f32.partialorder %v7842_v9, 14.0  ;;  %v8044_v51 = vpop.f32.mrb[101].mxu0 }
 0x386   :  { %4180 = vmatprep.mubr.msk.f32.mxu1 %vm9198_vm4, %v9167_v25  ;;  %v2940_v58 = vmul.f32 1.442695, %v2897_v8  ;;  %v3305_v13 = vsel %vm2857_vm6, %v7806_v10, %v3273_v38  ;;  %v3020_v3 = vmul.f32 0.6931472, %v5655_v47  ;;  %v2938_v31 = vmul.f32 1.442695, %v2896_v23  ;;  %v5657_v61 = vpop.eup %5656 }
 0x387   :  { %v8042_v34 = vadd.f32 %v7897_v16, %v7782_v1  ;;  %3337 = vst [vmem:[#allocation20 + $0x18] sm:$0xff] %v3305_v13  ;;  %v3304_v2 = vsel %vm2856_vm9, %v7810_v48, %v3272_v50  ;;  %v3035_v52 = vsel %vm7958_vm10, %v3032_v53, %v3029_v59  ;;  %v3050_v63 = vmul.f32 %v7945_v54, %v3049_v56  ;;  %v9200_v54 = vld [vmem:[#allocation40_spill] sm:$0xff] }
 0x388   :  { %5664 = vpow2.f32 %v2940_v58  ;;  %v5659_v10 = vpop.eup %5658  ;;  %vm9199_vm6 = vcmp.eq.s32.totalorder %v9197_v15, %v7471_v43  ;;  %3336 = vst [vmem:[#allocation20 + $0x10] sm:$0xff] %v3304_v2  ;;  %v3275_v16 = vmul.f32 2.0, %v3035_v52  ;;  %v3026_v21 = vsel %vm7971_vm12, %v3023_v57, %v3020_v3  ;;  %v8074_v30 = vpop.f32.mrb[102].mxu0  ;;  %v9206_v2 = vld [vmem:[#allocation43_spill] sm:$0xff] }
 0x389   :  { %4181 = vmatmul.mubr.msk.f32.gmra.mrb[82].mxu1 %vm9199_vm6, %v9167_v25  ;;  %v3036_v41 = vadd.f32 1.0, %v5657_v61  ;;  %v8060_v48 = vadd.f32 %v7782_v1, %v7907_v35  ;;  %v5661_v27 = vpop.eup %5660  ;;  %vm9201_vm7 = vcmp.eq.s32.totalorder %v9200_v54, %v9170_v20  ;;  %v3274_v12 = vmul.f32 2.0, %v3026_v21  ;;  %v8082_v37 = vpop.f32.mrb[103].mxu0 }
 0x38a   :  { %4182 = vmatprep.mubr.msk.f32.mxu1 %vm9201_vm7, %v9167_v25  ;;  %v3047_v44 = vmul.f32 0.6931472, %v5659_v10  ;;  %v3039_v19 = vmul.f32 -0.5, %v5657_v61  ;;  %5666 = vpow2.f32 %v2938_v31  ;;  %v8066_v53 = vpop.eup %5662  ;;  %v3307_v55 = vsel %vm2859_vm8, %v7828_v4, %v3275_v16 }
 0x38b   :  { %5668 = vlog2.f32 %v3036_v41  ;;  %v3063_v57 = vadd.f32 1.0, %v5661_v27  ;;  %v8072_v35 = vmul.f32 0.5, %v8042_v34  ;;  %3339 = vst [vmem:[#allocation20 + $0x28] sm:$0xff] %v3307_v55  ;;  %v3306_v46 = vsel %vm2858_vm5, %v7832_v6, %v3274_v12  ;;  %v9203_v6 = vld [vmem:[#allocation55_spill] sm:$0xff] }
 0x38c   :  { %vm2861_vm9 = vcmp.gt.f32.partialorder %v7857_v36, 14.0  ;;  %v3053_v56 = vsel %vm8025_vm3, %v3050_v63, %v3047_v44  ;;  %v3066_v8 = vmul.f32 -0.5, %v5661_v27  ;;  %vm9202_vm10 = vcmp.eq.s32.totalorder %v9200_v54, %v7471_v43  ;;  %3338 = vst [vmem:[#allocation20 + $0x20] sm:$0xff] %v3306_v46  ;;  %v9212_v46 = vld [vmem:[#allocation44_spill] sm:$0xff] }
 0x38d   :  { %4183 = vmatmul.mubr.msk.f32.gmra.mrb[84].mxu1 %vm9202_vm10, %v9167_v25  ;;  %v3277_v4 = vmul.f32 2.0, %v3053_v56  ;;  %5670 = vlog2.f32 %v3063_v57  ;;  %v8089_v45 = vmul.f32 0.5, %v8060_v48  ;;  %vm9204_vm12 = vcmp.eq.s32.totalorder %v9203_v6, %v9170_v20 }
 0x38e   :  { %4184 = vmatprep.mubr.msk.f32.mxu1 %vm9204_vm12, %v9167_v25  ;;  %v3040_v9 = vadd.f32 1.0, %v3039_v19  ;;  %v3042_v36 = vand.u32 2147483647, %v5657_v61  ;;  %v3054_v38 = vadd.f32 1.0, %v8066_v53  ;;  %v3057_v39 = vmul.f32 -0.5, %v8066_v53 }
 0x38f   :  { %v3309_v62 = vsel %vm2861_vm9, %v7850_v22, %v3277_v4  ;;  %v2899_v23 = vmin.f32 %v8072_v35, 14.0  ;;  %vm2860_vm8 = vcmp.gt.f32.partialorder %v7864_v11, 14.0  ;;  %v3067_v47 = vadd.f32 1.0, %v3066_v8  ;;  %v8100_v50 = vpop.f32.mrb[104].mxu0 }
 0x390   :  { %3341 = vst [vmem:[#allocation20 + $0x38] sm:$0xff] %v3309_v62  ;;  %v3069_v15 = vand.u32 2147483647, %v5661_v27  ;;  %5672 = vlog2.f32 %v3054_v38  ;;  %vm9205_vm11 = vcmp.eq.s32.totalorder %v9203_v6, %v7471_v43  ;;  %v2898_v22 = vmin.f32 %v8089_v45, 14.0  ;;  %v8115_v3 = vpop.f32.mrb[105].mxu0 }
 0x391   :  { %4185 = vmatmul.mubr.msk.f32.gmra.mrb[86].mxu1 %vm9205_vm11, %v9167_v25  ;;  %v2944_v59 = vmul.f32 1.442695, %v2899_v23  ;;  %v8109_v58 = vadd.f32 %v7930_v5, %v7782_v1  ;;  %v8113_v13 = vadd.f32 %v7782_v1, %v7938_v14  ;;  %v3041_v52 = vmul.f32 %v5657_v61, %v3040_v9 }
 0x392   :  { %v8117_v31 = vpop.eup %5664  ;;  %4186 = vmatprep.mubr.msk.f32.mxu1 %vm2310_vm13, %v9167_v25  ;;  %vm8123_vm1 = vcmp.lt.f32.partialorder %v3042_v36, 0.0004427343  ;;  %vm2863_vm2 = vcmp.gt.f32.partialorder %v7886_v29, 14.0  ;;  %v8130_v5 = vadd.f32 %v7963_v60, %v7782_v1  ;;  %v3058_v14 = vadd.f32 1.0, %v3057_v39 }
 0x393   :  { %v3060_v10 = vand.u32 2147483647, %v8066_v53  ;;  %v3081_v16 = vadd.f32 1.0, %v8117_v31  ;;  %5674 = vpow2.f32 %v2944_v59  ;;  %v3068_v41 = vmul.f32 %v5661_v27, %v3067_v47 }
 0x394   :  { %v8134_v21 = vpop.eup %5666  ;;  %vm8136_vm13 = vcmp.lt.f32.partialorder %v3069_v15, 0.0004427343  ;;  %v2942_v54 = vmul.f32 1.442695, %v2898_v22  ;;  %v8141_v12 = vmul.f32 0.5, %v8109_v58  ;;  %v8143_v44 = vpop.f32.mrb[106].mxu0  ;;  %vm9211_vm3 = vcmp.eq.s32.totalorder %v9206_v2, %v7471_v43 }
 0x395   :  { %v5669_v60 = vpop.eup %5668  ;;  %4187 = vmatmul.mubr.msk.f32.gmra.mrb[88].mxu1 %vm9211_vm3, %v9167_v25  ;;  %5676 = vlog2.f32 %v3081_v16  ;;  %v3084_v19 = vmul.f32 -0.5, %v8117_v31  ;;  %v3072_v27 = vadd.f32 1.0, %v8134_v21  ;;  %v8152_v55 = vmul.f32 0.5, %v8113_v13  ;;  %v8154_v57 = vpop.f32.mrb[107].mxu0 }
 0x396   :  { %vm9213_vm4 = vcmp.eq.s32.totalorder %v9212_v46, %v9170_v20  ;;  %v3038_v56 = vmul.f32 0.6931472, %v5669_v60  ;;  %v3075_v8 = vmul.f32 -0.5, %v8134_v21  ;;  %5678 = vpow2.f32 %v2942_v54 }
 0x397   :  { %4188 = vmatprep.mubr.msk.f32.mxu1 %vm9213_vm4, %v9167_v25  ;;  %v8162_v4 = vmul.f32 0.5, %v8130_v5  ;;  %v5671_v6 = vpop.eup %5670  ;;  %v3059_v9 = vmul.f32 %v8066_v53, %v3058_v14  ;;  %vm8165_vm5 = vcmp.lt.f32.partialorder %v3060_v10, 0.0004427343  ;;  %5680 = vlog2.f32 %v3072_v27  ;;  %v9217_v14 = vld [vmem:[#allocation59_spill] sm:$0xff] }
 0x398   :  { %v2901_v38 = vmin.f32 %v8141_v12, 14.0  ;;  %v3044_v62 = vsel %vm8123_vm1, %v3041_v52, %v3038_v56  ;;  %v3065_v39 = vmul.f32 0.6931472, %v5671_v6  ;;  %v3087_v23 = vand.u32 2147483647, %v8117_v31  ;;  %v8177_v15 = vpop.f32.mrb[108].mxu0 }
 0x399   :  { %v8175_v47 = vadd.f32 %v7782_v1, %v7969_v0  ;;  %vm9216_vm6 = vcmp.eq.s32.totalorder %v9212_v46, %v7471_v43  ;;  %v3276_v53 = vmul.f32 2.0, %v3044_v62  ;;  %v3085_v59 = vadd.f32 1.0, %v3084_v19  ;;  %v8184_v52 = vpop.f32.mrb[109].mxu0 }
 0x39a   :  { %4189 = vmatmul.mubr.msk.f32.gmra.mrb[90].mxu1 %vm9216_vm6, %v9167_v25  ;;  %v2948_v22 = vmul.f32 1.442695, %v2901_v38  ;;  %v2900_v2 = vmin.f32 %v8152_v55, 14.0  ;;  %v5673_v63 = vpop.eup %5672  ;;  %vm9218_vm7 = vcmp.eq.s32.totalorder %v9217_v14, %v9170_v20  ;;  %v3071_v0 = vsel %vm8136_vm13, %v3068_v41, %v3065_v39 }
 0x39b   :  { %4190 = vmatprep.mubr.msk.f32.mxu1 %vm9218_vm7, %v9167_v25  ;;  %v3076_v10 = vadd.f32 1.0, %v3075_v8  ;;  %v2903_v16 = vmin.f32 %v8162_v4, 14.0  ;;  %v8195_v54 = vadd.f32 %v7994_v17, %v7782_v1  ;;  %v3308_v60 = vsel %vm2860_vm8, %v7854_v28, %v3276_v53 }
 0x39c   :  { %v3279_v19 = vmul.f32 2.0, %v3071_v0  ;;  %v3056_v27 = vmul.f32 0.6931472, %v5673_v63  ;;  %5682 = vpow2.f32 %v2948_v22  ;;  %3340 = vst [vmem:[#allocation20 + $0x30] sm:$0xff] %v3308_v60  ;;  %vm2862_vm9 = vcmp.gt.f32.partialorder %v7918_v7, 14.0  ;;  %v8221_v6 = vpop.f32.mrb[110].mxu0 }
 0x39d   :  { %vm8201_vm10 = vcmp.lt.f32.partialorder %v3087_v23, 0.0004427343  ;;  %v2946_v41 = vmul.f32 1.442695, %v2900_v2  ;;  %v8206_v46 = vmul.f32 0.5, %v8175_v47  ;;  %v8208_v17 = vpop.eup %5674  ;;  %v3086_v56 = vmul.f32 %v8117_v31, %v3085_v59  ;;  %v8229_v36 = vpop.f32.mrb[111].mxu0 }
 0x39e   :  { %4191 = vmatmul.mubr.msk.f32.gmra.mrb[92].mxu1 %vm2313_vm14, %v9167_v25  ;;  %v3311_v28 = vsel %vm2863_vm2, %v7872_v24, %v3279_v19  ;;  %v3062_v11 = vsel %vm8165_vm5, %v3059_v9, %v3056_v27  ;;  %v3078_v8 = vand.u32 2147483647, %v8134_v21  ;;  %v3077_v39 = vmul.f32 %v8134_v21, %v3076_v10 }
 0x39f   :  { %4192 = vmatprep.mubr.msk.f32.mxu1 %vm2316_vm15, %v9167_v25  ;;  %3343 = vst [vmem:[#allocation20 + $0x48] sm:$0xff] %v3311_v28  ;;  %v3278_v62 = vmul.f32 2.0, %v3062_v11  ;;  %v3099_v24 = vadd.f32 1.0, %v8208_v17  ;;  %v2952_v29 = vmul.f32 1.442695, %v2903_v16  ;;  %v5677_v9 = vpop.eup %5676  ;;  %v3102_v31 = vmul.f32 -0.5, %v8208_v17 }
 0x3a0   :  { %5684 = vpow2.f32 %v2946_v41  ;;  %v8233_v23 = vmul.f32 0.5, %v8195_v54  ;;  %v8237_v20 = vadd.f32 %v7782_v1, %v8006_v33  ;;  %v8239_v53 = vpop.eup %5678  ;;  %v3083_v59 = vmul.f32 0.6931472, %v5677_v9 }
 0x3a1   :  { %v3310_v21 = vsel %vm2862_vm9, %v7891_v18, %v3278_v62  ;;  %5686 = vlog2.f32 %v3099_v24  ;;  %v2902_v22 = vmin.f32 %v8206_v46, 14.0  ;;  %v5681_v2 = vpop.eup %5680  ;;  %vm2865_vm14 = vcmp.gt.f32.partialorder %v8001_v49, 14.0 }
 0x3a2   :  { %4193 = vmatmul.mubr.msk.f32.gmra.mrb[94].mxu1 %vm2315_vm0, %v9167_v25  ;;  %3342 = vst [vmem:[#allocation20 + $0x40] sm:$0xff] %v3310_v21  ;;  %vm8250_vm15 = vcmp.lt.f32.partialorder %v3078_v8, 0.0004427343  ;;  %v3090_v7 = vadd.f32 1.0, %v8239_v53  ;;  %v8257_v18 = vadd.f32 %v8030_v40, %v7782_v1  ;;  %v3089_v63 = vsel %vm8201_vm10, %v3086_v56, %v3083_v59 }
 0x3a3   :  { %vm2864_vm12 = vcmp.gt.f32.partialorder %v8004_v32, 14.0  ;;  %v3074_v43 = vmul.f32 0.6931472, %v5681_v2  ;;  %5688 = vpow2.f32 %v2952_v29  ;;  %v3281_v25 = vmul.f32 2.0, %v3089_v63 }
 0x3a4   :  { %v3103_v14 = vadd.f32 1.0, %v3102_v31  ;;  %5690 = vlog2.f32 %v3090_v7  ;;  %v3093_v0 = vmul.f32 -0.5, %v8239_v53  ;;  %v2950_v16 = vmul.f32 1.442695, %v2902_v22 }
 0x3a5   :  { %v3080_v10 = vsel %vm8250_vm15, %v3077_v39, %v3074_v43  ;;  %v2905_v60 = vmin.f32 %v8233_v23, 14.0  ;;  %v8267_v40 = vmul.f32 0.5, %v8237_v20  ;;  %v3313_v27 = vsel %vm2865_vm14, %v7981_v42, %v3281_v25 }
 0x3a6   :  { %v5683_v19 = vpop.eup %5682  ;;  %v3280_v61 = vmul.f32 2.0, %v3080_v10  ;;  %v8273_v41 = vmul.f32 0.5, %v8257_v18  ;;  %3345 = vst [vmem:[#allocation20 + $0x58] sm:$0xff] %v3313_v27  ;;  %vm2867_vm0 = vcmp.gt.f32.partialorder %v8072_v35, 14.0  ;;  %v3105_v28 = vand.u32 2147483647, %v8208_v17 }
 0x3a7   :  { %v3117_v11 = vadd.f32 1.0, %v5683_v19  ;;  %5692 = vpow2.f32 %v2950_v16  ;;  %v3096_v8 = vand.u32 2147483647, %v8239_v53  ;;  %v2956_v38 = vmul.f32 1.442695, %v2905_v60 }
 0x3a8   :  { %v3312_v56 = vsel %vm2864_vm12, %v7985_v26, %v3280_v61  ;;  %v2904_v42 = vmin.f32 %v8267_v40, 14.0  ;;  %v3104_v49 = vmul.f32 %v8208_v17, %v3103_v14  ;;  %v3094_v62 = vadd.f32 1.0, %v3093_v0 }
 0x3a9   :  { %3344 = vst [vmem:[#allocation20 + $0x50] sm:$0xff] %v3312_v56  ;;  %5694 = vlog2.f32 %v3117_v11  ;;  %v3120_v39 = vmul.f32 -0.5, %v5683_v19  ;;  %v2907_v9 = vmin.f32 %v8273_v41, 14.0  ;;  %v8288_v26 = vadd.f32 %v7782_v1, %v8044_v51 }
 0x3aa   :  { %v8283_v24 = vpop.eup %5684  ;;  %5696 = vpow2.f32 %v2956_v38  ;;  %v2954_v29 = vmul.f32 1.442695, %v2904_v42  ;;  %vm8290_vm8 = vcmp.lt.f32.partialorder %v3105_v28, 0.0004427343  ;;  %vm2866_vm11 = vcmp.gt.f32.partialorder %v8089_v45, 14.0 }
 0x3ab   :  { %v5687_v32 = vpop.eup %5686  ;;  %v3123_v17 = vand.u32 2147483647, %v5683_v19  ;;  %v3108_v21 = vadd.f32 1.0, %v8283_v24  ;;  %v3111_v22 = vmul.f32 -0.5, %v8283_v24  ;;  %v2960_v2 = vmul.f32 1.442695, %v2907_v9 }
 0x3ac   :  { %v3101_v59 = vmul.f32 0.6931472, %v5687_v32  ;;  %5698 = vpow2.f32 %v2954_v29  ;;  %v3095_v7 = vmul.f32 %v8239_v53, %v3094_v62  ;;  %v8299_v51 = vmul.f32 0.5, %v8288_v26 }
 0x3ad   :  { %v5689_v33 = vpop.eup %5688  ;;  %5700 = vlog2.f32 %v3108_v21  ;;  %v8303_v63 = vadd.f32 %v8074_v30, %v7782_v1  ;;  %vm8307_vm1 = vcmp.lt.f32.partialorder %v3096_v8, 0.0004427343  ;;  %v3121_v0 = vadd.f32 1.0, %v3120_v39 }
 0x3ae   :  { %v5691_v43 = vpop.eup %5690  ;;  %v3107_v25 = vsel %vm8290_vm8, %v3104_v49, %v3101_v59  ;;  %v3135_v10 = vadd.f32 1.0, %v5689_v33  ;;  %v3138_v60 = vmul.f32 -0.5, %v5689_v33  ;;  %5702 = vpow2.f32 %v2960_v2 }
 0x3af   :  { %v3283_v16 = vmul.f32 2.0, %v3107_v25  ;;  %v3092_v53 = vmul.f32 0.6931472, %v5691_v43  ;;  %vm2869_vm2 = vcmp.gt.f32.partialorder %v8141_v12, 14.0  ;;  %vm8312_vm13 = vcmp.lt.f32.partialorder %v3123_v17, 0.0004427343 }
 0x3b0   :  { %v3112_v30 = vadd.f32 1.0, %v3111_v22  ;;  %5704 = vlog2.f32 %v3135_v10  ;;  %v2906_v56 = vmin.f32 %v8299_v51, 14.0  ;;  %v8325_v8 = vmul.f32 0.5, %v8303_v63 }
 0x3b1   :  { %v8316_v61 = vpop.eup %5692  ;;  %v3315_v28 = vsel %vm2867_vm0, %v8042_v34, %v3283_v16  ;;  %v3098_v11 = vsel %vm8307_vm1, %v3095_v7, %v3092_v53  ;;  %v3122_v42 = vmul.f32 %v5683_v19, %v3121_v0  ;;  %v3114_v49 = vand.u32 2147483647, %v8283_v24 }
 0x3b2   :  { %3347 = vst [vmem:[#allocation20 + $0x68] sm:$0xff] %v3315_v28  ;;  %v3282_v38 = vmul.f32 2.0, %v3098_v11  ;;  %v3126_v62 = vadd.f32 1.0, %v8316_v61  ;;  %v3139_v29 = vadd.f32 1.0, %v3138_v60  ;;  %v3141_v9 = vand.u32 2147483647, %v5689_v33 }
 0x3b3   :  { %v5695_v39 = vpop.eup %5694  ;;  %v2958_v35 = vmul.f32 1.442695, %v2906_v56  ;;  %v2909_v34 = vmin.f32 %v8325_v8, 14.0  ;;  %v3129_v21 = vmul.f32 -0.5, %v8316_v61  ;;  %vm2868_vm3 = vcmp.gt.f32.partialorder %v8152_v55, 14.0 }
 0x3b4   :  { %v5697_v32 = vpop.eup %5696  ;;  %v3314_v31 = vsel %vm2866_vm11, %v8060_v48, %v3282_v38  ;;  %v3119_v17 = vmul.f32 0.6931472, %v5695_v39  ;;  %5706 = vlog2.f32 %v3126_v62  ;;  %v3113_v19 = vmul.f32 %v8283_v24, %v3112_v30 }
 0x3b5   :  { %3346 = vst [vmem:[#allocation20 + $0x60] sm:$0xff] %v3314_v31  ;;  %vm2871_vm4 = vcmp.gt.f32.partialorder %v8162_v4, 14.0  ;;  %v3153_v59 = vadd.f32 1.0, %v5697_v32  ;;  %v3156_v7 = vmul.f32 -0.5, %v5697_v32  ;;  %5708 = vpow2.f32 %v2958_v35  ;;  %v3386_v31 = vld [vmem:[#allocation16 + $0x8] sm:$0xff] }
 0x3b6   :  { %v8337_v22 = vpop.eup %5698  ;;  %v3125_v2 = vsel %vm8312_vm13, %v3122_v42, %v3119_v17  ;;  %v2964_v48 = vmul.f32 1.442695, %v2909_v34  ;;  %vm8341_vm5 = vcmp.lt.f32.partialorder %v3114_v49, 0.0004427343  ;;  %vm8345_vm6 = vcmp.lt.f32.partialorder %v3141_v9, 0.0004427343 }
 0x3b7   :  { %v5701_v45 = vpop.eup %5700  ;;  %v3285_v43 = vmul.f32 2.0, %v3125_v2  ;;  %5710 = vlog2.f32 %v3153_v59  ;;  %v3140_v0 = vmul.f32 %v5689_v33, %v3139_v29  ;;  %v3130_v10 = vadd.f32 1.0, %v3129_v21 }
 0x3b8   :  { %v3110_v24 = vmul.f32 0.6931472, %v5701_v45  ;;  %v3144_v16 = vadd.f32 1.0, %v8337_v22  ;;  %v8350_v53 = vpop.eup %5702  ;;  %vm2870_vm7 = vcmp.gt.f32.partialorder %v8206_v46, 14.0  ;;  %v3132_v27 = vand.u32 2147483647, %v8316_v61 }
 0x3b9   :  { %v3317_v60 = vsel %vm2869_vm2, %v8109_v58, %v3285_v43  ;;  %5712 = vpow2.f32 %v2964_v48  ;;  %v8359_v30 = vadd.f32 %v7782_v1, %v8082_v37  ;;  %v3157_v11 = vadd.f32 1.0, %v3156_v7 }
 0x3ba   :  { %v5705_v28 = vpop.eup %5704  ;;  %3349 = vst [vmem:[#allocation20 + $0x78] sm:$0xff] %v3317_v60  ;;  %v3116_v33 = vsel %vm8341_vm5, %v3113_v19, %v3110_v24  ;;  %v3159_v56 = vand.u32 2147483647, %v5697_v32  ;;  %5714 = vlog2.f32 %v3144_v16  ;;  %v3147_v58 = vmul.f32 -0.5, %v8337_v22 }
 0x3bb   :  { %v3284_v38 = vmul.f32 2.0, %v3116_v33  ;;  %v3137_v12 = vmul.f32 0.6931472, %v5705_v28  ;;  %v3171_v42 = vadd.f32 1.0, %v8350_v53  ;;  %v3131_v49 = vmul.f32 %v8316_v61, %v3130_v10 }
 0x3bc   :  { %vm2873_vm9 = vcmp.gt.f32.partialorder %v8233_v23, 14.0  ;;  %v3150_v37 = vand.u32 2147483647, %v8337_v22  ;;  %v8369_v62 = vmul.f32 0.5, %v8359_v30  ;;  %v8373_v39 = vadd.f32 %v8100_v50, %v7782_v1 }
 0x3bd   :  { %v3316_v29 = vsel %vm2868_vm3, %v8113_v13, %v3284_v38  ;;  %v3143_v9 = vsel %vm8345_vm6, %v3140_v0, %v3137_v12  ;;  %5716 = vlog2.f32 %v3171_v42  ;;  %v3174_v61 = vmul.f32 -0.5, %v8350_v53 }
 0x3be   :  { %v5707_v35 = vpop.eup %5706  ;;  %3348 = vst [vmem:[#allocation20 + $0x70] sm:$0xff] %v3316_v29  ;;  %v3287_v34 = vmul.f32 2.0, %v3143_v9  ;;  %vm8381_vm10 = vcmp.lt.f32.partialorder %v3132_v27, 0.0004427343  ;;  %vm8385_vm14 = vcmp.lt.f32.partialorder %v3159_v56, 0.0004427343  ;;  %v3158_v17 = vmul.f32 %v5697_v32, %v3157_v11 }
 0x3bf   :  { %v2908_v55 = vmin.f32 %v8369_v62, 14.0  ;;  %v3128_v13 = vmul.f32 0.6931472, %v5707_v35  ;;  %vm2872_vm15 = vcmp.gt.f32.partialorder %v8267_v40, 14.0  ;;  %v3148_v21 = vadd.f32 1.0, %v3147_v58  ;;  %v8394_v59 = vpop.eup %5708 }
 0x3c0   :  { %v8392_v19 = vmul.f32 0.5, %v8373_v39  ;;  %v3319_v2 = vsel %vm2871_vm4, %v8130_v5, %v3287_v34  ;;  %vm8399_vm12 = vcmp.lt.f32.partialorder %v3150_v37, 0.0004427343  ;;  %v3177_v48 = vand.u32 2147483647, %v8350_v53  ;;  %v3385_v34 = vld [vmem:[#allocation16] sm:$0xff] }
 0x3c1   :  { %v2962_v45 = vmul.f32 1.442695, %v2908_v55  ;;  %v5711_v32 = vpop.eup %5710  ;;  %3351 = vst [vmem:[#allocation20 + $0x88] sm:$0xff] %v3319_v2  ;;  %v3134_v43 = vsel %vm8381_vm10, %v3131_v49, %v3128_v13  ;;  %v3175_v25 = vadd.f32 1.0, %v3174_v61  ;;  %v3162_v14 = vadd.f32 1.0, %v8394_v59 }
 0x3c2   :  { %v3165_v24 = vmul.f32 -0.5, %v8394_v59  ;;  %v3286_v0 = vmul.f32 2.0, %v3134_v43  ;;  %v3155_v4 = vmul.f32 0.6931472, %v5711_v32  ;;  %vm2875_vm0 = vcmp.gt.f32.partialorder %v8273_v41, 14.0 }
 0x3c3   :  { %5718 = vpow2.f32 %v2962_v45  ;;  %v8411_v5 = vadd.f32 %v7782_v1, %v8115_v3  ;;  %v8413_v10 = vpop.eup %5712  ;;  %v3149_v16 = vmul.f32 %v8337_v22, %v3148_v21  ;;  %v2911_v60 = vmin.f32 %v8392_v19, 14.0 }
 0x3c4   :  { %5720 = vlog2.f32 %v3162_v14  ;;  %v8419_v27 = vadd.f32 %v8143_v44, %v7782_v1  ;;  %v5715_v28 = vpop.eup %5714  ;;  %v3318_v33 = vsel %vm2870_vm7, %v8175_v47, %v3286_v0  ;;  %v3161_v3 = vsel %vm8385_vm14, %v3158_v17, %v3155_v4  ;;  %v8464_v17 = vld [vmem:[%s8931_s14] ss:$0 sm:$0xff]  ;;  %v3387_v0 = vld [vmem:[#allocation16 + $0x10] sm:$0xff]  ;;  %v3388_v4 = vld [vmem:[#allocation16 + $0x18] sm:$0xff] }
 0x3c5   :  { %vm8426_vm8 = vcmp.lt.f32.partialorder %v3177_v48, 0.0004427343  ;;  %v3189_v22 = vadd.f32 1.0, %v8413_v10  ;;  %3350 = vst [vmem:[#allocation20 + $0x80] sm:$0xff] %v3318_v33  ;;  %v3289_v56 = vmul.f32 2.0, %v3161_v3  ;;  %v3176_v44 = vmul.f32 %v8350_v53, %v3175_v25 }
 0x3c6   :  { %v3146_v38 = vmul.f32 0.6931472, %v5715_v28  ;;  %v3166_v12 = vadd.f32 1.0, %v3165_v24  ;;  %v2968_v58 = vmul.f32 1.442695, %v2911_v60  ;;  %v8433_v46 = vmul.f32 0.5, %v8411_v5 }
 0x3c7   :  { %5722 = vlog2.f32 %v3189_v22  ;;  %v8437_v47 = vadd.f32 %v7782_v1, %v8154_v57  ;;  %v5717_v42 = vpop.eup %5716  ;;  %v3321_v49 = vsel %vm2873_vm9, %v8195_v54, %v3289_v56  ;;  %v3192_v53 = vmul.f32 -0.5, %v8413_v10 }
 0x3c8   :  { %v3152_v37 = vsel %vm8399_vm12, %v3149_v16, %v3146_v38  ;;  %v8446_v29 = vmul.f32 0.5, %v8419_v27  ;;  %3353 = vst [vmem:[#allocation20 + $0x98] sm:$0xff] %v3321_v49  ;;  %v3173_v61 = vmul.f32 0.6931472, %v5717_v42  ;;  %v3168_v35 = vand.u32 2147483647, %v8394_v59 }
 0x3c9   :  { %v3288_v9 = vmul.f32 2.0, %v3152_v37  ;;  %5724 = vpow2.f32 %v2968_v58  ;;  %v3167_v1 = vmul.f32 %v8394_v59, %v3166_v12  ;;  %v3195_v57 = vand.u32 2147483647, %v8413_v10 }
 0x3ca   :  { %v2910_v54 = vmin.f32 %v8433_v46, 14.0  ;;  %v2913_v23 = vmin.f32 %v8446_v29, 14.0  ;;  %v3179_v55 = vsel %vm8426_vm8, %v3176_v44, %v3173_v61  ;;  %v8459_v13 = vmul.f32 0.5, %v8437_v47 }
 0x3cb   :  { %v3320_v50 = vsel %vm2872_vm15, %v8237_v20, %v3288_v9  ;;  %v8468_v21 = vadd.f32 %v8464_v17, %v8177_v15  ;;  %v3291_v59 = vmul.f32 2.0, %v3179_v55  ;;  %v3193_v2 = vadd.f32 1.0, %v3192_v53  ;;  %v3389_v53 = vld [vmem:[#allocation16 + $0x20] sm:$0xff]  ;;  %v3390_v9 = vld [vmem:[#allocation16 + $0x28] sm:$0xff] }
 0x3cc   :  { %3352 = vst [vmem:[#allocation20 + $0x90] sm:$0xff] %v3320_v50  ;;  %v2966_v40 = vmul.f32 1.442695, %v2910_v54  ;;  %v2972_v20 = vmul.f32 1.442695, %v2913_v23  ;;  %v2912_v48 = vmin.f32 %v8459_v13, 14.0  ;;  %v8478_v32 = vadd.f32 %v8464_v17, %v8184_v52 }
 0x3cd   :  { %v8470_v7 = vpop.eup %5718  ;;  %v8474_v45 = vmul.f32 0.5, %v8468_v21  ;;  %v5405_v43 = vpack.c.bf16 %v3386_v31, %v3385_v34  ;;  %v3323_v15 = vsel %vm2875_vm0, %v8257_v18, %v3291_v59  ;;  %vm2874_vm11 = vcmp.gt.f32.partialorder %v8299_v51, 14.0  ;;  %v3392_v51 = vld [vmem:[#allocation16 + $0x38] sm:$0xff]  ;;  %v3393_v50 = vld [vmem:[#allocation16 + $0x40] sm:$0xff] }
 0x3ce   :  { %v5721_v25 = vpop.eup %5720  ;;  %vm8484_vm1 = vcmp.lt.f32.partialorder %v3168_v35, 0.0004427343  ;;  %v3180_v24 = vadd.f32 1.0, %v8470_v7  ;;  %3355 = vst [vmem:[#allocation20 + $0xa8] sm:$0xff] %v3323_v15  ;;  %vm8489_vm2 = vcmp.lt.f32.partialorder %v3195_v57, 0.0004427343  ;;  %5726 = vpow2.f32 %v2966_v40 }
 0x3cf   :  { %v3164_v16 = vmul.f32 0.6931472, %v5721_v25  ;;  %v2970_v60 = vmul.f32 1.442695, %v2912_v48  ;;  %5406 = vmatprep.subr.bf16.mxu1 %v5405_v43  ;;  %v3194_v18 = vmul.f32 %v8413_v10, %v3193_v2  ;;  %v3183_v41 = vmul.f32 -0.5, %v8470_v7 }
 0x3d0   :  { %5728 = vlog2.f32 %v3180_v24  ;;  %v2915_v28 = vmin.f32 %v8474_v45, 14.0  ;;  %5408 = vmatpush3.bf16.msra.mxu1 %v5405_v43  ;;  %v8499_v11 = vmul.f32 0.5, %v8478_v32  ;;  %v5409_v22 = vpack.c.bf16 %v3388_v4, %v3387_v0  ;;  %v3395_v24 = vld [vmem:[#allocation16 + $0x50] sm:$0xff]  ;;  %v3396_v0 = vld [vmem:[#allocation16 + $0x58] sm:$0xff] }
 0x3d1   :  { %v5723_v33 = vpop.eup %5722  ;;  %v3170_v3 = vsel %vm8484_vm1, %v3167_v1, %v3164_v16  ;;  %5730 = vpow2.f32 %v2972_v20  ;;  %vm2877_vm13 = vcmp.gt.f32.partialorder %v8325_v8, 14.0  ;;  %v3184_v49 = vadd.f32 1.0, %v3183_v41 }
 0x3d2   :  { %v3290_v56 = vmul.f32 2.0, %v3170_v3  ;;  %v3191_v38 = vmul.f32 0.6931472, %v5723_v33  ;;  %5732 = vpow2.f32 %v2970_v60  ;;  %v2976_v10 = vmul.f32 1.442695, %v2915_v28  ;;  %5410 = vmatprep.subr.bf16.mxu1 %v5409_v22 }
 0x3d3   :  { %v5725_v44 = vpop.eup %5724  ;;  %v2914_v12 = vmin.f32 %v8499_v11, 14.0  ;;  %v8510_v1 = vadd.f32 %v8464_v17, %v8221_v6  ;;  %v3186_v57 = vand.u32 2147483647, %v8470_v7  ;;  %v5413_v34 = vpack.c.bf16 %v3390_v9, %v3389_v53  ;;  %v3394_v6 = vld [vmem:[#allocation16 + $0x48] sm:$0xff] }
 0x3d4   :  { %v3322_v58 = vsel %vm2874_vm11, %v8288_v26, %v3290_v56  ;;  %v3197_v42 = vsel %vm8489_vm2, %v3194_v18, %v3191_v38  ;;  %v3207_v37 = vadd.f32 1.0, %v5725_v44  ;;  %5412 = vmatpush3.bf16.msra.mxu1 %v5409_v22  ;;  %5734 = vpow2.f32 %v2976_v10  ;;  %v3391_v26 = vld [vmem:[#allocation16 + $0x30] sm:$0xff]  ;;  %v3397_v56 = vld [vmem:[#allocation16 + $0x60] sm:$0xff]  ;;  %v3398_v38 = vld [vmem:[#allocation16 + $0x68] sm:$0xff] }
 0x3d5   :  { %3354 = vst [vmem:[#allocation20 + $0xa0] sm:$0xff] %v3322_v58  ;;  %v3293_v61 = vmul.f32 2.0, %v3197_v42  ;;  %v2974_v35 = vmul.f32 1.442695, %v2914_v12  ;;  %v3210_v23 = vmul.f32 -0.5, %v5725_v44  ;;  %v8518_v31 = vadd.f32 %v8464_v17, %v8229_v36  ;;  %5414 = vmatprep.subr.bf16.mxu1 %v5413_v34 }
 0x3d6   :  { %5736 = vlog2.f32 %v3207_v37  ;;  %v3185_v59 = vmul.f32 %v8470_v7, %v3184_v49  ;;  %v8524_v2 = vmul.f32 0.5, %v8510_v1  ;;  %v5417_v8 = vpack.c.bf16 %v3392_v51, %v3391_v26 }
 0x3d7   :  { %v3325_v54 = vsel %vm2877_vm13, %v8303_v63, %v3293_v61  ;;  %5738 = vpow2.f32 %v2974_v35  ;;  %vm8526_vm3 = vcmp.lt.f32.partialorder %v3186_v57, 0.0004427343  ;;  %v3213_v20 = vand.u32 2147483647, %v5725_v44 }
 0x3d8   :  { %3357 = vst [vmem:[#allocation20 + $0xb8] sm:$0xff] %v3325_v54  ;;  %v8520_v55 = vpop.eup %5726  ;;  %5416 = vmatpush3.bf16.msra.mxu1 %v5413_v34  ;;  %v3211_v43 = vadd.f32 1.0, %v3210_v23  ;;  %v5421_v7 = vpack.c.bf16 %v3394_v6, %v3393_v50  ;;  %vm2876_vm4 = vcmp.gt.f32.partialorder %v8369_v62, 14.0  ;;  %v8538_v14 = vmul.f32 0.5, %v8518_v31  ;;  %v3399_v50 = vld [vmem:[#allocation16 + $0x70] sm:$0xff]  ;;  %v3400_v6 = vld [vmem:[#allocation16 + $0x78] sm:$0xff] }
 0x3d9   :  { %v3198_v36 = vadd.f32 1.0, %v8520_v55  ;;  %5418 = vmatprep.subr.bf16.mxu1 %v5417_v8  ;;  %v3201_v16 = vmul.f32 -0.5, %v8520_v55  ;;  %v2917_v60 = vmin.f32 %v8524_v2, 14.0  ;;  %vm8545_vm5 = vcmp.lt.f32.partialorder %v3213_v20, 0.0004427343 }
 0x3da   :  { %v5729_v63 = vpop.eup %5728  ;;  %v3212_v33 = vmul.f32 %v5725_v44, %v3211_v43  ;;  %v5425_v22 = vpack.c.bf16 %v3396_v0, %v3395_v24  ;;  %v2916_v49 = vmin.f32 %v8538_v14, 14.0  ;;  %vm2879_vm6 = vcmp.gt.f32.partialorder %v8392_v19, 14.0 }
 0x3db   :  { %v8531_v17 = vpop.eup %5730  ;;  %v3182_v48 = vmul.f32 0.6931472, %v5729_v63  ;;  %5740 = vlog2.f32 %v3198_v36  ;;  %v3202_v53 = vadd.f32 1.0, %v3201_v16  ;;  %v2980_v9 = vmul.f32 1.442695, %v2917_v60 }
 0x3dc   :  { %v8533_v25 = vpop.eup %5732  ;;  %v3225_v15 = vadd.f32 1.0, %v8531_v17  ;;  %5420 = vmatpush3.bf16.msra.mxu1 %v5417_v8  ;;  %v3228_v3 = vmul.f32 -0.5, %v8531_v17  ;;  %v3204_v61 = vand.u32 2147483647, %v8520_v55  ;;  %v3231_v26 = vand.u32 2147483647, %v8531_v17 }
 0x3dd   :  { %v3188_v4 = vsel %vm8526_vm3, %v3185_v59, %v3182_v48  ;;  %v3216_v52 = vadd.f32 1.0, %v8533_v25  ;;  %5422 = vmatprep.subr.bf16.mxu1 %v5421_v7  ;;  %v3219_v58 = vmul.f32 -0.5, %v8533_v25  ;;  %v2978_v34 = vmul.f32 1.442695, %v2916_v49 }
 0x3de   :  { %v3292_v18 = vmul.f32 2.0, %v3188_v4  ;;  %5742 = vlog2.f32 %v3225_v15  ;;  %v8549_v28 = vpop.eup %5734  ;;  %v3229_v57 = vadd.f32 1.0, %v3228_v3  ;;  %v3203_v59 = vmul.f32 %v8520_v55, %v3202_v53 }
 0x3df   :  { %5744 = vlog2.f32 %v3216_v52  ;;  %v3243_v42 = vadd.f32 1.0, %v8549_v28  ;;  %v3246_v51 = vmul.f32 -0.5, %v8549_v28  ;;  %v3220_v23 = vadd.f32 1.0, %v3219_v58 }
 0x3e0   :  { %v5737_v10 = vpop.eup %5736  ;;  %v3324_v12 = vsel %vm2876_vm4, %v8359_v30, %v3292_v18  ;;  %5424 = vmatpush3.bf16.msra.mxu1 %v5421_v7  ;;  %v5429_v30 = vpack.c.bf16 %v3398_v38, %v3397_v56  ;;  %v3222_v8 = vand.u32 2147483647, %v8533_v25  ;;  %vm8573_vm7 = vcmp.lt.f32.partialorder %v3204_v61, 0.0004427343 }
 0x3e1   :  { %v8558_v37 = vpop.eup %5738  ;;  %3356 = vst [vmem:[#allocation20 + $0xb0] sm:$0xff] %v3324_v12  ;;  %v3209_v44 = vmul.f32 0.6931472, %v5737_v10  ;;  %5746 = vlog2.f32 %v3243_v42  ;;  %5426 = vmatprep.subr.bf16.mxu1 %v5425_v22  ;;  %v3230_v55 = vmul.f32 %v8531_v17, %v3229_v57  ;;  %v3247_v43 = vadd.f32 1.0, %v3246_v51 }
 0x3e2   :  { %v3234_v62 = vadd.f32 1.0, %v8558_v37  ;;  %v3237_v63 = vmul.f32 -0.5, %v8558_v37  ;;  %v5433_v7 = vpack.c.bf16 %v3400_v6, %v3399_v50  ;;  %vm2878_vm9 = vcmp.gt.f32.partialorder %v8433_v46, 14.0 }
 0x3e3   :  { %v3215_v35 = vsel %vm8545_vm5, %v3212_v33, %v3209_v44  ;;  %vm8579_vm10 = vcmp.lt.f32.partialorder %v3231_v26, 0.0004427343  ;;  %v3249_v19 = vand.u32 2147483647, %v8549_v28  ;;  %vm8587_vm14 = vcmp.lt.f32.partialorder %v3222_v8, 0.0004427343 }
 0x3e4   :  { %v3295_v54 = vmul.f32 2.0, %v3215_v35  ;;  %5748 = vlog2.f32 %v3234_v62  ;;  %5428 = vmatpush3.bf16.msra.mxu1 %v5425_v22  ;;  %v3238_v52 = vadd.f32 1.0, %v3237_v63  ;;  %v3240_v41 = vand.u32 2147483647, %v8558_v37 }
 0x3e5   :  { %5750 = vpow2.f32 %v2980_v9  ;;  %v5741_v40 = vpop.eup %5740  ;;  %5430 = vmatprep.subr.bf16.mxu1 %v5429_v30  ;;  %vm2881_vm15 = vcmp.gt.f32.partialorder %v8446_v29, 14.0  ;;  %vm2880_vm12 = vcmp.gt.f32.partialorder %v8459_v13, 14.0  ;;  %v3248_v33 = vmul.f32 %v8549_v28, %v3247_v43 }
 0x3e6   :  { %v3327_v20 = vsel %vm2879_vm6, %v8373_v39, %v3295_v54  ;;  %5752 = vpow2.f32 %v2978_v34  ;;  %v3200_v48 = vmul.f32 0.6931472, %v5741_v40  ;;  %v3221_v39 = vmul.f32 %v8533_v25, %v3220_v23 }
 0x3e7   :  { %3359 = vst [vmem:[#allocation20 + $0xc8] sm:$0xff] %v3327_v20  ;;  %vm8602_vm0 = vcmp.lt.f32.partialorder %v3249_v19, 0.0004427343  ;;  %v3239_v58 = vmul.f32 %v8558_v37, %v3238_v52  ;;  %vm8608_vm8 = vcmp.lt.f32.partialorder %v3240_v41, 0.0004427343  ;;  %vm2883_vm11 = vcmp.gt.f32.partialorder %v8474_v45, 14.0 }
 0x3e8   :  { %v5743_v15 = vpop.eup %5742  ;;  %v3206_v4 = vsel %vm8573_vm7, %v3203_v59, %v3200_v48  ;;  %5432 = vmatpush3.bf16.msra.mxu1 %v5429_v30  ;;  %vm2882_vm1 = vcmp.gt.f32.partialorder %v8499_v11, 14.0  ;;  %vm2885_vm3 = vcmp.gt.f32.partialorder %v8524_v2, 14.0  ;;  %vm2884_vm4 = vcmp.gt.f32.partialorder %v8538_v14, 14.0 }
 0x3e9   :  { %v5745_v0 = vpop.eup %5744  ;;  %v3227_v16 = vmul.f32 0.6931472, %v5743_v15  ;;  %v3294_v60 = vmul.f32 2.0, %v3206_v4  ;;  %5434 = vmatprep.subr.bf16.mxu1 %v5433_v7 }
 0x3ea   :  { %v3218_v18 = vmul.f32 0.6931472, %v5745_v0 }
 0x3eb   :  { %v3233_v25 = vsel %vm8579_vm10, %v3230_v55, %v3227_v16  ;;  %v5747_v3 = vpop.eup %5746  ;;  %v3326_v22 = vsel %vm2878_vm9, %v8411_v5, %v3294_v60 }
 0x3ec   :  { %v3297_v56 = vmul.f32 2.0, %v3233_v25  ;;  %v3224_v38 = vsel %vm8587_vm14, %v3221_v39, %v3218_v18  ;;  %3358 = vst [vmem:[#allocation20 + $0xc0] sm:$0xff] %v3326_v22  ;;  %v3245_v12 = vmul.f32 0.6931472, %v5747_v3  ;;  %5436 = vmatpush3.bf16.msra.mxu1 %v5433_v7 }
 0x3ed   :  { %v3296_v29 = vmul.f32 2.0, %v3224_v38 }
 0x3ee   :  { %v5749_v28 = vpop.eup %5748  ;;  %v3329_v42 = vsel %vm2881_vm15, %v8419_v27, %v3297_v56  ;;  %v3251_v44 = vsel %vm8602_vm0, %v3248_v33, %v3245_v12 }
 0x3ef   :  { %v5751_v5 = vpop.eup %5750  ;;  %3361 = vst [vmem:[#allocation20 + $0xd8] sm:$0xff] %v3329_v42  ;;  %v3328_v46 = vsel %vm2880_vm12, %v8437_v47, %v3296_v29  ;;  %v3236_v37 = vmul.f32 0.6931472, %v5749_v28  ;;  %v3299_v27 = vmul.f32 2.0, %v3251_v44 }
 0x3f0   :  { %v5753_v53 = vpop.eup %5752  ;;  %3360 = vst [vmem:[#allocation20 + $0xd0] sm:$0xff] %v3328_v46  ;;  %v3261_v9 = vadd.f32 1.0, %v5751_v5  ;;  %v3264_v47 = vmul.f32 -0.5, %v5751_v5  ;;  %v3267_v26 = vand.u32 2147483647, %v5751_v5 }
 0x3f1   :  { %v3242_v61 = vsel %vm8608_vm8, %v3239_v58, %v3236_v37  ;;  %v3252_v62 = vadd.f32 1.0, %v5753_v53  ;;  %v3331_v30 = vsel %vm2883_vm11, %v8468_v21, %v3299_v27  ;;  %v3255_v35 = vmul.f32 -0.5, %v5753_v53 }
 0x3f2   :  { %v3298_v13 = vmul.f32 2.0, %v3242_v61  ;;  %5754 = vlog2.f32 %v3261_v9  ;;  %3363 = vst [vmem:[#allocation20 + $0xe8] sm:$0xff] %v3331_v30  ;;  %v3265_v57 = vadd.f32 1.0, %v3264_v47  ;;  %v3258_v54 = vand.u32 2147483647, %v5753_v53 }
 0x3f3   :  { %5756 = vlog2.f32 %v3252_v62  ;;  %v3256_v51 = vadd.f32 1.0, %v3255_v35  ;;  %vm3268_vm2 = vcmp.lt.f32.partialorder %v3267_v26, 0.0004427343  ;;  %v3826_v26 = vld [vmem:[#allocation18 + $0x8] sm:$0xff] }
 0x3f4   :  { %v3330_v45 = vsel %vm2882_vm1, %v8478_v32, %v3298_v13  ;;  %v3266_v11 = vmul.f32 %v5751_v5, %v3265_v57  ;;  %vm3259_vm13 = vcmp.lt.f32.partialorder %v3258_v54, 0.0004427343  ;;  %v3825_v57 = vld [vmem:[#allocation18] sm:$0xff]  ;;  %v3827_v54 = vld [vmem:[#allocation18 + $0x10] sm:$0xff] }
 0x3f5   :  { %3362 = vst [vmem:[#allocation20 + $0xe0] sm:$0xff] %v3330_v45  ;;  %v3257_v34 = vmul.f32 %v5753_v53, %v3256_v51  ;;  %v5437_v51 = vpack.c.bf16 %v3826_v26, %v3825_v57 }
 0x3f7   :  { %5438 = vmatprep.subr.bf16.mxu0 %v5437_v51  ;;  %5469 = vmatprep.subr.bf16.mxu1 %v5437_v51 }
 0x3f8   :  { %5440 = vmatpush3.bf16.msra.mxu0 %v5437_v51 }
 0x3fc   :  { %v5755_v23 = vpop.eup %5754 }
 0x3fd   :  { %v5757_v50 = vpop.eup %5756  ;;  %v3263_v6 = vmul.f32 0.6931472, %v5755_v23 }
 0x3fe   :  { %v3254_v21 = vmul.f32 0.6931472, %v5757_v50  ;;  %v3830_v50 = vld [vmem:[#allocation18 + $0x28] sm:$0xff] }
 0x3ff   :  { %v3269_v59 = vsel %vm3268_vm2, %v3266_v11, %v3263_v6  ;;  %v3828_v11 = vld [vmem:[#allocation18 + $0x18] sm:$0xff] }
 0x400   :  { %v3301_v8 = vmul.f32 2.0, %v3269_v59  ;;  %v3260_v32 = vsel %vm3259_vm13, %v3257_v34, %v3254_v21  ;;  %v5441_v23 = vpack.c.bf16 %v3828_v11, %v3827_v54  ;;  %v3829_v34 = vld [vmem:[#allocation18 + $0x20] sm:$0xff]  ;;  %v3831_v21 = vld [vmem:[#allocation18 + $0x30] sm:$0xff]  ;;  %v3832_v59 = vld [vmem:[#allocation18 + $0x38] sm:$0xff] }
 0x401   :  { %v3300_v63 = vmul.f32 2.0, %v3260_v32  ;;  %v5445_v6 = vpack.c.bf16 %v3830_v50, %v3829_v34  ;;  %v3833_v32 = vld [vmem:[#allocation18 + $0x40] sm:$0xff] }
 0x402   :  { %v3333_v40 = vsel %vm2885_vm3, %v8510_v1, %v3301_v8  ;;  %5442 = vmatprep.subr.bf16.mxu0 %v5441_v23  ;;  %v5449_v8 = vpack.c.bf16 %v3832_v59, %v3831_v21 }
 0x403   :  { %3365 = vst [vmem:[#allocation20 + $0xf8] sm:$0xff] %v3333_v40  ;;  %v3332_v20 = vsel %vm2884_vm4, %v8518_v31, %v3300_v63  ;;  %5444 = vmatpush3.bf16.msra.mxu0 %v5441_v23  ;;  %v3834_v63 = vld [vmem:[#allocation18 + $0x48] sm:$0xff]  ;;  %v3835_v40 = vld [vmem:[#allocation18 + $0x50] sm:$0xff] }
 0x404   :  { %3364 = vst [vmem:[#allocation20 + $0xf0] sm:$0xff] %v3332_v20  ;;  %5446 = vmatprep.subr.bf16.mxu0 %v5445_v6  ;;  %v5453_v20 = vpack.c.bf16 %v3834_v63, %v3833_v32 }
 0x407   :  { %5448 = vmatpush3.bf16.msra.mxu0 %v5445_v6 }
 0x408   :  { %5450 = vmatprep.subr.bf16.mxu0 %v5449_v8 }
 0x40b   :  { %5452 = vmatpush3.bf16.msra.mxu0 %v5449_v8 }
 0x40c   :  { %5454 = vmatprep.subr.bf16.mxu0 %v5453_v20 }
 0x40f   :  { %5456 = vmatpush3.bf16.msra.mxu0 %v5453_v20 }
 0x437   :  { %v4453_v36 = vpop.f32.mrb[64].mxu1 }
 0x438   :  { %v4454_v48 = vpop.f32.mrb[65].mxu1 }
 0x439   :  { %v4455_v55 = vadd.f32 %v4454_v48, %v4453_v36  ;;  %v3836_v36 = vld [vmem:[#allocation18 + $0x58] sm:$0xff] }
 0x43a   :  { %v5457_v48 = vpack.c.bf16 %v3836_v36, %v3835_v40 }
 0x43b   :  { %v4456_v43 = vpop.f32.mrb[66].mxu1  ;;  %5101 = vmatprep.mubr.f32.mxu1 %v4455_v55  ;;  %v3837_v55 = vld [vmem:[#allocation18 + $0x60] sm:$0xff] }
 0x43c   :  { %v4457_v7 = vpop.f32.mrb[67].mxu1  ;;  %5458 = vmatprep.subr.bf16.mxu0 %v5457_v48 }
 0x43d   :  { %v4458_v15 = vadd.f32 %v4457_v7, %v4456_v43  ;;  %5460 = vmatpush3.bf16.msra.mxu0 %v5457_v48  ;;  %v3838_v43 = vld [vmem:[#allocation18 + $0x68] sm:$0xff] }
 0x43e   :  { %v5461_v7 = vpack.c.bf16 %v3838_v43, %v3837_v55 }
 0x43f   :  { %5102 = vmatmul.mubr.f32.vlgmr.msra.gmra.mrb[96].mxu1 %v4458_v15  ;;  %v4459_v2 = vpop.f32.mrb[68].mxu1  ;;  %v3839_v15 = vld [vmem:[#allocation18 + $0x70] sm:$0xff] }
 0x440   :  { %v4460_v24 = vpop.f32.mrb[69].mxu1  ;;  %5477 = vmatpush3.bf16.msra.mxu1 %v5437_v51  ;;  %5462 = vmatprep.subr.bf16.mxu0 %v5461_v7 }
 0x441   :  { %v4461_v39 = vadd.f32 %v4460_v24, %v4459_v2  ;;  %5470 = vmatprep.subr.bf16.mxu1 %v5441_v23  ;;  %5464 = vmatpush3.bf16.msra.mxu0 %v5461_v7  ;;  %v3840_v2 = vld [vmem:[#allocation18 + $0x78] sm:$0xff] }
 0x442   :  { %v5465_v24 = vpack.c.bf16 %v3840_v2, %v3839_v15 }
 0x443   :  { %v4462_v14 = vpop.f32.mrb[70].mxu1  ;;  %5104 = vmatprep.mubr.f32.mxu1 %v4461_v39  ;;  %v8630_v39 = vld [vmem:[%s8933_s16] ss:$0 sm:$0xff]  ;;  %s6093_s16 = smov [#allocation20]  }
 0x444   :  { %v4463_v19 = vpop.f32.mrb[71].mxu1  ;;  %5478 = vmatpush3.bf16.msra.mxu1 %v5441_v23  ;;  %5466 = vmatprep.subr.bf16.mxu0 %v5465_v24  ;;  %s4042_s11 = sshll.u32 %s6093_s16, 4  ;;  %s4043_s11 = int_to_ptr.vmem [resolvable:$true] %s4042_s11 }
 0x445   :  { %v4464_v0 = vadd.f32 %v4463_v19, %v4462_v14  ;;  %5471 = vmatprep.subr.bf16.mxu1 %v5445_v6  ;;  %5468 = vmatpush3.bf16.msra.mxu0 %v5465_v24  ;;  %s6022_s23 = scalar_lea.vmem %s4043_s11, 4096  ;;  %p6027_p3 = scmp.lt.s32.totalorder %s4043_s11, %s4043_s11 }
 0x446   :  { %p6023_p2 = scmp.ne.s32.totalorder %s4043_s11, %s6022_s23  ;;  %p6028_p4 = scmp.lt.s32.totalorder %s6022_s23, %s6022_s23 }
 0x447   :  { %5105 = vmatmul.mubr.f32.gmra.mrb[98].mxu1 %v4464_v0  ;;  %v4465_v1 = vpop.f32.mrb[72].mxu1 }
 0x448   :  { %v4466_v4 = vpop.f32.mrb[73].mxu1  ;;  %5479 = vmatpush3.bf16.msra.mxu1 %v5445_v6  ;;  %p6029_p5 = por %p6028_p4, %p6027_p3 }
 0x449   :  { %v4467_v31 = vadd.f32 %v4466_v4, %v4465_v1  ;;  %5472 = vmatprep.subr.bf16.mxu1 %v5449_v8 }
 0x44a   :  { %p6030_p6 = pnand %p6029_p5, %p6023_p2 }
 0x44b   :  { %v4468_v16 = vpop.f32.mrb[74].mxu1  ;;  %5107 = vmatprep.mubr.f32.mxu1 %v4467_v31 }
 0x44c   :  { %v4469_v17 = vpop.f32.mrb[75].mxu1  ;;  %5480 = vmatpush3.bf16.msra.mxu1 %v5449_v8 }
 0x44d   :  { %v4470_v52 = vadd.f32 %v4469_v17, %v4468_v16  ;;  %5473 = vmatprep.subr.bf16.mxu1 %v5453_v20 }
 0x44f   :  { %5108 = vmatmul.mubr.f32.gmra.mrb[100].mxu1 %v4470_v52  ;;  %v4471_v60 = vpop.f32.mrb[76].mxu1 }
 0x450   :  { %v4472_v18 = vpop.f32.mrb[77].mxu1  ;;  %5481 = vmatpush3.bf16.msra.mxu1 %v5453_v20 }
 0x451   :  { %v4473_v41 = vadd.f32 %v4472_v18, %v4471_v60  ;;  %5474 = vmatprep.subr.bf16.mxu1 %v5457_v48 }
 0x453   :  { %v4474_v25 = vpop.f32.mrb[78].mxu1  ;;  %5110 = vmatprep.mubr.f32.mxu1 %v4473_v41 }
 0x454   :  { %v4475_v33 = vpop.f32.mrb[79].mxu1  ;;  %5482 = vmatpush3.bf16.msra.mxu1 %v5457_v48 }
 0x455   :  { %v4476_v3 = vadd.f32 %v4475_v33, %v4474_v25  ;;  %5475 = vmatprep.subr.bf16.mxu1 %v5461_v7 }
 0x457   :  { %5111 = vmatmul.mubr.f32.gmra.mrb[102].mxu1 %v4476_v3  ;;  %v4477_v22 = vpop.f32.mrb[80].mxu1 }
 0x458   :  { %v4478_v56 = vpop.f32.mrb[81].mxu1  ;;  %5483 = vmatpush3.bf16.msra.mxu1 %v5461_v7 }
 0x459   :  { %v4479_v38 = vadd.f32 %v4478_v56, %v4477_v22  ;;  %5476 = vmatprep.subr.bf16.mxu1 %v5465_v24 }
 0x45b   :  { %5113 = vmatprep.mubr.f32.mxu1 %v4479_v38 }
 0x45c   :  { %v4480_v10 = vpop.f32.mrb[82].mxu1  ;;  %5484 = vmatpush3.bf16.msra.mxu1 %v5465_v24 }
 0x45d   :  { %v4481_v29 = vpop.f32.mrb[83].mxu1 }
 0x45e   :  { %v4482_v12 = vadd.f32 %v4481_v29, %v4480_v10 }
 0x460   :  { %5114 = vmatmul.mubr.f32.gmra.mrb[104].mxu1 %v4482_v12  ;;  %v4483_v58 = vpop.f32.mrb[84].mxu1 }
 0x461   :  { %v4484_v28 = vpop.f32.mrb[85].mxu1 }
 0x462   :  { %v4485_v42 = vadd.f32 %v4484_v28, %v4483_v58 }
 0x464   :  { %v4486_v49 = vpop.f32.mrb[86].mxu1  ;;  %5116 = vmatprep.mubr.f32.mxu1 %v4485_v42 }
 0x465   :  { %v4487_v5 = vpop.f32.mrb[87].mxu1 }
 0x466   :  { %v4488_v46 = vadd.f32 %v4487_v5, %v4486_v49 }
 0x468   :  { %5117 = vmatmul.mubr.f32.gmra.mrb[106].mxu1 %v4488_v46  ;;  %v4489_v44 = vpop.f32.mrb[88].mxu1 }
 0x469   :  { %v4490_v37 = vpop.f32.mrb[89].mxu1 }
 0x46a   :  { %v4491_v53 = vadd.f32 %v4490_v37, %v4489_v44 }
 0x46c   :  { %5119 = vmatprep.mubr.f32.mxu1 %v4491_v53 }
 0x46d   :  { %v4492_v27 = vpop.f32.mrb[90].mxu1 }
 0x46e   :  { %v4493_v9 = vpop.f32.mrb[91].mxu1 }
 0x46f   :  { %v4494_v61 = vadd.f32 %v4493_v9, %v4492_v27 }
 0x471   :  { %5120 = vmatmul.mubr.f32.gmra.mrb[108].mxu1 %v4494_v61  ;;  %v4495_v62 = vpop.f32.mrb[92].mxu1 }
 0x472   :  { %v4496_v30 = vpop.f32.mrb[93].mxu1 }
 0x473   :  { %v4497_v13 = vadd.f32 %v4496_v30, %v4495_v62 }
 0x475   :  { %v4498_v47 = vpop.f32.mrb[94].mxu1  ;;  %5122 = vmatprep.mubr.f32.mxu1 %v4497_v13 }
 0x476   :  { %v4499_v45 = vpop.f32.mrb[95].mxu1 }
 0x477   :  { %v4500_v35 = vadd.f32 %v4499_v45, %v4498_v47 }
 0x479   :  { %5123 = vmatmul.mubr.f32.gmra.mrb[110].mxu1 %v4500_v35 }
 0x512   :  { %v5103_v14 = vpop.f32.mrb[96].mxu1 }
 0x513   :  { %v8633_v19 = vadd.f32 %v5103_v14, %v8630_v39  ;;  %v3474_v0 = vpop.f32.mrb[97].mxu1 }
 0x514   :  { %v8636_v1 = vadd.f32 %v8630_v39, %v3474_v0 }
 0x515   :  { %v8639_v4 = vmul.f32 0.5, %v8633_v19 }
 0x516   :  { %v8642_v31 = vmul.f32 0.5, %v8636_v1 }
 0x517   :  { %v3586_v16 = vmin.f32 %v8639_v4, 14.0  ;;  %vm3570_vm7 = vcmp.gt.f32.partialorder %v8639_v4, 14.0 }
 0x518   :  { %v3585_v17 = vmin.f32 %v8642_v31, 14.0  ;;  %vm3569_vm9 = vcmp.gt.f32.partialorder %v8642_v31, 14.0 }
 0x519   :  { %v3603_v52 = vmul.f32 1.442695, %v3586_v16 }
 0x51a   :  { %v3601_v60 = vmul.f32 1.442695, %v3585_v17  ;;  %v5106_v18 = vpop.f32.mrb[98].mxu1 }
 0x51b   :  { %5758 = vpow2.f32 %v3603_v52  ;;  %v8647_v41 = vadd.f32 %v5106_v18, %v8630_v39  ;;  %v3484_v25 = vpop.f32.mrb[99].mxu1 }
 0x51c   :  { %5760 = vpow2.f32 %v3601_v60  ;;  %v8650_v33 = vadd.f32 %v8630_v39, %v3484_v25 }
 0x51d   :  { %v8653_v3 = vmul.f32 0.5, %v8647_v41 }
 0x51e   :  { %v8656_v22 = vmul.f32 0.5, %v8650_v33 }
 0x51f   :  { %v3588_v56 = vmin.f32 %v8653_v3, 14.0  ;;  %vm3572_vm12 = vcmp.gt.f32.partialorder %v8653_v3, 14.0 }
 0x520   :  { %v3587_v38 = vmin.f32 %v8656_v22, 14.0  ;;  %vm3571_vm15 = vcmp.gt.f32.partialorder %v8656_v22, 14.0 }
 0x521   :  { %v3607_v10 = vmul.f32 1.442695, %v3588_v56 }
 0x522   :  { %v3605_v29 = vmul.f32 1.442695, %v3587_v38  ;;  %v5109_v12 = vpop.f32.mrb[100].mxu1 }
 0x523   :  { %5762 = vpow2.f32 %v3607_v10  ;;  %v8661_v58 = vadd.f32 %v5109_v12, %v8630_v39  ;;  %v3494_v28 = vpop.f32.mrb[101].mxu1 }
 0x524   :  { %5764 = vpow2.f32 %v3605_v29  ;;  %v8664_v42 = vadd.f32 %v8630_v39, %v3494_v28 }
 0x525   :  { %v5759_v49 = vpop.eup %5758  ;;  %v8667_v5 = vmul.f32 0.5, %v8661_v58 }
 0x526   :  { %v5761_v46 = vpop.eup %5760  ;;  %v3642_v44 = vadd.f32 1.0, %v5759_v49  ;;  %v8670_v37 = vmul.f32 0.5, %v8664_v42  ;;  %v3645_v62 = vmul.f32 -0.5, %v5759_v49  ;;  %v3648_v57 = vand.u32 2147483647, %v5759_v49 }
 0x527   :  { %v3590_v53 = vmin.f32 %v8667_v5, 14.0  ;;  %v3633_v27 = vadd.f32 1.0, %v5761_v46  ;;  %v3636_v35 = vmul.f32 -0.5, %v5761_v46  ;;  %v3639_v50 = vand.u32 2147483647, %v5761_v46 }
 0x528   :  { %5766 = vlog2.f32 %v3642_v44  ;;  %v3589_v9 = vmin.f32 %v8670_v37, 14.0  ;;  %v3646_v23 = vadd.f32 1.0, %v3645_v62  ;;  %vm8690_vm5 = vcmp.lt.f32.partialorder %v3648_v57, 0.0004427343 }
 0x529   :  { %v3611_v61 = vmul.f32 1.442695, %v3590_v53  ;;  %5768 = vlog2.f32 %v3633_v27  ;;  %v3637_v59 = vadd.f32 1.0, %v3636_v35  ;;  %vm8696_vm6 = vcmp.lt.f32.partialorder %v3639_v50, 0.0004427343 }
 0x52a   :  { %v3609_v30 = vmul.f32 1.442695, %v3589_v9  ;;  %v5112_v13 = vpop.f32.mrb[102].mxu1  ;;  %v3647_v55 = vmul.f32 %v5759_v49, %v3646_v23  ;;  %vm3573_vm11 = vcmp.gt.f32.partialorder %v8670_v37, 14.0  ;;  %vm3574_vm2 = vcmp.gt.f32.partialorder %v8667_v5, 14.0 }
 0x52b   :  { %5770 = vpow2.f32 %v3611_v61  ;;  %v8675_v47 = vadd.f32 %v5112_v13, %v8630_v39  ;;  %v3504_v45 = vpop.f32.mrb[103].mxu1  ;;  %v3638_v16 = vmul.f32 %v5761_v46, %v3637_v59 }
 0x52c   :  { %5772 = vpow2.f32 %v3609_v30  ;;  %v8678_v26 = vadd.f32 %v8630_v39, %v3504_v45 }
 0x52d   :  { %v5763_v51 = vpop.eup %5762  ;;  %v8681_v54 = vmul.f32 0.5, %v8675_v47 }
 0x52e   :  { %v8683_v11 = vpop.eup %5764  ;;  %v8686_v34 = vmul.f32 0.5, %v8678_v26  ;;  %v3660_v6 = vadd.f32 1.0, %v5763_v51  ;;  %v3663_v36 = vmul.f32 -0.5, %v5763_v51  ;;  %v3666_v60 = vand.u32 2147483647, %v5763_v51 }
 0x52f   :  { %v3592_v21 = vmin.f32 %v8681_v54, 14.0  ;;  %v3651_v8 = vadd.f32 1.0, %v8683_v11  ;;  %v3654_v20 = vmul.f32 -0.5, %v8683_v11  ;;  %v3657_v61 = vand.u32 2147483647, %v8683_v11 }
 0x530   :  { %v3591_v63 = vmin.f32 %v8686_v34, 14.0  ;;  %5774 = vlog2.f32 %v3660_v6  ;;  %v3664_v10 = vadd.f32 1.0, %v3663_v36  ;;  %vm8727_vm10 = vcmp.lt.f32.partialorder %v3666_v60, 0.0004427343 }
 0x531   :  { %v3615_v40 = vmul.f32 1.442695, %v3592_v21  ;;  %5776 = vlog2.f32 %v3651_v8  ;;  %v3655_v38 = vadd.f32 1.0, %v3654_v20  ;;  %vm3658_vm14 = vcmp.lt.f32.partialorder %v3657_v61, 0.0004427343 }
 0x532   :  { %v5767_v48 = vpop.eup %5766  ;;  %v3613_v43 = vmul.f32 1.442695, %v3591_v63  ;;  %v3665_v45 = vmul.f32 %v5763_v51, %v3664_v10  ;;  %vm3575_vm13 = vcmp.gt.f32.partialorder %v8686_v34, 14.0  ;;  %vm3576_vm4 = vcmp.gt.f32.partialorder %v8681_v54, 14.0 }
 0x533   :  { %v5115_v7 = vpop.f32.mrb[104].mxu1  ;;  %v5769_v2 = vpop.eup %5768  ;;  %v3644_v24 = vmul.f32 0.6931472, %v5767_v48  ;;  %5778 = vpow2.f32 %v3615_v40  ;;  %v3656_v50 = vmul.f32 %v8683_v11, %v3655_v38 }
 0x534   :  { %v8701_v14 = vadd.f32 %v5115_v7, %v8630_v39  ;;  %v3514_v0 = vpop.f32.mrb[105].mxu1  ;;  %5780 = vpow2.f32 %v3613_v43  ;;  %v3635_v52 = vmul.f32 0.6931472, %v5769_v2 }
 0x535   :  { %v8704_v17 = vadd.f32 %v8630_v39, %v3514_v0  ;;  %v8706_v18 = vpop.eup %5770  ;;  %v3650_v25 = vsel %vm8690_vm5, %v3647_v55, %v3644_v24 }
 0x536   :  { %v8711_v56 = vmul.f32 0.5, %v8701_v14  ;;  %v8713_v29 = vpop.eup %5772  ;;  %v3778_v12 = vmul.f32 2.0, %v3650_v25  ;;  %v3641_v49 = vsel %vm8696_vm6, %v3638_v16, %v3635_v52  ;;  %v3678_v46 = vadd.f32 1.0, %v8706_v18 }
 0x537   :  { %v8716_v28 = vmul.f32 0.5, %v8704_v17  ;;  %v3777_v53 = vmul.f32 2.0, %v3641_v49  ;;  %v3669_v27 = vadd.f32 1.0, %v8713_v29  ;;  %v3681_v8 = vmul.f32 -0.5, %v8706_v18 }
 0x538   :  { %v3594_v44 = vmin.f32 %v8711_v56, 14.0  ;;  %v3794_v35 = vsel %vm3570_vm7, %v8633_v19, %v3778_v12  ;;  %v3675_v40 = vand.u32 2147483647, %v8713_v29  ;;  %v3684_v25 = vand.u32 2147483647, %v8706_v18 }
 0x539   :  { %v3593_v9 = vmin.f32 %v8716_v28, 14.0  ;;  %v3793_v13 = vsel %vm3569_vm9, %v8636_v1, %v3777_v53  ;;  %5782 = vlog2.f32 %v3669_v27  ;;  %v3672_v1 = vmul.f32 -0.5, %v8713_v29 }
 0x53a   :  { %v3619_v30 = vmul.f32 1.442695, %v3594_v44  ;;  %v5775_v4 = vpop.eup %5774  ;;  %5157 = vmatprep.mubr.f32.mxu0 %v3793_v13  ;;  %5784 = vlog2.f32 %v3678_v46  ;;  %v3682_v16 = vadd.f32 1.0, %v3681_v8  ;;  %vm8765_vm0 = vcmp.lt.f32.partialorder %v3675_v40, 0.0004427343 }
 0x53b   :  { %v3617_v57 = vmul.f32 1.442695, %v3593_v9  ;;  %v5118_v23 = vpop.f32.mrb[106].mxu1  ;;  %v5777_v31 = vpop.eup %5776  ;;  %5158 = vmatmul.mubr.f32.vlgmr.msra.gmra.mrb[112].mxu0 %v3794_v35  ;;  %v3662_v59 = vmul.f32 0.6931472, %v5775_v4  ;;  %v3673_v2 = vadd.f32 1.0, %v3672_v1 }
 0x53c   :  { %5786 = vpow2.f32 %v3619_v30  ;;  %v8735_v6 = vadd.f32 %v5118_v23, %v8630_v39  ;;  %v3524_v21 = vpop.f32.mrb[107].mxu1  ;;  %v3653_v19 = vmul.f32 0.6931472, %v5777_v31  ;;  %vm8779_vm8 = vcmp.lt.f32.partialorder %v3684_v25, 0.0004427343 }
 0x53d   :  { %5788 = vpow2.f32 %v3617_v57  ;;  %v8739_v51 = vadd.f32 %v8630_v39, %v3524_v21  ;;  %v8742_v32 = vpop.eup %5778  ;;  %v3668_v63 = vsel %vm8727_vm10, %v3665_v45, %v3662_v59  ;;  %v3674_v3 = vmul.f32 %v8713_v29, %v3673_v2 }
 0x53e   :  { %v8745_v11 = vmul.f32 0.5, %v8735_v6  ;;  %v5781_v20 = vpop.eup %5780  ;;  %v3659_v48 = vsel %vm3658_vm14, %v3656_v50, %v3653_v19  ;;  %v3780_v55 = vmul.f32 2.0, %v3668_v63  ;;  %v3696_v43 = vadd.f32 1.0, %v8742_v32 }
 0x53f   :  { %v8751_v36 = vmul.f32 0.5, %v8739_v51  ;;  %v3779_v15 = vmul.f32 2.0, %v3659_v48  ;;  %v3687_v24 = vadd.f32 1.0, %v5781_v20  ;;  %v3690_v49 = vmul.f32 -0.5, %v5781_v20 }
 0x540   :  { %v3596_v7 = vmin.f32 %v8745_v11, 14.0  ;;  %v3796_v60 = vsel %vm3572_vm12, %v8647_v41, %v3780_v55  ;;  %v3699_v41 = vmul.f32 -0.5, %v8742_v32  ;;  %v3693_v61 = vand.u32 2147483647, %v5781_v20 }
 0x541   :  { %v3595_v0 = vmin.f32 %v8751_v36, 14.0  ;;  %v3795_v52 = vsel %vm3571_vm15, %v8650_v33, %v3779_v15  ;;  %5790 = vlog2.f32 %v3687_v24  ;;  %v3683_v29 = vmul.f32 %v8706_v18, %v3682_v16 }
 0x542   :  { %v3623_v38 = vmul.f32 1.442695, %v3596_v7  ;;  %5160 = vmatprep.mubr.f32.mxu0 %v3795_v52  ;;  %5792 = vlog2.f32 %v3696_v43  ;;  %v3691_v23 = vadd.f32 1.0, %v3690_v49  ;;  %v3700_v21 = vadd.f32 1.0, %v3699_v41 }
 0x543   :  { %v3621_v10 = vmul.f32 1.442695, %v3595_v0  ;;  %v5783_v46 = vpop.eup %5782  ;;  %5161 = vmatmul.mubr.f32.gmra.mrb[114].mxu0 %v3796_v60  ;;  %vm8796_vm1 = vcmp.lt.f32.partialorder %v3693_v61, 0.0004427343  ;;  %v3702_v7 = vand.u32 2147483647, %v8742_v32 }
 0x544   :  { %v5121_v12 = vpop.f32.mrb[108].mxu1  ;;  %v5785_v53 = vpop.eup %5784  ;;  %v3671_v9 = vmul.f32 0.6931472, %v5783_v46  ;;  %v3692_v43 = vmul.f32 %v5781_v20, %v3691_v23  ;;  %v3701_v0 = vmul.f32 %v8742_v32, %v3700_v21  ;;  %vm3577_vm7 = vcmp.gt.f32.partialorder %v8716_v28, 14.0 }
 0x545   :  { %v8762_v44 = vadd.f32 %v5121_v12, %v8630_v39  ;;  %v3534_v22 = vpop.f32.mrb[109].mxu1  ;;  %5794 = vpow2.f32 %v3621_v10  ;;  %v3680_v13 = vmul.f32 0.6931472, %v5785_v53  ;;  %vm3703_vm3 = vcmp.lt.f32.partialorder %v3702_v7, 0.0004427343 }
 0x546   :  { %v8771_v27 = vadd.f32 %v8630_v39, %v3534_v22  ;;  %v8773_v62 = vpop.eup %5786  ;;  %5796 = vpow2.f32 %v3623_v38  ;;  %v3677_v31 = vsel %vm8765_vm0, %v3674_v3, %v3671_v9  ;;  %vm3578_vm9 = vcmp.gt.f32.partialorder %v8711_v56, 14.0 }
 0x547   :  { %v8776_v30 = vmul.f32 0.5, %v8762_v44  ;;  %v8783_v4 = vpop.eup %5788  ;;  %v3714_v35 = vadd.f32 1.0, %v8773_v62  ;;  %v3686_v18 = vsel %vm8779_vm8, %v3683_v29, %v3680_v13  ;;  %v3781_v8 = vmul.f32 2.0, %v3677_v31 }
 0x548   :  { %v8787_v57 = vmul.f32 0.5, %v8771_v27  ;;  %v3782_v63 = vmul.f32 2.0, %v3686_v18  ;;  %v3705_v40 = vadd.f32 1.0, %v8783_v4  ;;  %v3717_v60 = vmul.f32 -0.5, %v8773_v62 }
 0x549   :  { %v3598_v50 = vmin.f32 %v8776_v30, 14.0  ;;  %5798 = vlog2.f32 %v3714_v35  ;;  %v3797_v2 = vsel %vm3573_vm11, %v8664_v42, %v3781_v8  ;;  %v3708_v33 = vmul.f32 -0.5, %v8783_v4 }
 0x54a   :  { %v3597_v59 = vmin.f32 %v8787_v57, 14.0  ;;  %5163 = vmatprep.mubr.f32.mxu0 %v3797_v2  ;;  %v3798_v5 = vsel %vm3574_vm2, %v8661_v58, %v3782_v63  ;;  %v3718_v41 = vadd.f32 1.0, %v3717_v60  ;;  %v3720_v61 = vand.u32 2147483647, %v8773_v62 }
 0x54b   :  { %v3627_v19 = vmul.f32 1.442695, %v3598_v50  ;;  %v5791_v15 = vpop.eup %5790  ;;  %5164 = vmatmul.mubr.f32.gmra.mrb[116].mxu0 %v3798_v5  ;;  %v3709_v35 = vadd.f32 1.0, %v3708_v33  ;;  %v3711_v31 = vand.u32 2147483647, %v8783_v4  ;;  %vm3579_vm14 = vcmp.gt.f32.partialorder %v8751_v36, 14.0 }
 0x54c   :  { %v3625_v48 = vmul.f32 1.442695, %v3597_v59  ;;  %v5124_v55 = vpop.f32.mrb[110].mxu1  ;;  %v5793_v16 = vpop.eup %5792  ;;  %v3689_v20 = vmul.f32 0.6931472, %v5791_v15  ;;  %vm3580_vm12 = vcmp.gt.f32.partialorder %v8745_v11, 14.0 }
 0x54d   :  { %5800 = vpow2.f32 %v3627_v19  ;;  %v8804_v37 = vadd.f32 %v5124_v55, %v8630_v39  ;;  %v3544_v24 = vpop.f32.mrb[111].mxu1  ;;  %v3698_v38 = vmul.f32 0.6931472, %v5793_v16  ;;  %vm3721_vm5 = vcmp.lt.f32.partialorder %v3720_v61, 0.0004427343 }
 0x54e   :  { %5802 = vpow2.f32 %v3625_v48  ;;  %v8809_v52 = vadd.f32 %v8630_v39, %v3544_v24  ;;  %v3695_v39 = vsel %vm8796_vm1, %v3692_v43, %v3689_v20  ;;  %v3710_v63 = vmul.f32 %v8783_v4, %v3709_v35 }
 0x54f   :  { %v8814_v25 = vmul.f32 0.5, %v8804_v37  ;;  %5804 = vlog2.f32 %v3705_v40  ;;  %v5795_v42 = vpop.eup %5794  ;;  %v3783_v10 = vmul.f32 2.0, %v3695_v39  ;;  %v3704_v12 = vsel %vm3703_vm3, %v3701_v0, %v3698_v38 }
 0x550   :  { %v8817_v32 = vmul.f32 0.5, %v8809_v52  ;;  %v3723_v49 = vadd.f32 1.0, %v5795_v42  ;;  %v8823_v46 = vpop.eup %5796  ;;  %v3784_v3 = vmul.f32 2.0, %v3704_v12  ;;  %v3726_v23 = vmul.f32 -0.5, %v5795_v42 }
 0x551   :  { %v3600_v58 = vmin.f32 %v8814_v25, 14.0  ;;  %v3799_v53 = vsel %vm3575_vm13, %v8678_v26, %v3783_v10  ;;  %v3732_v54 = vadd.f32 1.0, %v8823_v46  ;;  %v3719_v26 = vmul.f32 %v8773_v62, %v3718_v41 }
 0x552   :  { %v3599_v22 = vmin.f32 %v8817_v32, 14.0  ;;  %5806 = vlog2.f32 %v3723_v49  ;;  %5166 = vmatprep.mubr.f32.mxu0 %v3799_v53  ;;  %v3800_v29 = vsel %vm3576_vm4, %v8675_v47, %v3784_v3  ;;  %v3735_v1 = vmul.f32 -0.5, %v8823_v46 }
 0x553   :  { %v3631_v34 = vmul.f32 1.442695, %v3600_v58  ;;  %v5799_v9 = vpop.eup %5798  ;;  %5167 = vmatmul.mubr.f32.gmra.mrb[118].mxu0 %v3800_v29  ;;  %v3727_v40 = vadd.f32 1.0, %v3726_v23  ;;  %vm3712_vm6 = vcmp.lt.f32.partialorder %v3711_v31, 0.0004427343  ;;  %vm3581_vm11 = vcmp.gt.f32.partialorder %v8787_v57, 14.0 }
 0x554   :  { %v3629_v13 = vmul.f32 1.442695, %v3599_v22  ;;  %v3716_v45 = vmul.f32 0.6931472, %v5799_v9  ;;  %v3729_v62 = vand.u32 2147483647, %v5795_v42 }
 0x555   :  { %5808 = vpow2.f32 %v3631_v34  ;;  %v3736_v15 = vadd.f32 1.0, %v3735_v1  ;;  %v3728_v0 = vmul.f32 %v5795_v42, %v3727_v40  ;;  %v3738_v20 = vand.u32 2147483647, %v8823_v46 }
 0x556   :  { %5810 = vpow2.f32 %v3629_v13  ;;  %v3722_v59 = vsel %vm3721_vm5, %v3719_v26, %v3716_v45  ;;  %vm3730_vm10 = vcmp.lt.f32.partialorder %v3729_v62, 0.0004427343  ;;  %vm3582_vm1 = vcmp.gt.f32.partialorder %v8776_v30, 14.0 }
 0x557   :  { %v8832_v50 = vpop.eup %5800  ;;  %5812 = vlog2.f32 %v3732_v54  ;;  %v3786_v48 = vmul.f32 2.0, %v3722_v59  ;;  %v3737_v10 = vmul.f32 %v8823_v46, %v3736_v15  ;;  %vm3739_vm15 = vcmp.lt.f32.partialorder %v3738_v20, 0.0004427343 }
 0x558   :  { %v8836_v18 = vpop.eup %5802  ;;  %v3750_v47 = vadd.f32 1.0, %v8832_v50  ;;  %v3753_v2 = vmul.f32 -0.5, %v8832_v50  ;;  %v3756_v22 = vand.u32 2147483647, %v8832_v50  ;;  %vm3583_vm3 = vcmp.gt.f32.partialorder %v8817_v32, 14.0 }
 0x559   :  { %v5805_v21 = vpop.eup %5804  ;;  %v3741_v19 = vadd.f32 1.0, %v8836_v18  ;;  %v3744_v16 = vmul.f32 -0.5, %v8836_v18  ;;  %v3802_v38 = vsel %vm3578_vm9, %v8701_v14, %v3786_v48  ;;  %v3747_v14 = vand.u32 2147483647, %v8836_v18 }
 0x55a   :  { %v3707_v8 = vmul.f32 0.6931472, %v5805_v21  ;;  %5814 = vlog2.f32 %v3750_v47  ;;  %v3754_v12 = vadd.f32 1.0, %v3753_v2  ;;  %vm3757_vm0 = vcmp.lt.f32.partialorder %v3756_v22, 0.0004427343 }
 0x55b   :  { %5816 = vlog2.f32 %v3741_v19  ;;  %vm3748_vm8 = vcmp.lt.f32.partialorder %v3747_v14, 0.0004427343  ;;  %vm3584_vm4 = vcmp.gt.f32.partialorder %v8814_v25, 14.0 }
 0x55c   :  { %v3713_v55 = vsel %vm3712_vm6, %v3710_v63, %v3707_v8  ;;  %v5807_v43 = vpop.eup %5806  ;;  %v3755_v53 = vmul.f32 %v8832_v50, %v3754_v12 }
 0x55d   :  { %v3785_v7 = vmul.f32 2.0, %v3713_v55  ;;  %v3725_v24 = vmul.f32 0.6931472, %v5807_v43 }
 0x55f   :  { %v5809_v5 = vpop.eup %5808  ;;  %v3801_v4 = vsel %vm3577_vm7, %v8704_v17, %v3785_v7  ;;  %v3731_v39 = vsel %vm3730_vm10, %v3728_v0, %v3725_v24  ;;  %v3745_v17 = vadd.f32 1.0, %v3744_v16 }
 0x560   :  { %v5811_v60 = vpop.eup %5810  ;;  %5169 = vmatprep.mubr.f32.mxu1 %v3801_v4  ;;  %v3768_v28 = vadd.f32 1.0, %v5809_v5  ;;  %v3787_v42 = vmul.f32 2.0, %v3731_v39  ;;  %v3771_v9 = vmul.f32 -0.5, %v5809_v5  ;;  %v3774_v31 = vand.u32 2147483647, %v5809_v5 }
 0x561   :  { %v5813_v58 = vpop.eup %5812  ;;  %5170 = vmatmul.mubr.f32.vlgmr.msra.gmra.mrb[112].mxu1 %v3802_v38  ;;  %v3759_v56 = vadd.f32 1.0, %v5811_v60  ;;  %v3746_v13 = vmul.f32 %v8836_v18, %v3745_v17  ;;  %v3765_v18 = vand.u32 2147483647, %v5811_v60 }
 0x562   :  { %v3734_v49 = vmul.f32 0.6931472, %v5813_v58  ;;  %5818 = vlog2.f32 %v3768_v28  ;;  %v3803_v3 = vsel %vm3579_vm14, %v8739_v51, %v3787_v42  ;;  %v3762_v51 = vmul.f32 -0.5, %v5811_v60 }
 0x563   :  { %5820 = vlog2.f32 %v3759_v56  ;;  %5172 = vmatprep.mubr.f32.mxu1 %v3803_v3  ;;  %v3772_v23 = vadd.f32 1.0, %v3771_v9  ;;  %vm3775_vm2 = vcmp.lt.f32.partialorder %v3774_v31, 0.0004427343  ;;  %vm3766_vm13 = vcmp.lt.f32.partialorder %v3765_v18, 0.0004427343 }
 0x564   :  { %v5815_v36 = vpop.eup %5814  ;;  %v3740_v33 = vsel %vm3739_vm15, %v3737_v10, %v3734_v49  ;;  %v3763_v26 = vadd.f32 1.0, %v3762_v51 }
 0x565   :  { %v5817_v41 = vpop.eup %5816  ;;  %v3788_v46 = vmul.f32 2.0, %v3740_v33  ;;  %v3752_v34 = vmul.f32 0.6931472, %v5815_v36  ;;  %v3773_v1 = vmul.f32 %v5809_v5, %v3772_v23 }
 0x566   :  { %v3743_v61 = vmul.f32 0.6931472, %v5817_v41  ;;  %v3764_v8 = vmul.f32 %v5811_v60, %v3763_v26 }
 0x567   :  { %v3804_v29 = vsel %vm3580_vm12, %v8735_v6, %v3788_v46  ;;  %v3758_v45 = vsel %vm3757_vm0, %v3755_v53, %v3752_v34 }
 0x568   :  { %5173 = vmatmul.mubr.f32.gmra.mrb[114].mxu1 %v3804_v29  ;;  %v3749_v54 = vsel %vm3748_vm8, %v3746_v13, %v3743_v61  ;;  %v3790_v35 = vmul.f32 2.0, %v3758_v45 }
 0x569   :  { %v3789_v11 = vmul.f32 2.0, %v3749_v54 }
 0x56a   :  { %v3806_v6 = vsel %vm3582_vm1, %v8762_v44, %v3790_v35 }
 0x56b   :  { %v3805_v50 = vsel %vm3581_vm11, %v8771_v27, %v3789_v11 }
 0x56c   :  { %v5819_v47 = vpop.eup %5818  ;;  %5175 = vmatprep.mubr.f32.mxu1 %v3805_v50 }
 0x56d   :  { %v5821_v21 = vpop.eup %5820  ;;  %5176 = vmatmul.mubr.f32.gmra.mrb[116].mxu1 %v3806_v6  ;;  %v3770_v59 = vmul.f32 0.6931472, %v5819_v47 }
 0x56e   :  { %v3761_v19 = vmul.f32 0.6931472, %v5821_v21 }
 0x56f   :  { %v3776_v57 = vsel %vm3775_vm2, %v3773_v1, %v3770_v59 }
 0x570   :  { %v3767_v63 = vsel %vm3766_vm13, %v3764_v8, %v3761_v19  ;;  %v3792_v40 = vmul.f32 2.0, %v3776_v57 }
 0x571   :  { %v3791_v62 = vmul.f32 2.0, %v3767_v63 }
 0x572   :  { %v3808_v44 = vsel %vm3584_vm4, %v8804_v37, %v3792_v40 }
 0x573   :  { %v3807_v27 = vsel %vm3583_vm3, %v8809_v52, %v3791_v62 }
 0x574   :  { %5178 = vmatprep.mubr.f32.mxu1 %v3807_v27 }
 0x575   :  { %5179 = vmatmul.mubr.f32.gmra.mrb[118].mxu1 %v3808_v44 }
 0x576   :  { %6033 = shalt.err (!%p6030_p6)
}
 0x577   :  { %s6034_s22 = scalar_lea.hbm %s8937_s20, 4096 }
 0x578   :  { %p6035_p7 = scmp.ne.s32.totalorder %s8937_s20, %s6034_s22  ;;  %p6038_p8 = scmp.lt.u32.totalorder %s6034_s22, %s8937_s20 }
 0x57a   :  { %p6040_p9 = pnand %p6038_p8, %p6035_p7 }
 0x57c   :  { %6043 = shalt.err (!%p6040_p9)
}
 0x57d   :  { %4048 = dma.vmem_to_hbm [thread:$0]  %s4043_s11, 4096, %s8937_s20, [#allocation21], %s6082_s0, %s6082_s0, %s6083_s21   ;;  %v3810_v37 = vld [vmem:[#allocation4 + $0x8] sm:$0xff]  ;;  %v3809_v32 = vld [vmem:[#allocation4] sm:$0xff]  ;;  %v3812_v15 = vld [vmem:[#allocation4 + $0x18] sm:$0xff] }
 0x57e   :  { %v8884_v30 = vld [vmem:[%s8935_s18] ss:$0 sm:$0xff]  ;;  %v3811_v0 = vld [vmem:[#allocation4 + $0x10] sm:$0xff]  ;;  %v3814_v60 = vld [vmem:[#allocation4 + $0x28] sm:$0xff]  ;;  %s6094_s18 = smov [#allocation19]  }
 0x57f   :  { %v3813_v28 = vld [vmem:[#allocation4 + $0x20] sm:$0xff]  ;;  %v3816_v56 = vld [vmem:[#allocation4 + $0x38] sm:$0xff]  ;;  %v3815_v22 = vld [vmem:[#allocation4 + $0x30] sm:$0xff]  ;;  %s4030_s20 = sshll.u32 %s6094_s18, 4  ;;  %s4031_s20 = int_to_ptr.vmem [resolvable:$true] %s4030_s20 }
 0x580   :  { %v3818_v41 = vld [vmem:[#allocation4 + $0x48] sm:$0xff]  ;;  %v3817_v53 = vld [vmem:[#allocation4 + $0x40] sm:$0xff]  ;;  %v3820_v29 = vld [vmem:[#allocation4 + $0x58] sm:$0xff]  ;;  %s6044_s6 = scalar_lea.vmem %s4031_s20, 2048  ;;  %p6049_p11 = scmp.lt.s32.totalorder %s4031_s20, %s4031_s20 }
 0x581   :  { %v3819_v35 = vld [vmem:[#allocation4 + $0x50] sm:$0xff]  ;;  %v3822_v50 = vld [vmem:[#allocation4 + $0x68] sm:$0xff]  ;;  %v3821_v6 = vld [vmem:[#allocation4 + $0x60] sm:$0xff]  ;;  %p6045_p10 = scmp.ne.s32.totalorder %s4031_s20, %s6044_s6  ;;  %p6050_p12 = scmp.lt.s32.totalorder %s6044_s6, %s6044_s6 }
 0x582   :  { %v3824_v8 = vld [vmem:[#allocation4 + $0x78] sm:$0xff]  ;;  %v3823_v40 = vld [vmem:[#allocation4 + $0x70] sm:$0xff] }
 0x583   :  { %p6051_p13 = por %p6050_p12, %p6049_p11 }
 0x585   :  { %p6052_p0 = pnand %p6051_p13, %p6045_p10 }
 0x60e   :  { %v5159_v52 = vpop.f32.mrb[112].mxu0 }
 0x60f   :  { %v3920_v25 = vadd.f32 %v5159_v52, %v8884_v30  ;;  %v3914_v48 = vpop.f32.mrb[113].mxu0 }
 0x610   :  { %v3915_v55 = vadd.f32 %v8884_v30, %v3914_v48 }
 0x611   :  { %v3994_v43 = vadd.f32 %v3920_v25, %v3810_v37 }
 0x612   :  { %v3993_v7 = vadd.f32 %v3915_v55, %v3809_v32 }
 0x613   :  { %4010 = vst [vmem:[#allocation19 + $0x8] sm:$0xff] %v3994_v43 }
 0x614   :  { %4009 = vst [vmem:[#allocation19] sm:$0xff] %v3993_v7 }
 0x616   :  { %v5162_v2 = vpop.f32.mrb[114].mxu0 }
 0x617   :  { %v3930_v24 = vadd.f32 %v5162_v2, %v8884_v30  ;;  %v3924_v16 = vpop.f32.mrb[115].mxu0 }
 0x618   :  { %v3925_v5 = vadd.f32 %v8884_v30, %v3924_v16 }
 0x619   :  { %v3996_v4 = vadd.f32 %v3930_v24, %v3812_v15 }
 0x61a   :  { %v3995_v20 = vadd.f32 %v3925_v5, %v3811_v0 }
 0x61b   :  { %4012 = vst [vmem:[#allocation19 + $0x18] sm:$0xff] %v3996_v4 }
 0x61c   :  { %4011 = vst [vmem:[#allocation19 + $0x10] sm:$0xff] %v3995_v20 }
 0x61e   :  { %v5165_v38 = vpop.f32.mrb[116].mxu0 }
 0x61f   :  { %v3940_v39 = vadd.f32 %v5165_v38, %v8884_v30  ;;  %v3934_v58 = vpop.f32.mrb[117].mxu0 }
 0x620   :  { %v3935_v42 = vadd.f32 %v8884_v30, %v3934_v58 }
 0x621   :  { %v3998_v10 = vadd.f32 %v3940_v39, %v3814_v60 }
 0x622   :  { %v3997_v12 = vadd.f32 %v3935_v42, %v3813_v28 }
 0x623   :  { %4014 = vst [vmem:[#allocation19 + $0x28] sm:$0xff] %v3998_v10 }
 0x624   :  { %4013 = vst [vmem:[#allocation19 + $0x20] sm:$0xff] %v3997_v12 }
 0x626   :  { %v5168_v49 = vpop.f32.mrb[118].mxu0 }
 0x627   :  { %v3950_v17 = vadd.f32 %v5168_v49, %v8884_v30  ;;  %v3944_v3 = vpop.f32.mrb[119].mxu0 }
 0x628   :  { %v3945_v14 = vadd.f32 %v8884_v30, %v3944_v3 }
 0x629   :  { %v4000_v36 = vadd.f32 %v3950_v17, %v3816_v56 }
 0x62a   :  { %v3999_v33 = vadd.f32 %v3945_v14, %v3815_v22 }
 0x62b   :  { %4016 = vst [vmem:[#allocation19 + $0x38] sm:$0xff] %v4000_v36 }
 0x62c   :  { %4015 = vst [vmem:[#allocation19 + $0x30] sm:$0xff] %v3999_v33 }
 0x634   :  { %v5171_v46 = vpop.f32.mrb[112].mxu1 }
 0x635   :  { %v3960_v34 = vadd.f32 %v5171_v46, %v8884_v30  ;;  %v3954_v9 = vpop.f32.mrb[113].mxu1 }
 0x636   :  { %v3955_v61 = vadd.f32 %v8884_v30, %v3954_v9 }
 0x637   :  { %v4002_v13 = vadd.f32 %v3960_v34, %v3818_v41 }
 0x638   :  { %v4001_v51 = vadd.f32 %v3955_v61, %v3817_v53 }
 0x639   :  { %4018 = vst [vmem:[#allocation19 + $0x48] sm:$0xff] %v4002_v13 }
 0x63a   :  { %4017 = vst [vmem:[#allocation19 + $0x40] sm:$0xff] %v4001_v51 }
 0x63b   :  { %v5174_v45 = vpop.f32.mrb[114].mxu1 }
 0x63c   :  { %v3970_v54 = vadd.f32 %v5174_v45, %v8884_v30  ;;  %v3964_v11 = vpop.f32.mrb[115].mxu1 }
 0x63d   :  { %v3965_v23 = vadd.f32 %v8884_v30, %v3964_v11 }
 0x63e   :  { %v4004_v26 = vadd.f32 %v3970_v54, %v3820_v29 }
 0x63f   :  { %v4003_v31 = vadd.f32 %v3965_v23, %v3819_v35 }
 0x640   :  { %4020 = vst [vmem:[#allocation19 + $0x58] sm:$0xff] %v4004_v26  ;;  %v5177_v18 = vpop.f32.mrb[116].mxu1 }
 0x641   :  { %4019 = vst [vmem:[#allocation19 + $0x50] sm:$0xff] %v4003_v31  ;;  %v3980_v47 = vadd.f32 %v5177_v18, %v8884_v30  ;;  %v3974_v21 = vpop.f32.mrb[117].mxu1 }
 0x642   :  { %v3975_v59 = vadd.f32 %v8884_v30, %v3974_v21 }
 0x643   :  { %v4006_v1 = vadd.f32 %v3980_v47, %v3822_v50 }
 0x644   :  { %v4005_v19 = vadd.f32 %v3975_v59, %v3821_v6 }
 0x645   :  { %4022 = vst [vmem:[#allocation19 + $0x68] sm:$0xff] %v4006_v1 }
 0x646   :  { %4021 = vst [vmem:[#allocation19 + $0x60] sm:$0xff] %v4005_v19 }
 0x648   :  { %v5180_v57 = vpop.f32.mrb[118].mxu1 }
 0x649   :  { %v3990_v63 = vadd.f32 %v5180_v57, %v8884_v30  ;;  %v3984_v62 = vpop.f32.mrb[119].mxu1 }
 0x64a   :  { %v3985_v27 = vadd.f32 %v8884_v30, %v3984_v62 }
 0x64b   :  { %v4008_v44 = vadd.f32 %v3990_v63, %v3824_v8 }
 0x64c   :  { %v4007_v37 = vadd.f32 %v3985_v27, %v3823_v40 }
 0x64d   :  { %4024 = vst [vmem:[#allocation19 + $0x78] sm:$0xff] %v4008_v44 }
 0x64e   :  { %4023 = vst [vmem:[#allocation19 + $0x70] sm:$0xff] %v4007_v37 }
 0x64f   :  { %6055 = shalt.err (!%p6052_p0)
}
 0x650   :  { %s9272_s15 = sld [smem:[#allocation75_spill]] }
 0x656   :  { %s6056_s17 = scalar_lea.hbm %s9272_s15, 2048 }
 0x657   :  { %p6057_p1 = scmp.ne.s32.totalorder %s9272_s15, %s6056_s17  ;;  %p6060_p2 = scmp.lt.u32.totalorder %s6056_s17, %s9272_s15 }
 0x659   :  { %p6062_p3 = pnand %p6060_p2, %p6057_p1 }
 0x65b   :  { %6065 = shalt.err (!%p6062_p3)
}
 0x65c   :  { %4036 = dma.vmem_to_hbm [thread:$0]  %s4031_s20, 2048, %s9272_s15, [#allocation6], %s6082_s0, %s6082_s0, %s6083_s21  }
 0x65d   :  { %6076 = dma.done.wait [#allocation6], 2048  }
 0x65e   :  { %6077 = vsyncadd [#allocation6], 4294965248 }
 0x65f   :  { %6078 = dma.done.wait [#allocation21], 4096  }
 0x660   :  { %6079 = vsyncadd [#allocation21], 4294963200 }
 0x661   :  { %4055 = vsyncpa [#allocation5], 1 }
 0x662   :  { %4056 = vsyncpa [#allocation8], 1 }
 0x663   :  { %4057 = vsyncpa [#allocation11], 1 }
 0x664   :  { %4058 = vsyncpa [#allocation14], 1 }
 0x665   :  { %4059 = vsyncpa [#allocation17], 1 }
 0x666   :  { %4060 = vsyncpa [#allocation6], 1 }
 0x667   :  { %4061 = vsyncpa [#allocation21], 1 }

</bundles_post_ra>
